<compile_context>
chip_gen: v7x
topology: tpu7x:2x2x1
jax: 0.10.0
libtpu: 0.0.40
codegen_flags: <defaults>
</compile_context>

<pallas_src>
import functools

import jax
import jax.numpy as jnp
from jax import lax
from jax.experimental import pallas as pl
from jax.experimental.pallas import tpu as pltpu


# k_size -> (taps of conv0h/conv0v, taps of conv_spatial_h/v, spatial dilation)
_LSKA_CFG = {
    7:  dict(k0=3, ks=3,  ds=2),
    11: dict(k0=3, ks=5,  ds=2),
    23: dict(k0=5, ks=7,  ds=3),
    35: dict(k0=5, ks=11, ds=3),
    41: dict(k0=5, ks=13, ds=3),
    53: dict(k0=5, ks=17, ds=3),
}


def _lska_kernel(x_ref, wh0_ref, bh0_ref, wv0_ref, bv0_ref,
                 whs_ref, bhs_ref, wvs_ref, bvs_ref, w1_ref, b1_ref,
                 o_ref, buf_ref, *, H, W, d0, ds, P):
    HW = H * W
    C = x_ref.shape[2]
    x = x_ref[0]                                   # (HW, C): pixels on sublanes, channels on lanes

    # Zero the halo pads of the staging buffer (done every step -> megacore safe).
    buf_ref[0:P, :] = jnp.zeros((P, C), jnp.float32)
    buf_ref[P + HW:P + HW + P, :] = jnp.zeros((P, C), jnp.float32)

    # Column (W) index of every flattened pixel, for W-direction edge masks.
    wi = lax.broadcasted_iota(jnp.int32, (HW, C), 0) % W

    def dw_conv(v, w_ref, b_ref, dil, along_w):
        """Depthwise 'same' conv with K taps along W (along_w) or H, per-channel weights."""
        K = w_ref.shape[0]
        half = (K - 1) // 2
        buf_ref[P:P + HW, :] = v                   # stage between the zero halos (aligned store)
        acc = jnp.zeros_like(v)
        for k in range(K):                         # static unroll: K in {3,5,...}
            step = (k - half) * dil
            off = step if along_w else step * W
            tap = buf_ref[P + off:P + off + HW, :]
            if along_w and step != 0:
                valid = jnp.logical_and(wi + step >= 0, wi + step < W)
                tap = jnp.where(valid, tap, 0.0)
            acc = acc + tap * w_ref[k:k + 1, :]
        return acc + b_ref[...]

    # attn = conv1(conv_spatial_v(conv_spatial_h(conv0v(conv0h(x)))))
    a = dw_conv(x, wh0_ref, bh0_ref, d0, True)     # conv0h  (1 x k0)
    a = dw_conv(a, wv0_ref, bv0_ref, d0, False)    # conv0v  (k0 x 1)
    a = dw_conv(a, whs_ref, bhs_ref, ds, True)     # conv_spatial_h (1 x ks, dilated)
    a = dw_conv(a, wvs_ref, bvs_ref, ds, False)    # conv_spatial_v (ks x 1, dilated)

    # conv1: dense 1x1 conv == one lane-dense (HW, C) x (C, C) MXU matmul.
    a = jnp.dot(a, w1_ref[...], preferred_element_type=jnp.float32) + b1_ref[...]

    # return u * attn
    o_ref[0] = x * a


def lska_forward(x_nchw, params, k_size=7):
    """PyTorch-facing wrapper: NCHW in, NCHW out."""
    cfg = _LSKA_CFG[k_size]
    N, C, H, W = x_nchw.shape
    HW = H * W
    half0 = (cfg['k0'] - 1) // 2
    halfs = (cfg['ks'] - 1) // 2
    max_off = max(half0, half0 * W, halfs * cfg['ds'], halfs * cfg['ds'] * W)
    P = -(-max_off // 8) * 8                       # halo rounded up to a sublane multiple

    # channels-last compute layout (pixels on sublanes, channels on the 128 lanes)
    x_pc = jnp.transpose(x_nchw, (0, 2, 3, 1)).reshape(N, HW, C).astype(jnp.float32)

    kernel = functools.partial(_lska_kernel, H=H, W=W, d0=1, ds=cfg['ds'], P=P)
    out = pl.pallas_call(
        kernel,
        out_shape=jax.ShapeDtypeStruct((N, HW, C), jnp.float32),
        grid_spec=pltpu.PrefetchScalarGridSpec(
            num_scalar_prefetch=0,
            grid=(N,),
            in_specs=[
                pl.BlockSpec((1, HW, C), lambda n: (n, 0, 0)),    # x
                pl.BlockSpec((cfg['k0'], C), lambda n: (0, 0)),   # conv0h weight (taps, C)
                pl.BlockSpec((1, C), lambda n: (0, 0)),           # conv0h bias
                pl.BlockSpec((cfg['k0'], C), lambda n: (0, 0)),   # conv0v weight
                pl.BlockSpec((1, C), lambda n: (0, 0)),           # conv0v bias
                pl.BlockSpec((cfg['ks'], C), lambda n: (0, 0)),   # conv_spatial_h weight
                pl.BlockSpec((1, C), lambda n: (0, 0)),           # conv_spatial_h bias
                pl.BlockSpec((cfg['ks'], C), lambda n: (0, 0)),   # conv_spatial_v weight
                pl.BlockSpec((1, C), lambda n: (0, 0)),           # conv_spatial_v bias
                pl.BlockSpec((C, C), lambda n: (0, 0)),           # conv1 weight (Cin, Cout)
                pl.BlockSpec((1, C), lambda n: (0, 0)),           # conv1 bias
            ],
            out_specs=pl.BlockSpec((1, HW, C), lambda n: (n, 0, 0)),
            scratch_shapes=[pltpu.VMEM((HW + 2 * P, C), jnp.float32)],
        ),
        compiler_params=pltpu.CompilerParams(
            dimension_semantics=("parallel",),
            vmem_limit_bytes=32 * 1024 * 1024,
        ),
    )(x_pc, *params)
    return jnp.transpose(out.reshape(N, H, W, C), (0, 3, 1, 2))


# ---------------- pure-JAX reference (for correctness check) ----------------
def _dw_conv_ref(x, w_taps, b, kh, kw, dil):
    dim = x.shape[1]
    w = jnp.transpose(w_taps).reshape(dim, 1, kh, kw)   # (taps, C) -> OIHW depthwise
    pad_h = dil * (kh - 1) // 2
    pad_w = dil * (kw - 1) // 2
    y = lax.conv_general_dilated(
        x, w, window_strides=(1, 1),
        padding=[(pad_h, pad_h), (pad_w, pad_w)],
        rhs_dilation=(dil, dil),
        dimension_numbers=("NCHW", "OIHW", "NCHW"),
        feature_group_count=dim,
        precision=lax.Precision.HIGHEST)
    return y + b.reshape(1, dim, 1, 1)


def lska_ref(x, params, k_size=7):
    cfg = _LSKA_CFG[k_size]
    wh0, bh0, wv0, bv0, whs, bhs, wvs, bvs, w1, b1 = params
    a = _dw_conv_ref(x, wh0, bh0, 1, cfg['k0'], 1)
    a = _dw_conv_ref(a, wv0, bv0, cfg['k0'], 1, 1)
    a = _dw_conv_ref(a, whs, bhs, 1, cfg['ks'], cfg['ds'])
    a = _dw_conv_ref(a, wvs, bvs, cfg['ks'], 1, cfg['ds'])
    a = jnp.einsum('nihw,io->nohw', a, w1,
                   precision=lax.Precision.HIGHEST) + b1.reshape(1, -1, 1, 1)
    return x * a


if __name__ == "__main__":
    # dim=128 fills the 128-lane axis exactly (typical LSKA width in YOLO necks).
    N, DIM, H, W = 2, 128, 16, 16
    K_SIZE = 7
    cfg = _LSKA_CFG[K_SIZE]

    root = jax.random.PRNGKey(0)
    kx, k0h, k0v, ksh, ksv, kc1 = jax.random.split(root, 6)

    def dw_params(key, taps):
        kw_, kb_ = jax.random.split(key)
        w = jax.random.normal(kw_, (taps, DIM), jnp.float32) * (1.0 / taps)
        b = 0.1 * jax.random.normal(kb_, (1, DIM), jnp.float32)
        return w, b

    wh0, bh0 = dw_params(k0h, cfg['k0'])     # conv0h         (1 x 3)
    wv0, bv0 = dw_params(k0v, cfg['k0'])     # conv0v         (3 x 1)
    whs, bhs = dw_params(ksh, cfg['ks'])     # conv_spatial_h (1 x 3, dil 2)
    wvs, bvs = dw_params(ksv, cfg['ks'])     # conv_spatial_v (3 x 1, dil 2)
    k1w, k1b = jax.random.split(kc1)
    w1 = jax.random.normal(k1w, (DIM, DIM), jnp.float32) * (1.0 / DIM ** 0.5)
    b1 = 0.1 * jax.random.normal(k1b, (1, DIM), jnp.float32)
    params = (wh0, bh0, wv0, bv0, whs, bhs, wvs, bvs, w1, b1)

    x = jax.random.normal(kx, (N, DIM, H, W), jnp.float32)

    out = jax.block_until_ready(lska_forward(x, params, k_size=K_SIZE))
    ref = lska_ref(x, params, k_size=K_SIZE)

    assert out.shape == (N, DIM, H, W)
    max_err = float(jnp.max(jnp.abs(out - ref)))
    assert jnp.allclose(out, ref, atol=1e-3, rtol=1e-3), max_err
    print("KERNEL_OK")
</pallas_src>

<mosaic_0001>
module attributes {stable_mosaic.version = 11 : i64} {
  func.func @_lska_kernel(%arg0: i32, %arg1: memref<1x256x128xf32, #tpu.memory_space<vmem>>, %arg2: memref<3x128xf32, #tpu.memory_space<vmem>>, %arg3: memref<1x128xf32, #tpu.memory_space<vmem>>, %arg4: memref<3x128xf32, #tpu.memory_space<vmem>>, %arg5: memref<1x128xf32, #tpu.memory_space<vmem>>, %arg6: memref<3x128xf32, #tpu.memory_space<vmem>>, %arg7: memref<1x128xf32, #tpu.memory_space<vmem>>, %arg8: memref<3x128xf32, #tpu.memory_space<vmem>>, %arg9: memref<1x128xf32, #tpu.memory_space<vmem>>, %arg10: memref<128x128xf32, #tpu.memory_space<vmem>>, %arg11: memref<1x128xf32, #tpu.memory_space<vmem>>, %arg12: memref<1x256x128xf32, #tpu.memory_space<vmem>>, %arg13: memref<320x128xf32, #tpu.memory_space<vmem>>) attributes {dimension_semantics = [#tpu.dimension_semantics<parallel>], iteration_bounds = array<i64: 2>, scalar_prefetch = 0 : i64, scratch_operands = 1 : i64, tpu.core_type = #tpu.core_type<tc>, window_params = [{transform_indices = @transform_0, window_bounds = array<i64: 1, 256, 128>}, {pipeline_mode = #tpu.pipeline_mode<synchronous>, transform_indices = @transform_1, window_bounds = array<i64: 3, 128>}, {pipeline_mode = #tpu.pipeline_mode<synchronous>, transform_indices = @transform_2, window_bounds = array<i64: 1, 128>}, {pipeline_mode = #tpu.pipeline_mode<synchronous>, transform_indices = @transform_3, window_bounds = array<i64: 3, 128>}, {pipeline_mode = #tpu.pipeline_mode<synchronous>, transform_indices = @transform_4, window_bounds = array<i64: 1, 128>}, {pipeline_mode = #tpu.pipeline_mode<synchronous>, transform_indices = @transform_5, window_bounds = array<i64: 3, 128>}, {pipeline_mode = #tpu.pipeline_mode<synchronous>, transform_indices = @transform_6, window_bounds = array<i64: 1, 128>}, {pipeline_mode = #tpu.pipeline_mode<synchronous>, transform_indices = @transform_7, window_bounds = array<i64: 3, 128>}, {pipeline_mode = #tpu.pipeline_mode<synchronous>, transform_indices = @transform_8, window_bounds = array<i64: 1, 128>}, {pipeline_mode = #tpu.pipeline_mode<synchronous>, transform_indices = @transform_9, window_bounds = array<i64: 128, 128>}, {pipeline_mode = #tpu.pipeline_mode<synchronous>, transform_indices = @transform_10, window_bounds = array<i64: 1, 128>}, {transform_indices = @transform_11, window_bounds = array<i64: 1, 256, 128>}]} {
    %c0 = arith.constant 0 : index
    %c0_0 = arith.constant 0 : index
    %c0_1 = arith.constant 0 : index
    %0 = vector.load %arg1[%c0, %c0_0, %c0_1] : memref<1x256x128xf32, #tpu.memory_space<vmem>>, vector<1x256x128xf32>
    %1 = vector.shape_cast %0 : vector<1x256x128xf32> to vector<256x128xf32>
    %cst = arith.constant 0.000000e+00 : f32
    %2 = vector.broadcast %cst : f32 to vector<32x128xf32>
    %c0_2 = arith.constant 0 : index
    %c0_3 = arith.constant 0 : index
    %3 = vector.load %arg13[%c0_2, %c0_3] : memref<320x128xf32, #tpu.memory_space<vmem>>, vector<32x128xf32>
    tpu.vector_store %arg13[%c0_2, %c0_3], %2 {strides = array<i32>} : memref<320x128xf32, #tpu.memory_space<vmem>>, vector<32x128xf32>,
    %cst_4 = arith.constant 0.000000e+00 : f32
    %4 = vector.broadcast %cst_4 : f32 to vector<32x128xf32>
    %c288 = arith.constant 288 : index
    %c0_5 = arith.constant 0 : index
    %5 = vector.load %arg13[%c288, %c0_5] : memref<320x128xf32, #tpu.memory_space<vmem>>, vector<32x128xf32>
    tpu.vector_store %arg13[%c288, %c0_5], %4 {strides = array<i32>} : memref<320x128xf32, #tpu.memory_space<vmem>>, vector<32x128xf32>,
    %6 = tpu.iota {dimensions = array<i32: 0>} : vector<256x128xi32>
    %c16_i32 = arith.constant 16 : i32
    %c0_i32 = arith.constant 0 : i32
    %7 = arith.cmpi eq, %c16_i32, %c0_i32 : i32
    %c1_i32 = arith.constant 1 : i32
    %8 = arith.select %7, %c1_i32, %c16_i32 : i32
    %9 = vector.broadcast %8 : i32 to vector<256x128xi32>
    %10 = arith.remsi %6, %9 : vector<256x128xi32>
    %c0_i32_6 = arith.constant 0 : i32
    %11 = vector.broadcast %c0_i32_6 : i32 to vector<256x128xi32>
    %12 = arith.cmpi ne, %10, %11 : vector<256x128xi32>
    %c0_i32_7 = arith.constant 0 : i32
    %13 = vector.broadcast %c0_i32_7 : i32 to vector<256x128xi32>
    %14 = arith.cmpi slt, %10, %13 : vector<256x128xi32>
    %c0_i32_8 = arith.constant 0 : i32
    %15 = arith.cmpi slt, %8, %c0_i32_8 : i32
    %16 = vector.broadcast %15 : i1 to vector<256x128xi1>
    %17 = vector.broadcast %16 : vector<256x128xi1> to vector<256x128xi1>
    %18 = arith.xori %14, %17 : vector<256x128xi1>
    %19 = arith.andi %18, %12 : vector<256x128xi1>
    %20 = vector.broadcast %8 : i32 to vector<256x128xi32>
    %21 = arith.addi %10, %20 : vector<256x128xi32>
    %22 = arith.select %19, %21, %10 : vector<256x128xi1>, vector<256x128xi32>
    %c32 = arith.constant 32 : index
    %c0_9 = arith.constant 0 : index
    %23 = vector.load %arg13[%c32, %c0_9] : memref<320x128xf32, #tpu.memory_space<vmem>>, vector<256x128xf32>
    tpu.vector_store %arg13[%c32, %c0_9], %1 {strides = array<i32>} : memref<320x128xf32, #tpu.memory_space<vmem>>, vector<256x128xf32>,
    %cst_10 = arith.constant 0.000000e+00 : f32
    %24 = vector.broadcast %cst_10 : f32 to vector<256x128xf32>
    %c31 = arith.constant 31 : index
    %c0_11 = arith.constant 0 : index
    %25 = vector.load %arg13[%c31, %c0_11] : memref<320x128xf32, #tpu.memory_space<vmem>>, vector<256x128xf32>
    %c-1_i32 = arith.constant -1 : i32
    %26 = vector.broadcast %c-1_i32 : i32 to vector<256x128xi32>
    %27 = arith.addi %22, %26 : vector<256x128xi32>
    %c0_i32_12 = arith.constant 0 : i32
    %28 = vector.broadcast %c0_i32_12 : i32 to vector<256x128xi32>
    %29 = arith.cmpi sge, %27, %28 : vector<256x128xi32>
    %c-1_i32_13 = arith.constant -1 : i32
    %30 = vector.broadcast %c-1_i32_13 : i32 to vector<256x128xi32>
    %31 = arith.addi %22, %30 : vector<256x128xi32>
    %c16_i32_14 = arith.constant 16 : i32
    %32 = vector.broadcast %c16_i32_14 : i32 to vector<256x128xi32>
    %33 = arith.cmpi slt, %31, %32 : vector<256x128xi32>
    %34 = arith.andi %29, %33 : vector<256x128xi1>
    %cst_15 = arith.constant 0.000000e+00 : f32
    %35 = vector.broadcast %cst_15 : f32 to vector<256x128xf32>
    %36 = arith.select %34, %25, %35 : vector<256x128xi1>, vector<256x128xf32>
    %c0_16 = arith.constant 0 : index
    %c0_17 = arith.constant 0 : index
    %37 = vector.load %arg2[%c0_16, %c0_17] : memref<3x128xf32, #tpu.memory_space<vmem>>, vector<1x128xf32>
    %38 = vector.broadcast %37 : vector<1x128xf32> to vector<256x128xf32>
    %39 = arith.mulf %36, %38 : vector<256x128xf32>
    %40 = arith.addf %24, %39 : vector<256x128xf32>
    %c32_18 = arith.constant 32 : index
    %c0_19 = arith.constant 0 : index
    %41 = vector.load %arg13[%c32_18, %c0_19] : memref<320x128xf32, #tpu.memory_space<vmem>>, vector<256x128xf32>
    %c1 = arith.constant 1 : index
    %c0_20 = arith.constant 0 : index
    %42 = vector.load %arg2[%c1, %c0_20] : memref<3x128xf32, #tpu.memory_space<vmem>>, vector<1x128xf32>
    %43 = vector.broadcast %42 : vector<1x128xf32> to vector<256x128xf32>
    %44 = arith.mulf %41, %43 : vector<256x128xf32>
    %45 = arith.addf %40, %44 : vector<256x128xf32>
    %c33 = arith.constant 33 : index
    %c0_21 = arith.constant 0 : index
    %46 = vector.load %arg13[%c33, %c0_21] : memref<320x128xf32, #tpu.memory_space<vmem>>, vector<256x128xf32>
    %c1_i32_22 = arith.constant 1 : i32
    %47 = vector.broadcast %c1_i32_22 : i32 to vector<256x128xi32>
    %48 = arith.addi %22, %47 : vector<256x128xi32>
    %c0_i32_23 = arith.constant 0 : i32
    %49 = vector.broadcast %c0_i32_23 : i32 to vector<256x128xi32>
    %50 = arith.cmpi sge, %48, %49 : vector<256x128xi32>
    %c1_i32_24 = arith.constant 1 : i32
    %51 = vector.broadcast %c1_i32_24 : i32 to vector<256x128xi32>
    %52 = arith.addi %22, %51 : vector<256x128xi32>
    %c16_i32_25 = arith.constant 16 : i32
    %53 = vector.broadcast %c16_i32_25 : i32 to vector<256x128xi32>
    %54 = arith.cmpi slt, %52, %53 : vector<256x128xi32>
    %55 = arith.andi %50, %54 : vector<256x128xi1>
    %cst_26 = arith.constant 0.000000e+00 : f32
    %56 = vector.broadcast %cst_26 : f32 to vector<256x128xf32>
    %57 = arith.select %55, %46, %56 : vector<256x128xi1>, vector<256x128xf32>
    %c2 = arith.constant 2 : index
    %c0_27 = arith.constant 0 : index
    %58 = vector.load %arg2[%c2, %c0_27] : memref<3x128xf32, #tpu.memory_space<vmem>>, vector<1x128xf32>
    %59 = vector.broadcast %58 : vector<1x128xf32> to vector<256x128xf32>
    %60 = arith.mulf %57, %59 : vector<256x128xf32>
    %61 = arith.addf %45, %60 : vector<256x128xf32>
    %c0_28 = arith.constant 0 : index
    %c0_29 = arith.constant 0 : index
    %62 = vector.load %arg3[%c0_28, %c0_29] : memref<1x128xf32, #tpu.memory_space<vmem>>, vector<1x128xf32>
    %63 = vector.broadcast %62 : vector<1x128xf32> to vector<256x128xf32>
    %64 = arith.addf %61, %63 : vector<256x128xf32>
    %c32_30 = arith.constant 32 : index
    %c0_31 = arith.constant 0 : index
    %65 = vector.load %arg13[%c32_30, %c0_31] : memref<320x128xf32, #tpu.memory_space<vmem>>, vector<256x128xf32>
    tpu.vector_store %arg13[%c32_30, %c0_31], %64 {strides = array<i32>} : memref<320x128xf32, #tpu.memory_space<vmem>>, vector<256x128xf32>,
    %cst_32 = arith.constant 0.000000e+00 : f32
    %66 = vector.broadcast %cst_32 : f32 to vector<256x128xf32>
    %c16 = arith.constant 16 : index
    %c0_33 = arith.constant 0 : index
    %67 = vector.load %arg13[%c16, %c0_33] : memref<320x128xf32, #tpu.memory_space<vmem>>, vector<256x128xf32>
    %c0_34 = arith.constant 0 : index
    %c0_35 = arith.constant 0 : index
    %68 = vector.load %arg4[%c0_34, %c0_35] : memref<3x128xf32, #tpu.memory_space<vmem>>, vector<1x128xf32>
    %69 = vector.broadcast %68 : vector<1x128xf32> to vector<256x128xf32>
    %70 = arith.mulf %67, %69 : vector<256x128xf32>
    %71 = arith.addf %66, %70 : vector<256x128xf32>
    %c32_36 = arith.constant 32 : index
    %c0_37 = arith.constant 0 : index
    %72 = vector.load %arg13[%c32_36, %c0_37] : memref<320x128xf32, #tpu.memory_space<vmem>>, vector<256x128xf32>
    %c1_38 = arith.constant 1 : index
    %c0_39 = arith.constant 0 : index
    %73 = vector.load %arg4[%c1_38, %c0_39] : memref<3x128xf32, #tpu.memory_space<vmem>>, vector<1x128xf32>
    %74 = vector.broadcast %73 : vector<1x128xf32> to vector<256x128xf32>
    %75 = arith.mulf %72, %74 : vector<256x128xf32>
    %76 = arith.addf %71, %75 : vector<256x128xf32>
    %c48 = arith.constant 48 : index
    %c0_40 = arith.constant 0 : index
    %77 = vector.load %arg13[%c48, %c0_40] : memref<320x128xf32, #tpu.memory_space<vmem>>, vector<256x128xf32>
    %c2_41 = arith.constant 2 : index
    %c0_42 = arith.constant 0 : index
    %78 = vector.load %arg4[%c2_41, %c0_42] : memref<3x128xf32, #tpu.memory_space<vmem>>, vector<1x128xf32>
    %79 = vector.broadcast %78 : vector<1x128xf32> to vector<256x128xf32>
    %80 = arith.mulf %77, %79 : vector<256x128xf32>
    %81 = arith.addf %76, %80 : vector<256x128xf32>
    %c0_43 = arith.constant 0 : index
    %c0_44 = arith.constant 0 : index
    %82 = vector.load %arg5[%c0_43, %c0_44] : memref<1x128xf32, #tpu.memory_space<vmem>>, vector<1x128xf32>
    %83 = vector.broadcast %82 : vector<1x128xf32> to vector<256x128xf32>
    %84 = arith.addf %81, %83 : vector<256x128xf32>
    %c32_45 = arith.constant 32 : index
    %c0_46 = arith.constant 0 : index
    %85 = vector.load %arg13[%c32_45, %c0_46] : memref<320x128xf32, #tpu.memory_space<vmem>>, vector<256x128xf32>
    tpu.vector_store %arg13[%c32_45, %c0_46], %84 {strides = array<i32>} : memref<320x128xf32, #tpu.memory_space<vmem>>, vector<256x128xf32>,
    %cst_47 = arith.constant 0.000000e+00 : f32
    %86 = vector.broadcast %cst_47 : f32 to vector<256x128xf32>
    %c30 = arith.constant 30 : index
    %c0_48 = arith.constant 0 : index
    %87 = vector.load %arg13[%c30, %c0_48] : memref<320x128xf32, #tpu.memory_space<vmem>>, vector<256x128xf32>
    %c-2_i32 = arith.constant -2 : i32
    %88 = vector.broadcast %c-2_i32 : i32 to vector<256x128xi32>
    %89 = arith.addi %22, %88 : vector<256x128xi32>
    %c0_i32_49 = arith.constant 0 : i32
    %90 = vector.broadcast %c0_i32_49 : i32 to vector<256x128xi32>
    %91 = arith.cmpi sge, %89, %90 : vector<256x128xi32>
    %c-2_i32_50 = arith.constant -2 : i32
    %92 = vector.broadcast %c-2_i32_50 : i32 to vector<256x128xi32>
    %93 = arith.addi %22, %92 : vector<256x128xi32>
    %c16_i32_51 = arith.constant 16 : i32
    %94 = vector.broadcast %c16_i32_51 : i32 to vector<256x128xi32>
    %95 = arith.cmpi slt, %93, %94 : vector<256x128xi32>
    %96 = arith.andi %91, %95 : vector<256x128xi1>
    %cst_52 = arith.constant 0.000000e+00 : f32
    %97 = vector.broadcast %cst_52 : f32 to vector<256x128xf32>
    %98 = arith.select %96, %87, %97 : vector<256x128xi1>, vector<256x128xf32>
    %c0_53 = arith.constant 0 : index
    %c0_54 = arith.constant 0 : index
    %99 = vector.load %arg6[%c0_53, %c0_54] : memref<3x128xf32, #tpu.memory_space<vmem>>, vector<1x128xf32>
    %100 = vector.broadcast %99 : vector<1x128xf32> to vector<256x128xf32>
    %101 = arith.mulf %98, %100 : vector<256x128xf32>
    %102 = arith.addf %86, %101 : vector<256x128xf32>
    %c32_55 = arith.constant 32 : index
    %c0_56 = arith.constant 0 : index
    %103 = vector.load %arg13[%c32_55, %c0_56] : memref<320x128xf32, #tpu.memory_space<vmem>>, vector<256x128xf32>
    %c1_57 = arith.constant 1 : index
    %c0_58 = arith.constant 0 : index
    %104 = vector.load %arg6[%c1_57, %c0_58] : memref<3x128xf32, #tpu.memory_space<vmem>>, vector<1x128xf32>
    %105 = vector.broadcast %104 : vector<1x128xf32> to vector<256x128xf32>
    %106 = arith.mulf %103, %105 : vector<256x128xf32>
    %107 = arith.addf %102, %106 : vector<256x128xf32>
    %c34 = arith.constant 34 : index
    %c0_59 = arith.constant 0 : index
    %108 = vector.load %arg13[%c34, %c0_59] : memref<320x128xf32, #tpu.memory_space<vmem>>, vector<256x128xf32>
    %c2_i32 = arith.constant 2 : i32
    %109 = vector.broadcast %c2_i32 : i32 to vector<256x128xi32>
    %110 = arith.addi %22, %109 : vector<256x128xi32>
    %c0_i32_60 = arith.constant 0 : i32
    %111 = vector.broadcast %c0_i32_60 : i32 to vector<256x128xi32>
    %112 = arith.cmpi sge, %110, %111 : vector<256x128xi32>
    %c2_i32_61 = arith.constant 2 : i32
    %113 = vector.broadcast %c2_i32_61 : i32 to vector<256x128xi32>
    %114 = arith.addi %22, %113 : vector<256x128xi32>
    %c16_i32_62 = arith.constant 16 : i32
    %115 = vector.broadcast %c16_i32_62 : i32 to vector<256x128xi32>
    %116 = arith.cmpi slt, %114, %115 : vector<256x128xi32>
    %117 = arith.andi %112, %116 : vector<256x128xi1>
    %cst_63 = arith.constant 0.000000e+00 : f32
    %118 = vector.broadcast %cst_63 : f32 to vector<256x128xf32>
    %119 = arith.select %117, %108, %118 : vector<256x128xi1>, vector<256x128xf32>
    %c2_64 = arith.constant 2 : index
    %c0_65 = arith.constant 0 : index
    %120 = vector.load %arg6[%c2_64, %c0_65] : memref<3x128xf32, #tpu.memory_space<vmem>>, vector<1x128xf32>
    %121 = vector.broadcast %120 : vector<1x128xf32> to vector<256x128xf32>
    %122 = arith.mulf %119, %121 : vector<256x128xf32>
    %123 = arith.addf %107, %122 : vector<256x128xf32>
    %c0_66 = arith.constant 0 : index
    %c0_67 = arith.constant 0 : index
    %124 = vector.load %arg7[%c0_66, %c0_67] : memref<1x128xf32, #tpu.memory_space<vmem>>, vector<1x128xf32>
    %125 = vector.broadcast %124 : vector<1x128xf32> to vector<256x128xf32>
    %126 = arith.addf %123, %125 : vector<256x128xf32>
    %c32_68 = arith.constant 32 : index
    %c0_69 = arith.constant 0 : index
    %127 = vector.load %arg13[%c32_68, %c0_69] : memref<320x128xf32, #tpu.memory_space<vmem>>, vector<256x128xf32>
    tpu.vector_store %arg13[%c32_68, %c0_69], %126 {strides = array<i32>} : memref<320x128xf32, #tpu.memory_space<vmem>>, vector<256x128xf32>,
    %cst_70 = arith.constant 0.000000e+00 : f32
    %128 = vector.broadcast %cst_70 : f32 to vector<256x128xf32>
    %c0_71 = arith.constant 0 : index
    %c0_72 = arith.constant 0 : index
    %129 = vector.load %arg13[%c0_71, %c0_72] : memref<320x128xf32, #tpu.memory_space<vmem>>, vector<256x128xf32>
    %c0_73 = arith.constant 0 : index
    %c0_74 = arith.constant 0 : index
    %130 = vector.load %arg8[%c0_73, %c0_74] : memref<3x128xf32, #tpu.memory_space<vmem>>, vector<1x128xf32>
    %131 = vector.broadcast %130 : vector<1x128xf32> to vector<256x128xf32>
    %132 = arith.mulf %129, %131 : vector<256x128xf32>
    %133 = arith.addf %128, %132 : vector<256x128xf32>
    %c32_75 = arith.constant 32 : index
    %c0_76 = arith.constant 0 : index
    %134 = vector.load %arg13[%c32_75, %c0_76] : memref<320x128xf32, #tpu.memory_space<vmem>>, vector<256x128xf32>
    %c1_77 = arith.constant 1 : index
    %c0_78 = arith.constant 0 : index
    %135 = vector.load %arg8[%c1_77, %c0_78] : memref<3x128xf32, #tpu.memory_space<vmem>>, vector<1x128xf32>
    %136 = vector.broadcast %135 : vector<1x128xf32> to vector<256x128xf32>
    %137 = arith.mulf %134, %136 : vector<256x128xf32>
    %138 = arith.addf %133, %137 : vector<256x128xf32>
    %c64 = arith.constant 64 : index
    %c0_79 = arith.constant 0 : index
    %139 = vector.load %arg13[%c64, %c0_79] : memref<320x128xf32, #tpu.memory_space<vmem>>, vector<256x128xf32>
    %c2_80 = arith.constant 2 : index
    %c0_81 = arith.constant 0 : index
    %140 = vector.load %arg8[%c2_80, %c0_81] : memref<3x128xf32, #tpu.memory_space<vmem>>, vector<1x128xf32>
    %141 = vector.broadcast %140 : vector<1x128xf32> to vector<256x128xf32>
    %142 = arith.mulf %139, %141 : vector<256x128xf32>
    %143 = arith.addf %138, %142 : vector<256x128xf32>
    %c0_82 = arith.constant 0 : index
    %c0_83 = arith.constant 0 : index
    %144 = vector.load %arg9[%c0_82, %c0_83] : memref<1x128xf32, #tpu.memory_space<vmem>>, vector<1x128xf32>
    %145 = vector.broadcast %144 : vector<1x128xf32> to vector<256x128xf32>
    %146 = arith.addf %143, %145 : vector<256x128xf32>
    %c0_84 = arith.constant 0 : index
    %c0_85 = arith.constant 0 : index
    %147 = vector.load %arg10[%c0_84, %c0_85] : memref<128x128xf32, #tpu.memory_space<vmem>>, vector<128x128xf32>
    %cst_86 = arith.constant dense<0.000000e+00> : vector<256x128xf32>
    %148 = tpu.matmul %146, %147, %cst_86 {dimension_numbers = #tpu.dot_dimension_numbers<[1], [0], [0], [1], [0, 0, 1, 1], [], []>} : vector<256x128xf32>, vector<128x128xf32>, vector<256x128xf32> -> vector<256x128xf32>
    %c0_87 = arith.constant 0 : index
    %c0_88 = arith.constant 0 : index
    %149 = vector.load %arg11[%c0_87, %c0_88] : memref<1x128xf32, #tpu.memory_space<vmem>>, vector<1x128xf32>
    %150 = vector.broadcast %149 : vector<1x128xf32> to vector<256x128xf32>
    %151 = arith.addf %148, %150 : vector<256x128xf32>
    %152 = arith.mulf %1, %151 : vector<256x128xf32>
    %c0_89 = arith.constant 0 : index
    %c0_90 = arith.constant 0 : index
    %c0_91 = arith.constant 0 : index
    %153 = vector.load %arg12[%c0_89, %c0_90, %c0_91] : memref<1x256x128xf32, #tpu.memory_space<vmem>>, vector<1x256x128xf32>
    %154 = vector.shape_cast %153 : vector<1x256x128xf32> to vector<256x128xf32>
    %155 = vector.shape_cast %152 : vector<256x128xf32> to vector<1x256x128xf32>
    tpu.vector_store %arg12[%c0_89, %c0_90, %c0_91], %155 {strides = array<i32>} : memref<1x256x128xf32, #tpu.memory_space<vmem>>, vector<1x256x128xf32>,
    return
  }
  func.func @transform_0(%arg0: i32) -> (i32, i32, i32) {
    %c0_i32 = arith.constant 0 : i32
    %c0_i32_0 = arith.constant 0 : i32
    %c0_i32_1 = arith.constant 0 : i32
    return %arg0, %c0_i32, %c0_i32_0 : i32, i32, i32
  }
  func.func @transform_1(%arg0: i32) -> (i32, i32) {
    %c0_i32 = arith.constant 0 : i32
    %c0_i32_0 = arith.constant 0 : i32
    %c0_i32_1 = arith.constant 0 : i32
    return %c0_i32, %c0_i32_0 : i32, i32
  }
  func.func @transform_2(%arg0: i32) -> (i32, i32) {
    %c0_i32 = arith.constant 0 : i32
    %c0_i32_0 = arith.constant 0 : i32
    %c0_i32_1 = arith.constant 0 : i32
    return %c0_i32, %c0_i32_0 : i32, i32
  }
  func.func @transform_3(%arg0: i32) -> (i32, i32) {
    %c0_i32 = arith.constant 0 : i32
    %c0_i32_0 = arith.constant 0 : i32
    %c0_i32_1 = arith.constant 0 : i32
    return %c0_i32, %c0_i32_0 : i32, i32
  }
  func.func @transform_4(%arg0: i32) -> (i32, i32) {
    %c0_i32 = arith.constant 0 : i32
    %c0_i32_0 = arith.constant 0 : i32
    %c0_i32_1 = arith.constant 0 : i32
    return %c0_i32, %c0_i32_0 : i32, i32
  }
  func.func @transform_5(%arg0: i32) -> (i32, i32) {
    %c0_i32 = arith.constant 0 : i32
    %c0_i32_0 = arith.constant 0 : i32
    %c0_i32_1 = arith.constant 0 : i32
    return %c0_i32, %c0_i32_0 : i32, i32
  }
  func.func @transform_6(%arg0: i32) -> (i32, i32) {
    %c0_i32 = arith.constant 0 : i32
    %c0_i32_0 = arith.constant 0 : i32
    %c0_i32_1 = arith.constant 0 : i32
    return %c0_i32, %c0_i32_0 : i32, i32
  }
  func.func @transform_7(%arg0: i32) -> (i32, i32) {
    %c0_i32 = arith.constant 0 : i32
    %c0_i32_0 = arith.constant 0 : i32
    %c0_i32_1 = arith.constant 0 : i32
    return %c0_i32, %c0_i32_0 : i32, i32
  }
  func.func @transform_8(%arg0: i32) -> (i32, i32) {
    %c0_i32 = arith.constant 0 : i32
    %c0_i32_0 = arith.constant 0 : i32
    %c0_i32_1 = arith.constant 0 : i32
    return %c0_i32, %c0_i32_0 : i32, i32
  }
  func.func @transform_9(%arg0: i32) -> (i32, i32) {
    %c0_i32 = arith.constant 0 : i32
    %c0_i32_0 = arith.constant 0 : i32
    %c0_i32_1 = arith.constant 0 : i32
    return %c0_i32, %c0_i32_0 : i32, i32
  }
  func.func @transform_10(%arg0: i32) -> (i32, i32) {
    %c0_i32 = arith.constant 0 : i32
    %c0_i32_0 = arith.constant 0 : i32
    %c0_i32_1 = arith.constant 0 : i32
    return %c0_i32, %c0_i32_0 : i32, i32
  }
  func.func @transform_11(%arg0: i32) -> (i32, i32, i32) {
    %c0_i32 = arith.constant 0 : i32
    %c0_i32_0 = arith.constant 0 : i32
    %c0_i32_1 = arith.constant 0 : i32
    return %arg0, %c0_i32, %c0_i32_0 : i32, i32, i32
  }
}

</mosaic_0001>

<bundles_post_ra>
// kernel: tpu_custom_call.1
= control target key start
LH: loop header
LB: loop body
LE: loop exit
PB: predicated region body
PF: predicated region fallthrough
CT: control target
= control target key end

     0   :  { %s5878_s0 = inlined_call_operand.hbm [shape: f32[2,256,128], index: 0, kind: input, shape index: {}]   ;;  %s5879_s1 = inlined_call_operand.hbm [shape: f32[3,128], index: 1, kind: input, shape index: {}]   ;;  %s5880_s2 = inlined_call_operand.vmem [shape: f32[1,128], index: 2, kind: input, shape index: {}]   ;;  %s5881_s3 = inlined_call_operand.vmem [shape: f32[3,128], index: 3, kind: input, shape index: {}]   ;;  %s5882_s4 = inlined_call_operand.vmem [shape: f32[1,128], index: 4, kind: input, shape index: {}]   ;;  %s5883_s5 = inlined_call_operand.vmem [shape: f32[3,128], index: 5, kind: input, shape index: {}]   ;;  %s5884_s6 = inlined_call_operand.vmem [shape: f32[1,128], index: 6, kind: input, shape index: {}]   ;;  %s5885_s7 = inlined_call_operand.vmem [shape: f32[3,128], index: 7, kind: input, shape index: {}]   ;;  %s5886_s8 = inlined_call_operand.vmem [shape: f32[1,128], index: 8, kind: input, shape index: {}]   ;;  %s5887_s9 = inlined_call_operand.hbm [shape: f32[128,128], index: 9, kind: input, shape index: {}]   ;;  %s5888_s10 = inlined_call_operand.vmem [shape: f32[1,128], index: 10, kind: input, shape index: {}]   ;;  %s5889_s11 = inlined_call_operand.hbm [shape: f32[2,256,128], index: 11, kind: output, shape index: {}]  }
   0x1   :  { %6031 = sst [smem:[#allocation115_spill]] %s5879_s1 }
   0x2   :  { %6032 = sst [smem:[#allocation116_spill]] %s5889_s11 }
   0x3   :  { %16 = vsyncpa [#allocation4], 0 }
   0x4   :  { %18 = vsyncpa [#allocation4 + $0x1], 0 }
   0x5   :  { %19 = vsyncpa [#allocation7], 0 }
   0x6   :  { %20 = vsyncpa [#allocation5], 0 }
   0x7   :  { %22 = vsyncpa [#allocation5 + $0x1], 0  ;;  %s3878_s17 = smov 0   ;;  %s3880_s18 = smov 0  }
   0x8   :  { %s3882_s19 = smov 0   ;;  %s3884_s20 = smov 0  }
   0x9 LB: > { %6033 = sst [smem:[#allocation13_spill]] %s3795_s17  ;;  %s3899_s21 = sadd.s32 4294967295, %s3807_s20   ;;  %s3807_s20 = sphi %s3884_s20, %s6312_s20   ;;  %s3803_s19 = sphi %s3882_s19, %s6314_s19   ;;  %s3799_s18 = sphi %s3880_s18, %s6316_s18   ;;  %s3795_s17 = sphi %s3878_s17, %s6315_s17  }
   0xa   : > { %6034 = sst [smem:[#allocation14_spill]] %s3803_s19  ;;  %s3355_s22 = sadd.s32 4294967294, %s3807_s20  }
   0xb   : > { %s3903_s23 = sadd.s32 1, %s3807_s20   ;;  %s35_s24 = sadd.s32 1, %s3803_s19 }
   0xc   : > { %6035 = sst [smem:[#allocation15_spill]] %s3903_s23  ;;  %s32_s25 = ssub.s32 %s3807_s20, %s3903_s23 }
   0xd   : > { %p42_p0 = scmp.ne.s32.totalorder %s3803_s19, %s3799_s18  ;;  %p33_p1 = scmp.eq.s32.totalorder %s32_s25, 0 }
   0xe   : > { %p43_p2 = scmp.eq.s32.totalorder %s3807_s20, 0  ;;  %p48_p3 = scmp.ne.s32.totalorder %s3799_s18, %s3795_s17 }
   0xf   : > { %p5890_p4 = scmp.eq.s32.totalorder %s3899_s21, 0  ;;  %p282_p7 = scmp.eq.s32.totalorder %s3899_s21, 1 }
  0x10   : > { %s3915_s26 = scalar_select %p33_p1, %s3803_s19, %s35_s24  }
  0x11   : > { %p3917_p5 = por %p43_p2, %p42_p0  ;;  %p3923_p6 = por %p5890_p4, %p48_p3 }
  0x12   : > { %6036 = sst [smem:[#allocation16_spill]] %s3915_s26  ;;  %p288_p8 = scmp.eq.s32.totalorder %s3355_s22, 1 }
  0x13   : > { %s6038_s28 = scalar_select %p3923_p6, 1, 0 }
  0x14   : > { %p3356_p9 = scmp.ge.s32.totalorder %s3807_s20, 1  ;;  %p295_p10 = scmp.lt.s32.totalorder %s3807_s20, 3 }
  0x15   : > { %p3930_p11 = por %p282_p7, %p42_p0  ;;  %p3934_p12 = por %p288_p8, %p48_p3 }
  0x16   : > { %p3938_p13 = pnand %p3356_p9, %p295_p10  ;;  %s3809_s13 = smov [#allocation6]  }
  0x17   : > { %s6039_s29 = scalar_select %p3930_p11, 1, 0 }
  0x18   : > { %s6041_s30 = scalar_select %p3934_p12, 1, 0 }
  0x19   : > { %6040 = sst [smem:[#allocation17_spill]] %s6039_s29  ;;  %p3580_p2 = pneg %p3938_p13 }
  0x1a   : > { %6042 = sst [smem:[#allocation18_spill]] %s6041_s30  ;;  %s308_s14 = sshll.u32 %s3809_s13, 4  ;;  %s309_s14 = int_to_ptr.vmem [resolvable:$true] %s308_s14 }
  0x1b   : > { %s6043_s12 = scalar_select %p3938_p13, 1, 0 }
  0x1c   : > { %p3597_p4 = scmp.lt.s32.totalorder %s3807_s20, 2  ;;  %p6044_p0 = scmp.eq.s32.totalorder %s3899_s21, 0 }
  0x1d   : > { %s3810_s22 = smov [#allocation8]   ;;  %s6047_s1 = sld [smem:[#allocation115_spill]] }
  0x1e   : > { %p3948_p7 = pnand %p3580_p2, %p6044_p0  ;;  %p3954_p3 = pnand %p3597_p4, %p3917_p5 }
  0x1f   : > { %s339_s24 = sshll.u32 %s3810_s22, 4  ;;  %s3958_s24 = int_to_ptr.vmem [resolvable:$true] %s339_s24 }
  0x20   : > { %s6046_s16 = scalar_select %p3954_p3, 1, 0 }
  0x21   : > { %p3653_p9 = pneg %p3948_p7 }
  0x23   : > { %s3651_s26 = scalar_lea.hbm %s6047_s1, 64 }
  0x24   : > { %p3652_p8 = scmp.ne.s32.totalorder %s6047_s1, %s3651_s26  ;;  %p3658_p10 = scmp.lt.u32.totalorder %s3651_s26, %s6047_s1 }
  0x26   : > { %p3654_p4 = pnand %p3653_p9, %p3652_p8 }
  0x28   : > { %p3655_p5 = pneg %p3654_p4 }
  0x2a   : > { %p3660_p2 = pnand %p3658_p10, %p3655_p5 }
  0x2c   : > { %3663 = shalt.err (!%p3660_p2)
}
  0x2d   : > { %s3664_s22 = scalar_lea.vmem %s309_s14, 64  ;;  %p3672_p11 = scmp.lt.s32.totalorder %s309_s14, %s309_s14 }
  0x2e   : > { %p3665_p0 = scmp.ne.s32.totalorder %s309_s14, %s3664_s22  ;;  %p3673_p6 = scmp.lt.s32.totalorder %s3664_s22, %s3664_s22 }
  0x30   : > { %p3667_p1 = pnand %p3665_p0, %p3653_p9  ;;  %p3674_p13 = por %p3673_p6, %p3672_p11 }
  0x32   : > { %p3668_p12 = pneg %p3667_p1 }
  0x34   : > { %p3675_p3 = pnand %p3674_p13, %p3668_p12 }
  0x36   : > { %3678 = shalt.err (!%p3675_p3)
}
  0x37   : > { %3583 = dma.hbm_to_vmem [thread:$0]  (!%p3948_p7), %s6047_s1, 64, %s309_s14, [#allocation7]  }
  0x38   : > { %s356_s17 = sand.u32 1, %s3803_s19   ;;  %s3679_s13 = scalar_lea.hbm %s5887_s9, 2048 }
  0x39   : > { %p3680_p1 = scmp.ne.s32.totalorder %s5887_s9, %s3679_s13  ;;  %p3686_p12 = scmp.lt.u32.totalorder %s3679_s13, %s5887_s9 }
  0x3b   : > { %p3682_p6 = pnand %p3680_p1, %p3653_p9 }
  0x3d   : > { %p3683_p11 = pneg %p3682_p6 }
  0x3f   : > { %p3688_p13 = pnand %p3686_p12, %p3683_p11 }
  0x41   : > { %3691 = shalt.err (!%p3688_p13)
}
  0x42   : > { %s3692_s14 = scalar_lea.vmem %s3958_s24, 2048  ;;  %p3700_p5 = scmp.lt.s32.totalorder %s3958_s24, %s3958_s24 }
  0x43   : > { %p3693_p3 = scmp.ne.s32.totalorder %s3958_s24, %s3692_s14  ;;  %p3701_p10 = scmp.lt.s32.totalorder %s3692_s14, %s3692_s14 }
  0x45   : > { %p3695_p8 = pnand %p3693_p3, %p3653_p9  ;;  %p3702_p2 = por %p3701_p10, %p3700_p5 }
  0x47   : > { %p3696_p4 = pneg %p3695_p8 }
  0x49   : > { %p3703_p0 = pnand %p3702_p2, %p3696_p4 }
  0x4b   : > { %3706 = shalt.err (!%p3703_p0)
}
  0x4c   : > { %s3811_s11 = smov 128   ;;  %s3812_s29 = smov 8  }
  0x4d   : > { %3586 = dma.hbm_to_vmem [thread:$0]  (!%p3948_p7), %s5887_s9, 2048, %s3958_s24, [#allocation7], %s3811_s11, %s3811_s11, %s3812_s29  }
  0x4e   : > { %s3360_s26 = sshll.u32 %s356_s17, 8  ;;  %s3390_s25 = sshll.u32 %s3807_s20, 12 }
  0x4f   : > { %s4015_s22 = scalar_lea.hbm %s5878_s0, %s3390_s25  ;;  %s360_s14 = scalar_lea.vmem [#allocation3], %s3360_s26 }
  0x50   : > { %s367_s15 = sshll.u32 %s360_s14, 4  ;;  %s4019_s1 = scalar_lea.sflag [#allocation4], %s356_s17  ;;  %s4017_s15 = int_to_ptr.vmem [resolvable:$true] %s367_s15 }
  0x51   : > { %s3707_s19 = scalar_lea.hbm %s4015_s22, 4096  ;;  %p6048_p7 = scmp.ne.s32.totalorder %s6046_s16, 0 }
  0x52   : > { %p3708_p9 = scmp.ne.s32.totalorder %s4015_s22, %s3707_s19  ;;  %s3712_s30 = scalar_lea.hbm %s5878_s0, 8192 }
  0x53   : > { %p3709_p1 = pneg %p6048_p7  ;;  %p3713_p12 = scmp.lt.u32.totalorder %s4015_s22, %s5878_s0 }
  0x54   : > { %p3714_p13 = scmp.lt.u32.totalorder %s3712_s30, %s3707_s19  ;;  %p3716_p8 = scmp.lt.u32.totalorder %s3707_s19, %s4015_s22 }
  0x55   : > { %p3710_p6 = pnand %p3709_p1, %p3708_p9 }
  0x56   : > { %p3715_p3 = por %p3714_p13, %p3713_p12 }
  0x57   : > { %p3711_p11 = pneg %p3710_p6 }
  0x58   : > { %p3717_p4 = por %p3716_p8, %p3715_p3 }
  0x5a   : > { %p3718_p5 = pnand %p3717_p4, %p3711_p11 }
  0x5c   : > { %3721 = shalt.err (!%p3718_p5)
}
  0x5d   : > { %s3722_s17 = scalar_lea.vmem %s4017_s15, 4096  ;;  %s3813_s26 = smov [#allocation3]  }
  0x5e   : > { %p3723_p10 = scmp.ne.s32.totalorder %s4017_s15, %s3722_s17  ;;  %s3727_s27 = sshll.u32 %s3813_s26, 4  ;;  %s3728_s27 = int_to_ptr.vmem [resolvable:$false] %s3727_s27 }
  0x5f   : > { %s3729_s14 = scalar_lea.vmem %s3728_s27, 8192  ;;  %p3730_p9 = scmp.lt.s32.totalorder %s4017_s15, %s3728_s27 }
  0x60   : > { %p3725_p2 = pnand %p3723_p10, %p3709_p1  ;;  %p3731_p6 = scmp.lt.s32.totalorder %s3729_s14, %s3722_s17 }
  0x62   : > { %p3726_p0 = pneg %p3725_p2  ;;  %p3732_p12 = por %p3731_p6, %p3730_p9 }
  0x64   : > { %p3733_p13 = pnand %p3732_p12, %p3726_p0 }
  0x66   : > { %3736 = shalt.err (!%p3733_p13)
}
  0x67   : > { %3590 = dma.hbm_to_vmem [thread:$0]  (!%p6048_p7), %s4015_s22, 4096, %s4017_s15, %s4019_s1, %s3811_s11, %s3811_s11, %s3812_s29  }
  0x68   : > { %p6049_p1 = scmp.ne.s32.totalorder %s6043_s12, 0 }
  0x6a   : > { %379 = sbr.rel (%p6049_p1) target bundleno = 641 (0x281), region = 64 }
  0x71   : > { %s4053_s19 = sand.u32 1, %s3799_s18   ;;  %p6050_p11 = scmp.ne.s32.totalorder %s6038_s28, 0 }
  0x72   : > { %s3364_s24 = sshll.u32 %s4053_s19, 8  ;;  %s382_s23 = scalar_lea.sflag [#allocation4], %s4053_s19 }
  0x73   : > { %s4059_s16 = scalar_lea.vmem [#allocation3], %s3364_s24 }
  0x74   : > { %3782 = dma.done.wait (%p6050_p11), %s382_s23, 4096  }
  0x75   : > { %3784 = vsyncadd (%p6050_p11), %s382_s23, 4294963200  ;;  %p6051_p7 = scmp.eq.s32.totalorder %s3899_s21, 0 }
  0x77   : > { %3786 = dma.done.wait (%p6051_p7), [#allocation7], 2112   ;;  %p6052_p3 = pmov %p6051_p7 }
  0x78   : > { %v472_v0 = vlaneseq  ;;  %v3814_v1 = vmov 0.0   ;;  %v2937_v11 = vld [vmem:[#allocation8] sm:$0xff]  ;;  %v2938_v12 = vld [vmem:[#allocation8 + $0x8] sm:$0xff]  ;;  %v2939_v13 = vld [vmem:[#allocation8 + $0x10] sm:$0xff]  ;;  %s5733_s27 = scalar_lea.vmem [#allocation9], %s3364_s24  ;;  %s3391_s24 = sshll.u32 %s3899_s21, 12 }
  0x79   : > { %3788 = vsyncadd (%p6052_p3), [#allocation7], 4294965184  ;;  %464 = vst [vmem:[#allocation2] sm:$0xff] %v3814_v1  ;;  %v3520_v17 = vpack.c.bf16 %v2938_v12, %v2937_v11  ;;  %v2940_v18 = vld [vmem:[#allocation8 + $0x18] sm:$0xff]  ;;  %v2941_v19 = vld [vmem:[#allocation8 + $0x20] sm:$0xff]  ;;  %s3263_s14 = sshll.u32 %s5733_s27, 4  ;;  %s5831_s14 = int_to_ptr.vmem [resolvable:$true] %s3263_s14 }
  0x7a   : > { %467 = vst [vmem:[#allocation2 + $0x18] sm:$0xff] %v3814_v1  ;;  %468 = vst [vmem:[#allocation2 + $0x120] sm:$0xff] %v3814_v1  ;;  %v4069_v2 = vshrl.u32 %v472_v0, 7  ;;  %v2942_v20 = vld [vmem:[#allocation8 + $0x28] sm:$0xff]  ;;  %v3524_v24 = vpack.c.bf16 %v2940_v18, %v2939_v13  ;;  %v2943_v28 = vld [vmem:[#allocation8 + $0x30] sm:$0xff]  ;;  %s6303_s23 = sld [smem:[#allocation17_spill]] }
  0x7b   : > { %3521 = vmatprep.subr.bf16.mxu0 %v3520_v17  ;;  %3552 = vmatprep.subr.bf16.mxu1 %v3520_v17  ;;  %v4120_v33 = vpack.c.bf16 %v2942_v20, %v2941_v19  ;;  %v2944_v34 = vld [vmem:[#allocation8 + $0x38] sm:$0xff]  ;;  %v2945_v35 = vld [vmem:[#allocation8 + $0x40] sm:$0xff]  ;;  %v2946_v36 = vld [vmem:[#allocation8 + $0x48] sm:$0xff]  ;;  %s6305_s28 = sld [smem:[#allocation116_spill]]  ;;  %s3250_s21 = scalar_lea.sflag [#allocation5], %s4053_s19 }
  0x7c   : > { %v4072_v3 = vadd.s32 8, %v4069_v2  ;;  %v4075_v4 = vadd.s32 16, %v4069_v2  ;;  %v4078_v5 = vadd.s32 24, %v4069_v2  ;;  %v4081_v6 = vadd.s32 32, %v4069_v2  ;;  %3523 = vmatpush3.bf16.msra.mxu0 %v3520_v17  ;;  %3560 = vmatpush3.bf16.msra.mxu1 %v3520_v17  ;;  %v2947_v40 = vld [vmem:[#allocation8 + $0x50] sm:$0xff]  ;;  %v2948_v41 = vld [vmem:[#allocation8 + $0x58] sm:$0xff] }
  0x7d   : > { %v4084_v7 = vadd.s32 40, %v4069_v2  ;;  %v4087_v8 = vadd.s32 48, %v4069_v2  ;;  %v4090_v9 = vadd.s32 56, %v4069_v2  ;;  %v4093_v10 = vadd.s32 64, %v4069_v2  ;;  %3525 = vmatprep.subr.bf16.mxu0 %v3524_v24  ;;  %3553 = vmatprep.subr.bf16.mxu1 %v3524_v24  ;;  %v4126_v42 = vld [vmem:[%s4059_s16] sm:$0xff]  ;;  %v4129_v43 = vld [vmem:[%s4059_s16 + $0x8] sm:$0xff] }
  0x7e   : > { %6053 = vst [vmem:[#allocation19_spill] sm:$0xff] %v4075_v4  ;;  %v4096_v14 = vadd.s32 72, %v4069_v2  ;;  %v4099_v15 = vadd.s32 216, %v4069_v2  ;;  %v4102_v16 = vadd.s32 224, %v4069_v2  ;;  %v4105_v21 = vadd.s32 232, %v4069_v2  ;;  %6064 = vst [vmem:[#allocation30_spill] sm:$0xff] %v4126_v42 }
  0x7f   : > { %6054 = vst [vmem:[#allocation20_spill] sm:$0xff] %v4084_v7  ;;  %6055 = vst [vmem:[#allocation21_spill] sm:$0xff] %v4087_v8  ;;  %v4108_v22 = vadd.s32 240, %v4069_v2  ;;  %v4111_v23 = vadd.s32 248, %v4069_v2  ;;  %v5911_v25 = vand.u32 15, %v4069_v2  ;;  %v5909_v26 = vand.u32 15, %v4072_v3 }
  0x80   : > { %6056 = vst [vmem:[#allocation22_spill] sm:$0xff] %v4090_v9  ;;  %6057 = vst [vmem:[#allocation23_spill] sm:$0xff] %v4093_v10  ;;  %v5907_v27 = vand.u32 15, %v4075_v4  ;;  %v5908_v29 = vand.u32 15, %v4078_v5  ;;  %v5910_v30 = vand.u32 15, %v4081_v6  ;;  %v5906_v31 = vand.u32 15, %v4087_v8  ;;  %3527 = vmatpush3.bf16.msra.mxu0 %v3524_v24  ;;  %3561 = vmatpush3.bf16.msra.mxu1 %v3524_v24 }
  0x81   : > { %6058 = vst [vmem:[#allocation24_spill] sm:$0xff] %v4096_v14  ;;  %6059 = vst [vmem:[#allocation25_spill] sm:$0xff] %v4099_v15  ;;  %v5905_v32 = vand.u32 15, %v4093_v10  ;;  %v5912_v37 = vand.u32 15, %v4084_v7  ;;  %v5918_v38 = vand.u32 15, %v4090_v9  ;;  %v5904_v45 = vand.u32 15, %v4102_v16  ;;  %3529 = vmatprep.subr.bf16.mxu0 %v4120_v33  ;;  %3554 = vmatprep.subr.bf16.mxu1 %v4120_v33  ;;  %s5829_s12 = scalar_lea.hbm %s6305_s28, %s3391_s24 }
  0x82   : > { %6060 = vst [vmem:[#allocation26_spill] sm:$0xff] %v4102_v16  ;;  %6061 = vst [vmem:[#allocation27_spill] sm:$0xff] %v4105_v21  ;;  %v5903_v47 = vand.u32 15, %v4108_v22  ;;  %v2949_v48 = vld [vmem:[#allocation8 + $0x60] sm:$0xff]  ;;  %v2950_v49 = vld [vmem:[#allocation8 + $0x68] sm:$0xff]  ;;  %v4149_v56 = vadd.s32 4294967295, %v5911_v25  ;;  %v4179_v0 = vpack.c.bf16 %v2944_v34, %v2943_v28  ;;  %v4204_v18 = vpack.c.bf16 %v2946_v36, %v2945_v35 }
  0x83   : > { %6062 = vst [vmem:[#allocation28_spill] sm:$0xff] %v4108_v22  ;;  %6063 = vst [vmem:[#allocation29_spill] sm:$0xff] %v4111_v23  ;;  %v2951_v50 = vld [vmem:[#allocation8 + $0x70] sm:$0xff]  ;;  %v2952_v51 = vld [vmem:[#allocation8 + $0x78] sm:$0xff]  ;;  %v4153_v57 = vadd.s32 4294967295, %v5907_v27  ;;  %v4169_v61 = vadd.s32 4294967295, %v5910_v30  ;;  %v4221_v28 = vpack.c.bf16 %v2948_v41, %v2947_v40  ;;  %v4238_v40 = vpack.c.bf16 %v2950_v49, %v2949_v48 }
  0x84   : > { %6065 = vst [vmem:[#allocation31_spill] sm:$0xff] %v4129_v43  ;;  %v4136_v52 = vld [vmem:[%s4059_s16 + $0x10] sm:$0xff]  ;;  %v4139_v53 = vld [vmem:[%s4059_s16 + $0x18] sm:$0xff]  ;;  %v4142_v54 = vld [vmem:[%s4059_s16 + $0x20] sm:$0xff]  ;;  %v4173_v62 = vadd.s32 4294967295, %v5906_v31  ;;  %v4177_v63 = vadd.s32 4294967295, %v5905_v32  ;;  %v4240_v41 = vpack.c.bf16 %v2952_v51, %v2951_v50  ;;  %3531 = vmatpush3.bf16.msra.mxu0 %v4120_v33  ;;  %3562 = vmatpush3.bf16.msra.mxu1 %v4120_v33 }
  0x85   : > { %6066 = vst [vmem:[#allocation32_spill] sm:$0xff] %v4136_v52  ;;  %6067 = vst [vmem:[#allocation33_spill] sm:$0xff] %v4139_v53  ;;  %v4156_v58 = vld [vmem:[%s4059_s16 + $0x28] sm:$0xff]  ;;  %v4159_v59 = vld [vmem:[%s4059_s16 + $0x30] sm:$0xff]  ;;  %v4195_v13 = vadd.s32 4294967295, %v5904_v45  ;;  %v4199_v17 = vadd.s32 4294967295, %v5903_v47  ;;  %3533 = vmatprep.subr.bf16.mxu0 %v4179_v0  ;;  %3555 = vmatprep.subr.bf16.mxu1 %v4179_v0 }
  0x86   : > { %6068 = vst [vmem:[#allocation34_spill] sm:$0xff] %v4142_v54  ;;  %889 = vst [vmem:[#allocation2 + $0x20] sm:$0xff] %v4126_v42  ;;  %v4162_v60 = vld [vmem:[%s4059_s16 + $0x38] sm:$0xff]  ;;  %v4182_v1 = vld [vmem:[%s4059_s16 + $0x40] sm:$0xff]  ;;  %vm985_vm0 = vcmp.ge.s32.totalorder %v4149_v56, 0  ;;  %vm987_vm1 = vcmp.ge.s32.totalorder %v4153_v57, 0 }
  0x87   : > { %890 = vst [vmem:[#allocation2 + $0x28] sm:$0xff] %v4129_v43  ;;  %6069 = vst [vmem:[#allocation35_spill] sm:$0xff] %v4156_v58  ;;  %v4185_v11 = vld [vmem:[%s4059_s16 + $0x48] sm:$0xff]  ;;  %v4188_v12 = vld [vmem:[%s4059_s16 + $0x50] sm:$0xff]  ;;  %vm989_vm2 = vcmp.ge.s32.totalorder %v4169_v61, 0  ;;  %vm991_vm3 = vcmp.ge.s32.totalorder %v4173_v62, 0 }
  0x88   : > { %6070 = vst [vmem:[#allocation36_spill] sm:$0xff] %v4159_v59  ;;  %6071 = vst [vmem:[#allocation37_spill] sm:$0xff] %v4162_v60  ;;  %v4207_v19 = vld [vmem:[%s4059_s16 + $0xd0] sm:$0xff]  ;;  %v4210_v20 = vld [vmem:[%s4059_s16 + $0xd8] sm:$0xff]  ;;  %vm993_vm4 = vcmp.ge.s32.totalorder %v4177_v63, 0  ;;  %vm1013_vm5 = vcmp.ge.s32.totalorder %v4195_v13, 0  ;;  %3535 = vmatpush3.bf16.msra.mxu0 %v4179_v0  ;;  %3563 = vmatpush3.bf16.msra.mxu1 %v4179_v0 }
  0x89   : > { %891 = vst [vmem:[#allocation2 + $0x30] sm:$0xff] %v4136_v52  ;;  %892 = vst [vmem:[#allocation2 + $0x38] sm:$0xff] %v4139_v53  ;;  %v4213_v24 = vld [vmem:[%s4059_s16 + $0xe0] sm:$0xff]  ;;  %v4224_v34 = vld [vmem:[%s4059_s16 + $0xe8] sm:$0xff]  ;;  %vm1015_vm6 = vcmp.ge.s32.totalorder %v4199_v17, 0  ;;  %v4251_v32 = vadd.s32 1, %v5909_v26  ;;  %3537 = vmatprep.subr.bf16.mxu0 %v4204_v18  ;;  %3556 = vmatprep.subr.bf16.mxu1 %v4204_v18 }
  0x8a   : > { %893 = vst [vmem:[#allocation2 + $0x40] sm:$0xff] %v4142_v54  ;;  %6072 = vst [vmem:[#allocation38_spill] sm:$0xff] %v4182_v1  ;;  %v4227_v35 = vld [vmem:[%s4059_s16 + $0xf0] sm:$0xff]  ;;  %v4230_v36 = vld [vmem:[%s4059_s16 + $0xf8] sm:$0xff]  ;;  %v4255_v48 = vadd.s32 1, %v5908_v29  ;;  %v4273_v31 = vadd.s32 1, %v5912_v37 }
  0x8b   : > { %6073 = vst [vmem:[#allocation39_spill] sm:$0xff] %v4185_v11  ;;  %6074 = vst [vmem:[#allocation40_spill] sm:$0xff] %v4188_v12  ;;  %v4245_v47 = vld [vmem:[#allocation6] ss:$0 sm:$0xff]  ;;  %v4247_v45 = vld [vmem:[#allocation6 + $0x1] ss:$0 sm:$0xff] }
  0x8c   : > { %894 = vst [vmem:[#allocation2 + $0x48] sm:$0xff] %v4156_v58  ;;  %895 = vst [vmem:[#allocation2 + $0x50] sm:$0xff] %v4159_v59  ;;  %v4261_v49 = vmul.f32 %v4247_v45, %v4126_v42  ;;  %v4265_v50 = vmul.f32 %v4247_v45, %v4129_v43  ;;  %v4269_v51 = vmul.f32 %v4247_v45, %v4136_v52  ;;  %v4276_v27 = vld [vmem:[%s4059_s16 + $0x58] sm:$0xff]  ;;  %v4288_v37 = vadd.s32 1, %v5918_v38  ;;  %s3737_s11 = scalar_lea.vmem %s5831_s14, 4096  ;;  %p6307_p4 = scmp.ne.s32.totalorder %s6303_s23, 0 }
  0x8d   : > { %896 = vst [vmem:[#allocation2 + $0x58] sm:$0xff] %v4162_v60  ;;  %6075 = vst [vmem:[#allocation41_spill] sm:$0xff] %v4207_v19  ;;  %v921_v33 = vld [vmem:[#allocation2 + $0x1f] sm:$0xff]  ;;  %v1222_v26 = vmul.f32 %v4247_v45, %v4139_v53  ;;  %v1223_v30 = vmul.f32 %v4247_v45, %v4142_v54  ;;  %v1224_v25 = vmul.f32 %v4247_v45, %v4156_v58  ;;  %3539 = vmatpush3.bf16.msra.mxu0 %v4204_v18  ;;  %p3738_p8 = scmp.ne.s32.totalorder %s5831_s14, %s3737_s11  ;;  %s3815_s29 = smov [#allocation9]  }
  0x8e   : > { %6076 = vst [vmem:[#allocation42_spill] sm:$0xff] %v4210_v20  ;;  %6077 = vst [vmem:[#allocation43_spill] sm:$0xff] %v4213_v24  ;;  %v922_v29 = vld [vmem:[#allocation2 + $0x27] sm:$0xff]  ;;  %v1081_v39 = vsel %vm985_vm0, %v921_v33, 0.0  ;;  %v1225_v54 = vmul.f32 %v4247_v45, %v4159_v59  ;;  %v1226_v58 = vmul.f32 %v4247_v45, %v4162_v60  ;;  %v1227_v63 = vmul.f32 %v4247_v45, %v4182_v1  ;;  %s3741_s22 = sshll.u32 %s3815_s29, 4  ;;  %s3742_s22 = int_to_ptr.vmem [resolvable:$false] %s3741_s22 }
  0x8f   : > { %897 = vst [vmem:[#allocation2 + $0x60] sm:$0xff] %v4182_v1  ;;  %898 = vst [vmem:[#allocation2 + $0x68] sm:$0xff] %v4185_v11  ;;  %v1118_v56 = vmul.f32 %v4245_v47, %v1081_v39  ;;  %3564 = vmatpush3.bf16.msra.mxu1 %v4204_v18  ;;  %v6082_v17 = vand.u32 15, %v4096_v14  ;;  %3541 = vmatprep.subr.bf16.mxu0 %v4221_v28  ;;  %v1248_v18 = vmul.f32 %v4247_v45, %v4224_v34  ;;  %p3739_p5 = pnand %p3738_p8, %p6307_p4  ;;  %s3743_s15 = scalar_lea.vmem %s3742_s22, 8192 }
  0x90   : > { %899 = vst [vmem:[#allocation2 + $0x70] sm:$0xff] %v4188_v12  ;;  %6078 = vst [vmem:[#allocation44_spill] sm:$0xff] %v4224_v34  ;;  %v923_v55 = vld [vmem:[#allocation2 + $0x2f] sm:$0xff]  ;;  %v924_v46 = vld [vmem:[#allocation2 + $0x37] sm:$0xff]  ;;  %3557 = vmatprep.subr.bf16.mxu1 %v4221_v28  ;;  %vm1380_vm7 = vcmp.lt.s32.totalorder %v4251_v32, 16  ;;  %vm1382_vm8 = vcmp.lt.s32.totalorder %v4255_v48, 16  ;;  %p3744_p2 = scmp.lt.s32.totalorder %s5831_s14, %s3742_s22  ;;  %p3745_p0 = scmp.lt.s32.totalorder %s3743_s15, %s3737_s11 }
  0x91   : > { %6079 = vst [vmem:[#allocation45_spill] sm:$0xff] %v4227_v35  ;;  %6080 = vst [vmem:[#allocation46_spill] sm:$0xff] %v4230_v36  ;;  %v925_v44 = vld [vmem:[#allocation2 + $0x3f] sm:$0xff]  ;;  %v1083_v42 = vsel %vm987_vm1, %v923_v55, 0.0  ;;  %v1121_v33 = vmul.f32 %v4245_v47, %v924_v46  ;;  %3543 = vmatpush3.bf16.msra.mxu0 %v4221_v28  ;;  %vm1384_vm9 = vcmp.lt.s32.totalorder %v4273_v31, 16  ;;  %vm1386_vm10 = vcmp.lt.s32.totalorder %v4288_v37, 16  ;;  %p3740_p10 = pneg %p3739_p5 }
  0x92   : > { %915 = vst [vmem:[#allocation2 + $0xf0] sm:$0xff] %v4207_v19  ;;  %916 = vst [vmem:[#allocation2 + $0xf8] sm:$0xff] %v4210_v20  ;;  %v1119_v19 = vmul.f32 %v4245_v47, %v922_v29  ;;  %v1085_v43 = vsel %vm989_vm2, %v925_v44, 0.0  ;;  %v1120_v22 = vmul.f32 %v4245_v47, %v1083_v42  ;;  %3545 = vmatprep.subr.bf16.mxu0 %v4238_v40  ;;  %p3746_p9 = por %p3745_p0, %p3744_p2 }
  0x93   : > { %917 = vst [vmem:[#allocation2 + $0x100] sm:$0xff] %v4213_v24  ;;  %918 = vst [vmem:[#allocation2 + $0x108] sm:$0xff] %v4224_v34  ;;  %v926_v52 = vld [vmem:[#allocation2 + $0x47] sm:$0xff]  ;;  %v927_v53 = vld [vmem:[#allocation2 + $0x4f] sm:$0xff]  ;;  %v1122_v55 = vmul.f32 %v4245_v47, %v1085_v43  ;;  %v4361_v34 = vadd.f32 %v1222_v26, %v1121_v33  ;;  %3565 = vmatpush3.bf16.msra.mxu1 %v4221_v28  ;;  %v6084_v26 = vand.u32 15, %v4105_v21  ;;  %v6086_v33 = vand.u32 15, %v4111_v23 }
  0x94   : > { %919 = vst [vmem:[#allocation2 + $0x110] sm:$0xff] %v4227_v35  ;;  %920 = vst [vmem:[#allocation2 + $0x118] sm:$0xff] %v4230_v36  ;;  %v928_v38 = vld [vmem:[#allocation2 + $0x57] sm:$0xff]  ;;  %v1087_v60 = vsel %vm991_vm3, %v927_v53, 0.0  ;;  %v1123_v57 = vmul.f32 %v4245_v47, %v926_v52  ;;  %3558 = vmatprep.subr.bf16.mxu1 %v4238_v40  ;;  %v4479_v23 = vld [vmem:[%s4059_s16 + $0xc0] sm:$0xff]  ;;  %p3747_p6 = pnand %p3746_p9, %p3740_p10 }
  0x95   : > { %6081 = vst [vmem:[#allocation47_spill] sm:$0xff] %v4276_v27  ;;  %900 = vst [vmem:[#allocation2 + $0x78] sm:$0xff] %v4276_v27  ;;  %v1124_v61 = vmul.f32 %v4245_v47, %v1087_v60  ;;  %v1125_v62 = vmul.f32 %v4245_v47, %v928_v38  ;;  %v4363_v1 = vadd.f32 %v1223_v30, %v1122_v55  ;;  %v1344_v30 = vadd.s32 1, %v6084_v26  ;;  %v1286_v28 = vld [vmem:[#allocation2 + $0x39] sm:$0xff]  ;;  %v4482_v21 = vld [vmem:[%s4059_s16 + $0xc8] sm:$0xff] }
  0x96   : > { %v929_v29 = vld [vmem:[#allocation2 + $0x5f] sm:$0xff]  ;;  %v930_v59 = vld [vmem:[#allocation2 + $0x67] sm:$0xff]  ;;  %v1346_v55 = vadd.s32 1, %v6086_v33  ;;  %3547 = vmatpush3.bf16.msra.mxu0 %v4238_v40  ;;  %v1446_v48 = vsel %vm1382_vm8, %v1286_v28, 0.0  ;;  %6100 = vst [vmem:[#allocation61_spill] sm:$0xff] %v4479_v23  ;;  %6101 = vst [vmem:[#allocation62_spill] sm:$0xff] %v4482_v21 }
  0x97   : > { %v1089_v46 = vsel %vm993_vm4, %v929_v29, 0.0  ;;  %v1127_v53 = vmul.f32 %v4245_v47, %v930_v59  ;;  %3566 = vmatpush3.bf16.msra.mxu1 %v4238_v40  ;;  %vm1408_vm13 = vcmp.lt.s32.totalorder %v1344_v30, 16  ;;  %3549 = vmatprep.subr.bf16.mxu0 %v4240_v41  ;;  %913 = vst [vmem:[#allocation2 + $0xe0] sm:$0xff] %v4479_v23  ;;  %914 = vst [vmem:[#allocation2 + $0xe8] sm:$0xff] %v4482_v21  ;;  %v4577_v21 = vld [vmem:[%s5881_s3 + $0x2] ss:$0 sm:$0xff] }
  0x98   : > { %v1126_v16 = vmul.f32 %v4245_v47, %v1089_v46  ;;  %v4338_v46 = vadd.s32 1, %v6082_v17  ;;  %v4353_v17 = vadd.f32 %v4261_v49, %v1118_v56  ;;  %v4371_v49 = vadd.f32 %v1226_v58, %v1125_v62  ;;  %v1288_v56 = vld [vmem:[#allocation2 + $0x49] sm:$0xff]  ;;  %3559 = vmatprep.subr.bf16.mxu1 %v4240_v41 }
  0x99   : > { %v948_v39 = vld [vmem:[#allocation2 + $0xf7] sm:$0xff]  ;;  %vm1410_vm14 = vcmp.lt.s32.totalorder %v1346_v55, 16 }
  0x9a   : > { %v949_v44 = vld [vmem:[#allocation2 + $0xff] sm:$0xff]  ;;  %v950_v42 = vld [vmem:[#allocation2 + $0x107] sm:$0xff]  ;;  %v1145_v9 = vmul.f32 %v4245_v47, %v948_v39  ;;  %v1228_v39 = vmul.f32 %v4247_v45, %v4185_v11  ;;  %vm1388_vm11 = vcmp.lt.s32.totalorder %v4338_v46, 16  ;;  %v4426_v55 = vld [vmem:[%s4059_s16 + $0x70] sm:$0xff]  ;;  %3551 = vmatpush3.bf16.msra.mxu0 %v4240_v41 }
  0x9b   : > { %v951_v0 = vld [vmem:[#allocation2 + $0x10f] sm:$0xff]  ;;  %v952_v43 = vld [vmem:[#allocation2 + $0x117] sm:$0xff]  ;;  %v1109_v52 = vsel %vm1013_vm5, %v949_v44, 0.0  ;;  %v1147_v59 = vmul.f32 %v4245_v47, %v950_v42  ;;  %v1246_v44 = vmul.f32 %v4247_v45, %v4210_v20  ;;  %v1247_v42 = vmul.f32 %v4247_v45, %v4213_v24  ;;  %6089 = vst [vmem:[#allocation51_spill] sm:$0xff] %v4426_v55  ;;  %3567 = vmatpush3.bf16.msra.mxu1 %v4240_v41 }
  0x9c   : > { %v1111_v60 = vsel %vm1015_vm6, %v951_v0, 0.0  ;;  %v1146_v38 = vmul.f32 %v4245_v47, %v1109_v52  ;;  %v1149_v29 = vmul.f32 %v4245_v47, %v952_v43  ;;  %v1249_v0 = vmul.f32 %v4247_v45, %v4227_v35  ;;  %v1313_v26 = vld [vmem:[#allocation2 + $0x111] sm:$0xff]  ;;  %903 = vst [vmem:[#allocation2 + $0x90] sm:$0xff] %v4426_v55 }
  0x9d   : > { %v1148_v13 = vmul.f32 %v4245_v47, %v1111_v60  ;;  %v6083_v43 = vand.u32 15, %v4099_v15  ;;  %v1250_v60 = vmul.f32 %v4247_v45, %v4230_v36  ;;  %v4356_v20 = vadd.f32 %v4265_v50, %v1119_v19  ;;  %v4466_v36 = vld [vmem:[%s4059_s16 + $0xb0] sm:$0xff]  ;;  %v4476_v11 = vld [vmem:[%s4059_s16 + $0xb8] sm:$0xff] }
  0x9e   : > { %v4359_v24 = vadd.f32 %v4269_v51, %v1120_v22  ;;  %v4365_v35 = vadd.f32 %v1224_v25, %v1123_v57  ;;  %v4373_v19 = vadd.f32 %v1227_v63, %v1126_v16  ;;  %v4375_v50 = vadd.f32 %v1228_v39, %v1127_v53  ;;  %v1284_v22 = vld [vmem:[#allocation2 + $0x29] sm:$0xff]  ;;  %v4380_v51 = vld [vmem:[%s4059_s16 + $0x60] sm:$0xff]  ;;  %6098 = vst [vmem:[#allocation59_spill] sm:$0xff] %v4466_v36 }
  0x9f   : > { %v1342_v52 = vadd.s32 1, %v6083_v43  ;;  %v4367_v43 = vadd.f32 %v1225_v54, %v1124_v61  ;;  %6085 = vst [vmem:[#allocation48_spill] sm:$0xff] %v4380_v51  ;;  %v4384_v25 = vadd.f32 %v1246_v44, %v1145_v9  ;;  %v4386_v54 = vadd.f32 %v1247_v42, %v1146_v38  ;;  %v1283_v16 = vld [vmem:[#allocation2 + $0x21] sm:$0xff]  ;;  %901 = vst [vmem:[#allocation2 + $0x80] sm:$0xff] %v4380_v51  ;;  %v1290_v53 = vld [vmem:[#allocation2 + $0x59] sm:$0xff] }
  0xa0   : > { %v4388_v58 = vadd.f32 %v1248_v18, %v1147_v59  ;;  %v4392_v57 = vld [vmem:[#allocation6 + $0x2] ss:$0 sm:$0xff]  ;;  %v4395_v61 = vld [vmem:[%s4059_s16 + $0x68] sm:$0xff]  ;;  %v4398_v62 = vadd.f32 %v1249_v0, %v1148_v13  ;;  %v4400_v9 = vadd.f32 %v1250_v60, %v1149_v29  ;;  %v1310_v38 = vld [vmem:[#allocation2 + $0xf9] sm:$0xff]  ;;  %v1444_v32 = vsel %vm1380_vm7, %v1284_v22, 0.0  ;;  %6099 = vst [vmem:[#allocation60_spill] sm:$0xff] %v4476_v11 }
  0xa1   : > { %6087 = vst [vmem:[#allocation49_spill] sm:$0xff] %v4392_v57  ;;  %6088 = vst [vmem:[#allocation50_spill] sm:$0xff] %v4395_v61  ;;  %v1292_v63 = vld [vmem:[#allocation2 + $0x69] sm:$0xff]  ;;  %v1314_v39 = vld [vmem:[#allocation2 + $0x119] sm:$0xff]  ;;  %vm1406_vm12 = vcmp.lt.s32.totalorder %v1342_v52, 16  ;;  %v1448_v18 = vsel %vm1384_vm9, %v1288_v56, 0.0  ;;  %v1480_v33 = vmul.f32 %v4392_v57, %v1283_v16  ;;  %v1481_v31 = vmul.f32 %v4392_v57, %v1444_v32 }
  0xa2   : > { %902 = vst [vmem:[#allocation2 + $0x88] sm:$0xff] %v4395_v61  ;;  %v1312_v59 = vld [vmem:[#allocation2 + $0x109] sm:$0xff]  ;;  %v1285_v29 = vld [vmem:[#allocation2 + $0x31] sm:$0xff]  ;;  %v1287_v13 = vld [vmem:[#allocation2 + $0x41] sm:$0xff]  ;;  %v1450_v40 = vsel %vm1386_vm10, %v1290_v53, 0.0  ;;  %v1452_v0 = vsel %vm1388_vm11, %v1292_v63, 0.0  ;;  %v1483_v56 = vmul.f32 %v4392_v57, %v1446_v48  ;;  %v1485_v52 = vmul.f32 %v4392_v57, %v1448_v18 }
  0xa3   : > { %v1289_v44 = vld [vmem:[#allocation2 + $0x51] sm:$0xff]  ;;  %v1291_v42 = vld [vmem:[#allocation2 + $0x61] sm:$0xff]  ;;  %v1470_v60 = vsel %vm1406_vm12, %v1310_v38, 0.0  ;;  %v1472_v30 = vsel %vm1408_vm13, %v1312_v59, 0.0  ;;  %v1474_v28 = vsel %vm1410_vm14, %v1314_v39, 0.0  ;;  %v1482_v37 = vmul.f32 %v4392_v57, %v1285_v29  ;;  %911 = vst [vmem:[#allocation2 + $0xd0] sm:$0xff] %v4466_v36 }
  0xa4   : > { %v1311_v22 = vld [vmem:[#allocation2 + $0x101] sm:$0xff]  ;;  %v1484_v46 = vmul.f32 %v4392_v57, %v1287_v13  ;;  %v4429_v53 = vld [vmem:[%s4059_s16 + $0x78] sm:$0xff]  ;;  %v1486_v16 = vmul.f32 %v4392_v57, %v1289_v44  ;;  %v1487_v38 = vmul.f32 %v4392_v57, %v1450_v40  ;;  %v1488_v59 = vmul.f32 %v4392_v57, %v1291_v42  ;;  %v4447_v32 = vld [vmem:[%s4059_s16 + $0x90] sm:$0xff]  ;;  %912 = vst [vmem:[#allocation2 + $0xd8] sm:$0xff] %v4476_v11 }
  0xa5   : > { %6090 = vst [vmem:[#allocation52_spill] sm:$0xff] %v4429_v53  ;;  %v4432_v63 = vld [vmem:[%s4059_s16 + $0x80] sm:$0xff]  ;;  %v6092_v39 = vand.u32 15, %v4069_v2  ;;  %v4444_v13 = vld [vmem:[%s4059_s16 + $0x88] sm:$0xff]  ;;  %6094 = vst [vmem:[#allocation55_spill] sm:$0xff] %v4447_v32  ;;  %v1489_v41 = vmul.f32 %v4392_v57, %v1452_v0  ;;  %v1507_v44 = vmul.f32 %v4392_v57, %v1470_v60  ;;  %v1508_v42 = vmul.f32 %v4392_v57, %v1311_v22 }
  0xa6   : > { %6091 = vst [vmem:[#allocation53_spill] sm:$0xff] %v4432_v63  ;;  %6093 = vst [vmem:[#allocation54_spill] sm:$0xff] %v4444_v13  ;;  %v4450_v48 = vld [vmem:[%s4059_s16 + $0x98] sm:$0xff]  ;;  %v1509_v18 = vmul.f32 %v4392_v57, %v1472_v30  ;;  %v4460_v40 = vld [vmem:[%s4059_s16 + $0xa0] sm:$0xff]  ;;  %v1510_v0 = vmul.f32 %v4392_v57, %v1313_v26  ;;  %v1511_v60 = vmul.f32 %v4392_v57, %v1474_v28 }
  0xa7   : > { %v4441_v29 = vadd.s32 4294967294, %v6092_v39  ;;  %6095 = vst [vmem:[#allocation56_spill] sm:$0xff] %v4450_v48  ;;  %904 = vst [vmem:[#allocation2 + $0x98] sm:$0xff] %v4429_v53  ;;  %v4463_v39 = vld [vmem:[%s4059_s16 + $0xa8] sm:$0xff]  ;;  %v1512_v22 = vadd.f32 %v1480_v33, %v4353_v17  ;;  %v1513_v30 = vadd.f32 %v1481_v31, %v4356_v20  ;;  %v1514_v26 = vadd.f32 %v1482_v37, %v4359_v24  ;;  %v4494_v33 = vld [vmem:[%s5880_s2] ss:$0 sm:$0xff] }
  0xa8   : > { %905 = vst [vmem:[#allocation2 + $0xa0] sm:$0xff] %v4432_v63  ;;  %6096 = vst [vmem:[#allocation57_spill] sm:$0xff] %v4460_v40  ;;  %v1515_v28 = vadd.f32 %v1483_v56, %v4361_v34  ;;  %v1516_v17 = vadd.f32 %v1484_v46, %v4363_v1  ;;  %v1517_v20 = vadd.f32 %v1485_v52, %v4365_v35 }
  0xa9   : > { %6097 = vst [vmem:[#allocation58_spill] sm:$0xff] %v4463_v39  ;;  %906 = vst [vmem:[#allocation2 + $0xa8] sm:$0xff] %v4444_v13  ;;  %v1518_v31 = vadd.f32 %v1486_v16, %v4367_v43  ;;  %v1519_v24 = vadd.f32 %v1487_v38, %v4371_v49  ;;  %v1520_v34 = vadd.f32 %v1488_v59, %v4373_v19  ;;  %vm1993_vm15 = vcmp.ge.s32.totalorder %v4441_v29, 0 }
  0xaa   : > { %907 = vst [vmem:[#allocation2 + $0xb0] sm:$0xff] %v4447_v32  ;;  %908 = vst [vmem:[#allocation2 + $0xb8] sm:$0xff] %v4450_v48  ;;  %v1521_v1 = vadd.f32 %v1489_v41, %v4375_v50  ;;  %v1539_v35 = vadd.f32 %v1507_v44, %v4384_v25  ;;  %v1540_v37 = vadd.f32 %v1508_v42, %v4386_v54 }
  0xab   : > { %909 = vst [vmem:[#allocation2 + $0xc0] sm:$0xff] %v4460_v40  ;;  %910 = vst [vmem:[#allocation2 + $0xc8] sm:$0xff] %v4463_v39  ;;  %v1541_v56 = vadd.f32 %v1509_v18, %v4388_v58  ;;  %v1542_v46 = vadd.f32 %v1510_v0, %v4398_v62  ;;  %v1543_v52 = vadd.f32 %v1511_v60, %v4400_v9  ;;  %v4518_v58 = vld [vmem:[%s5881_s3] ss:$0 sm:$0xff]  ;;  %v4541_v18 = vld [vmem:[%s5881_s3 + $0x1] ss:$0 sm:$0xff] }
  0xac   : > { %6102 = vst [vmem:[#allocation63_spill] sm:$0xff] %v4494_v33  ;;  %v1551_v15 = vadd.f32 %v4494_v33, %v1512_v22  ;;  %v1552_v43 = vadd.f32 %v4494_v33, %v1513_v30  ;;  %v1553_v49 = vadd.f32 %v4494_v33, %v1514_v26  ;;  %v1554_v19 = vadd.f32 %v4494_v33, %v1515_v28 }
  0xad   : > { %v1555_v50 = vadd.f32 %v4494_v33, %v1516_v17  ;;  %v1556_v25 = vadd.f32 %v4494_v33, %v1517_v20  ;;  %v1557_v54 = vadd.f32 %v4494_v33, %v1518_v31  ;;  %6103 = vst [vmem:[#allocation64_spill] sm:$0xff] %v4518_v58  ;;  %v4521_v62 = vadd.f32 %v4494_v33, %v1519_v24 }
  0xae   : > { %v4524_v9 = vadd.f32 %v4494_v33, %v1520_v34  ;;  %v4527_v16 = vadd.f32 %v4494_v33, %v1521_v1  ;;  %v4530_v38 = vadd.f32 %v4494_v33, %v1539_v35  ;;  %v4533_v59 = vadd.f32 %v4494_v33, %v1540_v37  ;;  %6106 = vst [vmem:[#allocation67_spill] sm:$0xff] %v4541_v18 }
  0xaf   : > { %v1580_v41 = vadd.f32 %v4494_v33, %v1541_v56  ;;  %v1581_v44 = vadd.f32 %v4494_v33, %v1542_v46  ;;  %v1582_v42 = vadd.f32 %v4494_v33, %v1543_v52  ;;  %v1652_v0 = vmul.f32 0.0, %v4518_v58 }
  0xb0   : > { %6104 = vst [vmem:[#allocation65_spill] sm:$0xff] %v4530_v38  ;;  %6105 = vst [vmem:[#allocation66_spill] sm:$0xff] %v4533_v59  ;;  %v1654_v60 = vmul.f32 %v4518_v58, %v1551_v15  ;;  %v1655_v22 = vmul.f32 %v4518_v58, %v1552_v43  ;;  %v1656_v30 = vmul.f32 %v4518_v58, %v1553_v49 }
  0xb1   : > { %v1657_v26 = vmul.f32 %v4518_v58, %v1554_v19  ;;  %v1658_v28 = vmul.f32 %v4518_v58, %v1555_v50  ;;  %v1659_v17 = vmul.f32 %v4518_v58, %v1556_v25  ;;  %v1660_v20 = vmul.f32 %v4518_v58, %v1557_v54 }
  0xb2   : > { %v1681_v31 = vmul.f32 %v4518_v58, %v4530_v38  ;;  %v1682_v24 = vmul.f32 %v4518_v58, %v4533_v59  ;;  %v1683_v34 = vmul.f32 %v4518_v58, %v1580_v41  ;;  %v1723_v1 = vmul.f32 %v4541_v18, %v1551_v15 }
  0xb3   : > { %v1724_v35 = vmul.f32 %v4541_v18, %v1552_v43  ;;  %v1725_v37 = vmul.f32 %v4541_v18, %v1553_v49  ;;  %v1726_v56 = vmul.f32 %v4541_v18, %v1554_v19  ;;  %v1727_v46 = vmul.f32 %v4541_v18, %v1555_v50 }
  0xb4   : > { %v1728_v52 = vmul.f32 %v4541_v18, %v1556_v25  ;;  %v1729_v14 = vmul.f32 %v4541_v18, %v1557_v54  ;;  %v1730_v10 = vmul.f32 %v4541_v18, %v4521_v62  ;;  %v1731_v7 = vmul.f32 %v4541_v18, %v4524_v9 }
  0xb5   : > { %v4569_v15 = vmul.f32 %v4541_v18, %v4533_v59  ;;  %v1752_v43 = vmul.f32 %v4541_v18, %v1580_v41  ;;  %v1753_v8 = vmul.f32 %v4541_v18, %v1581_v44  ;;  %v1754_v4 = vmul.f32 %v4541_v18, %v1582_v42 }
  0xb6   : > { %v1755_v38 = vadd.f32 %v1723_v1, %v1652_v0  ;;  %v1756_v58 = vadd.f32 %v1724_v35, %v1652_v0  ;;  %v1757_v33 = vadd.f32 %v1725_v37, %v1654_v60  ;;  %v1758_v57 = vadd.f32 %v1726_v56, %v1655_v22 }
  0xb7   : > { %6107 = vst [vmem:[#allocation68_spill] sm:$0xff] %v4569_v15  ;;  %v1759_v23 = vadd.f32 %v1727_v46, %v1656_v30  ;;  %v1760_v11 = vadd.f32 %v1728_v52, %v1657_v26  ;;  %v1761_v36 = vadd.f32 %v1729_v14, %v1658_v28  ;;  %v1762_v59 = vadd.f32 %v1730_v10, %v1659_v17 }
  0xb8   : > { %v4579_v15 = vadd.f32 %v1731_v7, %v1660_v20  ;;  %v1784_v39 = vadd.f32 %v1752_v43, %v1681_v31  ;;  %v1785_v40 = vadd.f32 %v1753_v8, %v1682_v24  ;;  %v1786_v48 = vadd.f32 %v1754_v4, %v1683_v34 }
  0xb9   : > { %v1794_v18 = vmul.f32 %v4577_v21, %v1553_v49  ;;  %v1795_v0 = vmul.f32 %v4577_v21, %v1554_v19  ;;  %v1796_v60 = vmul.f32 %v4577_v21, %v1555_v50  ;;  %v1797_v22 = vmul.f32 %v4577_v21, %v1556_v25  ;;  %v4603_v19 = vld [vmem:[%s5882_s4] ss:$0 sm:$0xff] }
  0xba   : > { %6108 = vst [vmem:[#allocation69_spill] sm:$0xff] %v4579_v15  ;;  %v1798_v1 = vmul.f32 %v4577_v21, %v1557_v54  ;;  %v1799_v30 = vmul.f32 %v4577_v21, %v4521_v62  ;;  %v1800_v7 = vmul.f32 %v4577_v21, %v4524_v9  ;;  %v1801_v8 = vmul.f32 %v4577_v21, %v4527_v16 }
  0xbb   : > { %v4593_v4 = vmul.f32 %v4577_v21, %v1580_v41  ;;  %v4596_v10 = vmul.f32 %v4577_v21, %v1581_v44  ;;  %v1823_v14 = vmul.f32 %v4577_v21, %v1582_v42  ;;  %v1824_v49 = vmul.f32 0.0, %v4577_v21  ;;  %6111 = vst [vmem:[#allocation72_spill] sm:$0xff] %v4603_v19 }
  0xbc   : > { %v1826_v50 = vadd.f32 %v1794_v18, %v1755_v38  ;;  %v1827_v25 = vadd.f32 %v1795_v0, %v1756_v58  ;;  %v1828_v54 = vadd.f32 %v1796_v60, %v1757_v33  ;;  %v1829_v26 = vadd.f32 %v1797_v22, %v1758_v57 }
  0xbd   : > { %6109 = vst [vmem:[#allocation70_spill] sm:$0xff] %v4593_v4  ;;  %6110 = vst [vmem:[#allocation71_spill] sm:$0xff] %v4596_v10  ;;  %v1830_v28 = vadd.f32 %v1798_v1, %v1759_v23  ;;  %v1831_v17 = vadd.f32 %v1799_v30, %v1760_v11  ;;  %v1832_v41 = vadd.f32 %v1800_v7, %v1761_v36  ;;  %v4613_v23 = vld [vmem:[%s5883_s5 + $0x1] ss:$0 sm:$0xff]  ;;  %v6114_v58 = vand.u32 15, %v4081_v6 }
  0xbe   : > { %v1833_v20 = vadd.f32 %v1801_v8, %v1762_v59  ;;  %v1855_v31 = vadd.f32 %v1823_v14, %v1784_v39  ;;  %v1856_v44 = vadd.f32 %v1824_v49, %v1785_v40  ;;  %v1857_v24 = vadd.f32 %v1824_v49, %v1786_v48  ;;  %6112 = vst [vmem:[#allocation73_spill] sm:$0xff] %v4613_v23  ;;  %v4622_v40 = vld [vmem:[%s5885_s7] ss:$0 sm:$0xff]  ;;  %v932_v49 = vld [vmem:[#allocation2 + $0x77] sm:$0xff] }
  0xbf   : > { %v1865_v42 = vadd.f32 %v4603_v19, %v1826_v50  ;;  %v1866_v34 = vadd.f32 %v4603_v19, %v1827_v25  ;;  %v1867_v35 = vadd.f32 %v4603_v19, %v1828_v54  ;;  %v1868_v37 = vadd.f32 %v4603_v19, %v1829_v26  ;;  %6113 = vst [vmem:[#allocation74_spill] sm:$0xff] %v4622_v40  ;;  %v4643_v1 = vld [vmem:[%s5883_s5] ss:$0 sm:$0xff]  ;;  %v4666_v50 = vld [vmem:[%s5883_s5 + $0x2] ss:$0 sm:$0xff] }
  0xc0   : > { %v1869_v38 = vadd.f32 %v4603_v19, %v1830_v28  ;;  %v1870_v11 = vadd.f32 %v4603_v19, %v1831_v17  ;;  %v1871_v36 = vadd.f32 %v4603_v19, %v1832_v41  ;;  %v1872_v57 = vadd.f32 %v4603_v19, %v1833_v20  ;;  %6117 = vst [vmem:[#allocation75_spill] sm:$0xff] %v4643_v1 }
  0xc1   : > { %v1894_v48 = vadd.f32 %v4603_v19, %v1855_v31  ;;  %1897 = vst [vmem:[#allocation2 + $0x20] sm:$0xff] %v1865_v42  ;;  %v1895_v39 = vadd.f32 %v4603_v19, %v1856_v44  ;;  %v1896_v33 = vadd.f32 %v4603_v19, %v1857_v24  ;;  %1898 = vst [vmem:[#allocation2 + $0x28] sm:$0xff] %v1866_v34  ;;  %v1965_v59 = vadd.s32 4294967294, %v6114_v58 }
  0xc2   : > { %1899 = vst [vmem:[#allocation2 + $0x30] sm:$0xff] %v1867_v35  ;;  %1900 = vst [vmem:[#allocation2 + $0x38] sm:$0xff] %v1868_v37  ;;  %v2227_v18 = vmul.f32 %v4613_v23, %v1865_v42  ;;  %v2228_v56 = vmul.f32 %v4613_v23, %v1866_v34  ;;  %v2230_v46 = vmul.f32 %v4613_v23, %v1868_v37  ;;  %v6115_v43 = vand.u32 15, %v4072_v3 }
  0xc3   : > { %1901 = vst [vmem:[#allocation2 + $0x40] sm:$0xff] %v1869_v38  ;;  %1902 = vst [vmem:[#allocation2 + $0x48] sm:$0xff] %v1870_v11  ;;  %v2231_v52 = vmul.f32 %v4613_v23, %v1869_v38  ;;  %vm1997_vm0 = vcmp.ge.s32.totalorder %v1965_v59, 0  ;;  %v6116_v6 = vand.u32 15, %v4078_v5  ;;  %v4638_v22 = vmul.f32 0.0, %v4622_v40 }
  0xc4   : > { %1903 = vst [vmem:[#allocation2 + $0x50] sm:$0xff] %v1871_v36  ;;  %1904 = vst [vmem:[#allocation2 + $0x58] sm:$0xff] %v1872_v57  ;;  %v2324_v0 = vadd.s32 2, %v6115_v43  ;;  %v4646_v30 = vadd.s32 80, %v4069_v2  ;;  %v4649_v7 = vadd.s32 88, %v4069_v2  ;;  %v4652_v3 = vadd.s32 96, %v4069_v2 }
  0xc5   : > { %1926 = vst [vmem:[#allocation2 + $0x108] sm:$0xff] %v1894_v48  ;;  %v2326_v60 = vadd.s32 2, %v6116_v6  ;;  %1927 = vst [vmem:[#allocation2 + $0x110] sm:$0xff] %v1895_v39  ;;  %v4655_v5 = vadd.s32 104, %v4069_v2  ;;  %v4658_v8 = vadd.s32 112, %v4069_v2  ;;  %v4661_v14 = vadd.s32 120, %v4069_v2 }
  0xc6   : > { %1928 = vst [vmem:[#allocation2 + $0x118] sm:$0xff] %v1896_v33  ;;  %6118 = vst [vmem:[#allocation76_spill] sm:$0xff] %v4646_v30  ;;  %vm2388_vm1 = vcmp.lt.s32.totalorder %v2324_v0, 16  ;;  %v4669_v25 = vadd.s32 128, %v4069_v2  ;;  %v4672_v54 = vadd.s32 136, %v4069_v2  ;;  %v4675_v26 = vadd.s32 144, %v4069_v2 }
  0xc7   : > { %6119 = vst [vmem:[#allocation77_spill] sm:$0xff] %v4649_v7  ;;  %6120 = vst [vmem:[#allocation78_spill] sm:$0xff] %v4652_v3  ;;  %vm2390_vm2 = vcmp.lt.s32.totalorder %v2326_v60, 16  ;;  %v4678_v28 = vadd.s32 152, %v4069_v2  ;;  %v4681_v41 = vadd.s32 160, %v4069_v2  ;;  %v4684_v20 = vadd.s32 168, %v4069_v2 }
  0xc8   : > { %6121 = vst [vmem:[#allocation79_spill] sm:$0xff] %v4655_v5  ;;  %6122 = vst [vmem:[#allocation80_spill] sm:$0xff] %v4658_v8  ;;  %v1929_v17 = vld [vmem:[#allocation2 + $0x1e] sm:$0xff]  ;;  %v4687_v31 = vadd.s32 176, %v4069_v2  ;;  %v4690_v44 = vadd.s32 184, %v4069_v2  ;;  %v1930_v24 = vld [vmem:[#allocation2 + $0x26] sm:$0xff]  ;;  %v4701_v11 = vmul.f32 %v4245_v47, %v932_v49 }
  0xc9   : > { %6123 = vst [vmem:[#allocation81_spill] sm:$0xff] %v4661_v14  ;;  %6124 = vst [vmem:[#allocation82_spill] sm:$0xff] %v4666_v50  ;;  %v1932_v42 = vld [vmem:[#allocation2 + $0x36] sm:$0xff]  ;;  %v2089_v35 = vsel %vm1993_vm15, %v1929_v17, 0.0  ;;  %v4695_v37 = vadd.s32 192, %v4069_v2  ;;  %v4698_v38 = vadd.s32 200, %v4069_v2  ;;  %v2127_v39 = vmul.f32 %v4643_v1, %v1930_v24 }
  0xca   : > { %6125 = vst [vmem:[#allocation83_spill] sm:$0xff] %v4669_v25  ;;  %6126 = vst [vmem:[#allocation84_spill] sm:$0xff] %v4672_v54  ;;  %v1933_v34 = vld [vmem:[#allocation2 + $0x3e] sm:$0xff]  ;;  %v1934_v36 = vld [vmem:[#allocation2 + $0x46] sm:$0xff]  ;;  %v2126_v48 = vmul.f32 %v4643_v1, %v2089_v35  ;;  %v2129_v33 = vmul.f32 %v4643_v1, %v1932_v42 }
  0xcb   : > { %6127 = vst [vmem:[#allocation85_spill] sm:$0xff] %v4675_v26  ;;  %6128 = vst [vmem:[#allocation86_spill] sm:$0xff] %v4678_v28  ;;  %v2093_v57 = vsel %vm1997_vm0, %v1933_v34, 0.0  ;;  %v2291_v29 = vld [vmem:[#allocation2 + $0x22] sm:$0xff]  ;;  %v2292_v58 = vld [vmem:[#allocation2 + $0x2a] sm:$0xff]  ;;  %v4709_v6 = vmul.f32 %v4643_v1, %v1934_v36  ;;  %v2260_v19 = vadd.f32 %v2228_v56, %v2127_v39 }
  0xcc   : > { %6129 = vst [vmem:[#allocation87_spill] sm:$0xff] %v4681_v41  ;;  %6130 = vst [vmem:[#allocation88_spill] sm:$0xff] %v4684_v20  ;;  %v2130_v43 = vmul.f32 %v4643_v1, %v2093_v57  ;;  %v2294_v17 = vld [vmem:[#allocation2 + $0x3a] sm:$0xff]  ;;  %v2295_v23 = vld [vmem:[#allocation2 + $0x42] sm:$0xff]  ;;  %v2452_v49 = vsel %vm2388_vm1, %v2292_v58, 0.0  ;;  %v2488_v59 = vmul.f32 %v4666_v50, %v2291_v29  ;;  %v2259_v34 = vadd.f32 %v2227_v18, %v2126_v48 }
  0xcd   : > { %6131 = vst [vmem:[#allocation89_spill] sm:$0xff] %v4687_v31  ;;  %6132 = vst [vmem:[#allocation90_spill] sm:$0xff] %v4690_v44  ;;  %v2262_v35 = vadd.f32 %v2230_v46, %v2129_v33  ;;  %v2454_v24 = vsel %vm2390_vm2, %v2294_v17, 0.0  ;;  %v2489_v42 = vmul.f32 %v4666_v50, %v2452_v49  ;;  %v2492_v57 = vmul.f32 %v4666_v50, %v2295_v23  ;;  %v4720_v36 = vld [vmem:[%s5884_s6] ss:$0 sm:$0xff] }
  0xce   : > { %6133 = vst [vmem:[#allocation91_spill] sm:$0xff] %v4695_v37  ;;  %6134 = vst [vmem:[#allocation92_spill] sm:$0xff] %v4698_v38  ;;  %v2263_v10 = vadd.f32 %v2231_v52, %v2130_v43  ;;  %v2491_v4 = vmul.f32 %v4666_v50, %v2454_v24  ;;  %v2520_v0 = vadd.f32 %v2488_v59, %v2259_v34  ;;  %v4723_v29 = vadd.s32 208, %v4069_v2  ;;  %v4730_v23 = vld [vmem:[%s5885_s7 + $0x1] ss:$0 sm:$0xff]  ;;  %v4754_v24 = vld [vmem:[#allocation2 + $0x2e] sm:$0xff] }
  0xcf   : > { %6135 = vst [vmem:[#allocation93_spill] sm:$0xff] %v4709_v6  ;;  %6136 = vst [vmem:[#allocation94_spill] sm:$0xff] %v4720_v36  ;;  %v5970_v18 = vand.u32 15, %v4646_v30  ;;  %v2521_v46 = vadd.f32 %v2489_v42, %v2260_v19  ;;  %v5972_v48 = vand.u32 15, %v4652_v3  ;;  %v4737_v2 = vld [vmem:[%s5885_s7 + $0x2] ss:$0 sm:$0xff] }
  0xd0   : > { %6137 = vst [vmem:[#allocation95_spill] sm:$0xff] %v4723_v29  ;;  %v2523_v52 = vadd.f32 %v2491_v4, %v2262_v35  ;;  %v2524_v60 = vadd.f32 %v2492_v57, %v2263_v10  ;;  %6138 = vst [vmem:[#allocation96_spill] sm:$0xff] %v4730_v23  ;;  %v2559_v39 = vadd.f32 %v4720_v36, %v2520_v0  ;;  %v5973_v19 = vand.u32 15, %v4658_v8  ;;  %v4756_v42 = vld [vmem:[#allocation2 + $0x32] sm:$0xff]  ;;  %v933_v34 = vld [vmem:[#allocation2 + $0x7f] sm:$0xff] }
  0xd1   : > { %6139 = vst [vmem:[#allocation97_spill] sm:$0xff] %v4737_v2  ;;  %v4743_v10 = vadd.f32 %v4720_v36, %v2521_v46  ;;  %v5974_v17 = vand.u32 15, %v4669_v25  ;;  %v5977_v35 = vand.u32 15, %v4675_v26  ;;  %6142 = vst [vmem:[#allocation100_spill] sm:$0xff] %v4754_v24  ;;  %v5980_v46 = vand.u32 15, %v4681_v41  ;;  %v941_v8 = vld [vmem:[#allocation2 + $0xbf] sm:$0xff] }
  0xd2   : > { %v2562_v58 = vadd.f32 %v4720_v36, %v2523_v52  ;;  %v2563_v43 = vadd.f32 %v4720_v36, %v2524_v60  ;;  %2591 = vst [vmem:[#allocation2 + $0x20] sm:$0xff] %v2559_v39  ;;  %v4749_v49 = vmul.f32 %v4622_v40, %v2559_v39  ;;  %v2733_v59 = vmul.f32 %v4730_v23, %v2559_v39  ;;  %v935_v39 = vld [vmem:[#allocation2 + $0x8f] sm:$0xff]  ;;  %v937_v52 = vld [vmem:[#allocation2 + $0x9f] sm:$0xff]  ;;  %v944_v6 = vld [vmem:[#allocation2 + $0xd7] sm:$0xff] }
  0xd3   : > { %6140 = vst [vmem:[#allocation98_spill] sm:$0xff] %v4743_v10  ;;  %6143 = vst [vmem:[#allocation101_spill] sm:$0xff] %v4756_v42  ;;  %v967_v56 = vadd.s32 4294967295, %v5973_v19  ;;  %v969_v4 = vadd.s32 4294967295, %v5974_v17  ;;  %v971_v0 = vadd.s32 4294967295, %v5977_v35  ;;  %v6145_v30 = vand.u32 15, %v4687_v31 }
  0xd4   : > { %6141 = vst [vmem:[#allocation99_spill] sm:$0xff] %v4749_v49  ;;  %2595 = vst [vmem:[#allocation2 + $0x40] sm:$0xff] %v2563_v43  ;;  %v2834_v57 = vmul.f32 %v4737_v2, %v2563_v43  ;;  %v2765_v60 = vadd.f32 %v2733_v59, %v4638_v22  ;;  %v4770_v43 = vld [vmem:[%s5886_s8] ss:$0 sm:$0xff]  ;;  %v965_v22 = vadd.s32 4294967295, %v5972_v48  ;;  %v931_v59 = vld [vmem:[#allocation2 + $0x6f] sm:$0xff] }
  0xd5   : > { %2592 = vst [vmem:[#allocation2 + $0x28] sm:$0xff] %v4743_v10  ;;  %2594 = vst [vmem:[#allocation2 + $0x38] sm:$0xff] %v2562_v58  ;;  %v963_v58 = vadd.s32 4294967295, %v5970_v18  ;;  %v973_v18 = vadd.s32 4294967295, %v5980_v46  ;;  %v975_v48 = vadd.s32 4294967295, %v6145_v30  ;;  %v6147_v49 = vand.u32 15, %v4723_v29 }
  0xd6   : > { %6144 = vst [vmem:[#allocation102_spill] sm:$0xff] %v4770_v43  ;;  %v2866_v33 = vadd.f32 %v2834_v57, %v2765_v60  ;;  %v6146_v57 = vand.u32 15, %v4695_v37  ;;  %v939_v17 = vld [vmem:[#allocation2 + $0xaf] sm:$0xff]  ;;  %vm997_vm4 = vcmp.ge.s32.totalorder %v965_v22, 0  ;;  %vm999_vm5 = vcmp.ge.s32.totalorder %v967_v56, 0  ;;  %v945_v35 = vld [vmem:[#allocation2 + $0xdf] sm:$0xff] }
  0xd7   : > { %v979_v19 = vadd.s32 4294967295, %v6147_v49  ;;  %v943_v26 = vld [vmem:[#allocation2 + $0xcf] sm:$0xff]  ;;  %vm995_vm3 = vcmp.ge.s32.totalorder %v963_v58, 0  ;;  %vm1001_vm6 = vcmp.ge.s32.totalorder %v969_v4, 0  ;;  %vm1003_vm7 = vcmp.ge.s32.totalorder %v971_v0, 0  ;;  %v934_v30 = vld [vmem:[#allocation2 + $0x87] sm:$0xff] }
  0xd8   : > { %v977_v60 = vadd.s32 4294967295, %v6146_v57  ;;  %v2905_v42 = vadd.f32 %v4770_v43, %v2866_v33  ;;  %v947_v2 = vld [vmem:[#allocation2 + $0xef] sm:$0xff]  ;;  %vm1005_vm8 = vcmp.ge.s32.totalorder %v973_v18, 0  ;;  %vm1007_vm9 = vcmp.ge.s32.totalorder %v975_v48, 0  ;;  %v936_v57 = vld [vmem:[#allocation2 + $0x97] sm:$0xff]  ;;  %v938_v33 = vld [vmem:[#allocation2 + $0xa7] sm:$0xff] }
  0xd9   : > { %vm1011_vm11 = vcmp.ge.s32.totalorder %v979_v19, 0  ;;  %v1091_v49 = vsel %vm995_vm3, %v931_v59, 0.0  ;;  %v1093_v46 = vsel %vm997_vm4, %v933_v34, 0.0  ;;  %v940_v29 = vld [vmem:[#allocation2 + $0xb7] sm:$0xff]  ;;  %v1095_v37 = vsel %vm999_vm5, %v935_v39, 0.0  ;;  %v942_v31 = vld [vmem:[#allocation2 + $0xc7] sm:$0xff] }
  0xda   : > { %3472 = vmatprep.mubr.f32.mxu0 %v2905_v42  ;;  %vm1009_vm10 = vcmp.ge.s32.totalorder %v977_v60, 0  ;;  %v1097_v58 = vsel %vm1001_vm6, %v937_v52, 0.0  ;;  %v1099_v22 = vsel %vm1003_vm7, %v939_v17, 0.0  ;;  %v1101_v43 = vsel %vm1005_vm8, %v941_v8, 0.0  ;;  %v946_v36 = vld [vmem:[#allocation2 + $0xe7] sm:$0xff] }
  0xdb   : > { %v1103_v4 = vsel %vm1007_vm9, %v943_v26, 0.0  ;;  %v1105_v18 = vsel %vm1009_vm10, %v945_v35, 0.0  ;;  %v1107_v0 = vsel %vm1011_vm11, %v947_v2, 0.0  ;;  %v1128_v42 = vmul.f32 %v4245_v47, %v1091_v49 }
  0xdc   : > { %v1130_v19 = vmul.f32 %v4245_v47, %v1093_v46  ;;  %v1131_v34 = vmul.f32 %v4245_v47, %v934_v30  ;;  %v1132_v59 = vmul.f32 %v4245_v47, %v1095_v37  ;;  %v1133_v56 = vmul.f32 %v4245_v47, %v936_v57  ;;  %v1208_v57 = vld [vmem:[#allocation2 + $0xf0] sm:$0xff] }
  0xdd   : > { %v1134_v17 = vmul.f32 %v4245_v47, %v1097_v58  ;;  %v1135_v8 = vmul.f32 %v4245_v47, %v938_v33  ;;  %v1136_v48 = vmul.f32 %v4245_v47, %v1099_v22  ;;  %v1137_v26 = vmul.f32 %v4245_v47, %v940_v29  ;;  %v6148_v58 = vld [vmem:[#allocation56_spill] sm:$0xff] }
  0xde   : > { %v1138_v2 = vmul.f32 %v4245_v47, %v1101_v43  ;;  %v1139_v35 = vmul.f32 %v4245_v47, %v942_v31  ;;  %v1140_v46 = vmul.f32 %v4245_v47, %v1103_v4  ;;  %v1141_v52 = vmul.f32 %v4245_v47, %v944_v6  ;;  %v6149_v4 = vld [vmem:[#allocation57_spill] sm:$0xff] }
  0xdf   : > { %v1142_v37 = vmul.f32 %v4245_v47, %v1105_v18  ;;  %v1143_v39 = vmul.f32 %v4245_v47, %v946_v36  ;;  %v1144_v60 = vmul.f32 %v4245_v47, %v1107_v0  ;;  %v1229_v30 = vmul.f32 %v4247_v45, %v4188_v12  ;;  %v6150_v0 = vld [vmem:[#allocation58_spill] sm:$0xff] }
  0xe0   : > { %v1230_v29 = vmul.f32 %v4247_v45, %v4276_v27  ;;  %v1231_v31 = vmul.f32 %v4247_v45, %v4380_v51  ;;  %v1232_v43 = vmul.f32 %v4247_v45, %v4395_v61  ;;  %v1233_v6 = vmul.f32 %v4247_v45, %v4426_v55  ;;  %v6151_v51 = vld [vmem:[#allocation59_spill] sm:$0xff]  ;;  %v6152_v61 = vld [vmem:[#allocation60_spill] sm:$0xff]  ;;  %v6153_v27 = vld [vmem:[#allocation61_spill] sm:$0xff] }
  0xe1   : > { %v1234_v36 = vmul.f32 %v4247_v45, %v4429_v53  ;;  %v1235_v47 = vmul.f32 %v4247_v45, %v4432_v63  ;;  %v1236_v49 = vmul.f32 %v4247_v45, %v4444_v13  ;;  %v1237_v33 = vmul.f32 %v4247_v45, %v4447_v32  ;;  %v6154_v13 = vld [vmem:[#allocation62_spill] sm:$0xff] }
  0xe2   : > { %v1238_v22 = vmul.f32 %v4247_v45, %v6148_v58  ;;  %v1239_v18 = vmul.f32 %v4247_v45, %v6149_v4  ;;  %v1240_v55 = vmul.f32 %v4247_v45, %v6150_v0  ;;  %v1241_v53 = vmul.f32 %v4247_v45, %v6151_v51 }
  0xe3   : > { %v1242_v12 = vmul.f32 %v4247_v45, %v6152_v61  ;;  %v1243_v63 = vmul.f32 %v4247_v45, %v6153_v27  ;;  %v1244_v32 = vmul.f32 %v4247_v45, %v6154_v13  ;;  %v1245_v58 = vmul.f32 %v4247_v45, %v1208_v57 }
  0xe4   : > { %v4844_v24 = vadd.f32 %v1229_v30, %v1128_v42  ;;  %v4847_v4 = vadd.f32 %v1230_v29, %v4701_v11  ;;  %v4849_v0 = vadd.f32 %v1231_v31, %v1130_v19  ;;  %v4851_v50 = vadd.f32 %v1232_v43, %v1131_v34  ;;  %v1296_v30 = vld [vmem:[#allocation2 + $0x89] sm:$0xff] }
  0xe5   : > { %v4853_v51 = vadd.f32 %v1233_v6, %v1132_v59  ;;  %v4855_v61 = vadd.f32 %v1234_v36, %v1133_v56  ;;  %v4857_v1 = vadd.f32 %v1235_v47, %v1134_v17  ;;  %v4859_v27 = vadd.f32 %v1236_v49, %v1135_v8  ;;  %v1294_v8 = vld [vmem:[#allocation2 + $0x79] sm:$0xff]  ;;  %v1304_v6 = vld [vmem:[#allocation2 + $0xc9] sm:$0xff] }
  0xe6   : > { %v4861_v13 = vadd.f32 %v1237_v33, %v1136_v48  ;;  %v4863_v45 = vadd.f32 %v1238_v22, %v1137_v26  ;;  %v4865_v42 = vadd.f32 %v1239_v18, %v1138_v2  ;;  %v4867_v11 = vadd.f32 %v1240_v55, %v1139_v35  ;;  %v1298_v48 = vld [vmem:[#allocation2 + $0x99] sm:$0xff]  ;;  %v1295_v33 = vld [vmem:[#allocation2 + $0x81] sm:$0xff]  ;;  %v1297_v22 = vld [vmem:[#allocation2 + $0x91] sm:$0xff] }
  0xe7   : > { %v4869_v19 = vadd.f32 %v1241_v53, %v1140_v46  ;;  %v4871_v34 = vadd.f32 %v1242_v12, %v1141_v52  ;;  %v4873_v59 = vadd.f32 %v1243_v63, %v1142_v37  ;;  %v4875_v56 = vadd.f32 %v1244_v32, %v1143_v39  ;;  %v1293_v12 = vld [vmem:[#allocation2 + $0x71] sm:$0xff]  ;;  %v1300_v46 = vld [vmem:[#allocation2 + $0xa9] sm:$0xff]  ;;  %v1302_v63 = vld [vmem:[#allocation2 + $0xb9] sm:$0xff] }
  0xe8   : > { %v4877_v17 = vadd.f32 %v1245_v58, %v1144_v60  ;;  %v6155_v26 = vand.u32 15, %v4649_v7  ;;  %v6156_v2 = vand.u32 15, %v4655_v5  ;;  %v6157_v53 = vand.u32 15, %v4661_v14  ;;  %v1306_v36 = vld [vmem:[#allocation2 + $0xd9] sm:$0xff]  ;;  %v1308_v58 = vld [vmem:[#allocation2 + $0xe9] sm:$0xff]  ;;  %v1299_v18 = vld [vmem:[#allocation2 + $0xa1] sm:$0xff] }
  0xe9   : > { %v6158_v32 = vand.u32 15, %v4672_v54  ;;  %v6159_v37 = vand.u32 15, %v4678_v28  ;;  %v6160_v60 = vand.u32 15, %v4684_v20  ;;  %v6161_v31 = vand.u32 15, %v4690_v44  ;;  %v6163_v44 = vld [vmem:[#allocation49_spill] sm:$0xff] }
  0xea   : > { %v1326_v57 = vadd.s32 1, %v6155_v26  ;;  %v1328_v55 = vadd.s32 1, %v6156_v2  ;;  %v1330_v35 = vadd.s32 1, %v6157_v53  ;;  %v6162_v47 = vand.u32 15, %v4698_v38  ;;  %v6181_v28 = vld [vmem:[#allocation65_spill] sm:$0xff] }
  0xeb   : > { %v1332_v52 = vadd.s32 1, %v6158_v32  ;;  %v1334_v39 = vadd.s32 1, %v6159_v37  ;;  %v1336_v29 = vadd.s32 1, %v6160_v60  ;;  %v1338_v43 = vadd.s32 1, %v6161_v31  ;;  %v1301_v32 = vld [vmem:[#allocation2 + $0xb1] sm:$0xff]  ;;  %v1303_v37 = vld [vmem:[#allocation2 + $0xc1] sm:$0xff] }
  0xec   : > { %v1340_v49 = vadd.s32 1, %v6162_v47  ;;  %vm1390_vm12 = vcmp.lt.s32.totalorder %v1326_v57, 16  ;;  %vm1392_vm13 = vcmp.lt.s32.totalorder %v1328_v55, 16  ;;  %vm1394_vm14 = vcmp.lt.s32.totalorder %v1330_v35, 16  ;;  %v1305_v55 = vld [vmem:[#allocation2 + $0xd1] sm:$0xff]  ;;  %v1307_v35 = vld [vmem:[#allocation2 + $0xe1] sm:$0xff] }
  0xed   : > { %vm1396_vm15 = vcmp.lt.s32.totalorder %v1332_v52, 16  ;;  %vm1398_vm0 = vcmp.lt.s32.totalorder %v1334_v39, 16  ;;  %vm1400_vm1 = vcmp.lt.s32.totalorder %v1336_v29, 16  ;;  %vm1402_vm2 = vcmp.lt.s32.totalorder %v1338_v43, 16  ;;  %v1309_v43 = vld [vmem:[#allocation2 + $0xf1] sm:$0xff] }
  0xee   : > { %vm1404_vm3 = vcmp.lt.s32.totalorder %v1340_v49, 16  ;;  %v1454_v26 = vsel %vm1390_vm12, %v1294_v8, 0.0  ;;  %v1456_v2 = vsel %vm1392_vm13, %v1296_v30, 0.0  ;;  %v1458_v53 = vsel %vm1394_vm14, %v1298_v48, 0.0 }
  0xef   : > { %v1460_v60 = vsel %vm1396_vm15, %v1300_v46, 0.0  ;;  %v1462_v31 = vsel %vm1398_vm0, %v1302_v63, 0.0  ;;  %v1464_v47 = vsel %vm1400_vm1, %v1304_v6, 0.0  ;;  %v1466_v57 = vsel %vm1402_vm2, %v1306_v36, 0.0 }
  0xf0   : > { %v1468_v38 = vsel %vm1404_vm3, %v1308_v58, 0.0  ;;  %v1490_v52 = vmul.f32 %v6163_v44, %v1293_v12  ;;  %v1491_v39 = vmul.f32 %v6163_v44, %v1454_v26  ;;  %v1492_v29 = vmul.f32 %v6163_v44, %v1295_v33 }
  0xf1   : > { %v1493_v8 = vmul.f32 %v6163_v44, %v1456_v2  ;;  %v1494_v30 = vmul.f32 %v6163_v44, %v1297_v22  ;;  %v1495_v48 = vmul.f32 %v6163_v44, %v1458_v53  ;;  %v1496_v46 = vmul.f32 %v6163_v44, %v1299_v18 }
  0xf2   : > { %v1497_v63 = vmul.f32 %v6163_v44, %v1460_v60  ;;  %v1498_v6 = vmul.f32 %v6163_v44, %v1301_v32  ;;  %v1499_v36 = vmul.f32 %v6163_v44, %v1462_v31  ;;  %v1500_v12 = vmul.f32 %v6163_v44, %v1303_v37 }
  0xf3   : > { %v1501_v49 = vmul.f32 %v6163_v44, %v1464_v47  ;;  %v1502_v33 = vmul.f32 %v6163_v44, %v1305_v55  ;;  %v1503_v58 = vmul.f32 %v6163_v44, %v1466_v57  ;;  %v1504_v22 = vmul.f32 %v6163_v44, %v1307_v35  ;;  %v6164_v55 = vld [vmem:[#allocation63_spill] sm:$0xff] }
  0xf4   : > { %v1505_v26 = vmul.f32 %v6163_v44, %v1468_v38  ;;  %v1506_v18 = vmul.f32 %v6163_v44, %v1309_v43  ;;  %v1522_v2 = vadd.f32 %v1490_v52, %v4844_v24  ;;  %v1523_v53 = vadd.f32 %v1491_v39, %v4847_v4 }
  0xf5   : > { %v1524_v32 = vadd.f32 %v1492_v29, %v4849_v0  ;;  %v1525_v37 = vadd.f32 %v1493_v8, %v4851_v50  ;;  %v1526_v60 = vadd.f32 %v1494_v30, %v4853_v51  ;;  %v1527_v31 = vadd.f32 %v1495_v48, %v4855_v61  ;;  %v6179_v48 = vld [vmem:[#allocation64_spill] sm:$0xff] }
  0xf6   : > { %v1528_v47 = vadd.f32 %v1496_v46, %v4857_v1  ;;  %v1529_v57 = vadd.f32 %v1497_v63, %v4859_v27  ;;  %v1530_v38 = vadd.f32 %v1498_v6, %v4861_v13  ;;  %v1531_v44 = vadd.f32 %v1499_v36, %v4863_v45 }
  0xf7   : > { %v1532_v24 = vadd.f32 %v1500_v12, %v4865_v42  ;;  %v1533_v4 = vadd.f32 %v1501_v49, %v4867_v11  ;;  %v1534_v0 = vadd.f32 %v1502_v33, %v4869_v19  ;;  %v1535_v50 = vadd.f32 %v1503_v58, %v4871_v34 }
  0xf8   : > { %v1536_v51 = vadd.f32 %v1504_v22, %v4873_v59  ;;  %v1537_v61 = vadd.f32 %v1505_v26, %v4875_v56  ;;  %v1538_v1 = vadd.f32 %v1506_v18, %v4877_v17  ;;  %v4930_v27 = vadd.f32 %v6164_v55, %v1522_v2 }
  0xf9   : > { %v4933_v13 = vadd.f32 %v6164_v55, %v1523_v53  ;;  %v4936_v45 = vadd.f32 %v6164_v55, %v1524_v32  ;;  %v4939_v42 = vadd.f32 %v6164_v55, %v1525_v37  ;;  %v4942_v11 = vadd.f32 %v6164_v55, %v1526_v60 }
  0xfa   : > { %v4945_v19 = vadd.f32 %v6164_v55, %v1527_v31  ;;  %v4948_v34 = vadd.f32 %v6164_v55, %v1528_v47  ;;  %v4951_v59 = vadd.f32 %v6164_v55, %v1529_v57  ;;  %v4954_v56 = vadd.f32 %v6164_v55, %v1530_v38  ;;  %v6180_v57 = vld [vmem:[#allocation67_spill] sm:$0xff] }
  0xfb   : > { %6165 = vst [vmem:[#allocation49_spill] sm:$0xff] %v4939_v42  ;;  %6166 = vst [vmem:[#allocation63_spill] sm:$0xff] %v4942_v11  ;;  %v4957_v17 = vadd.f32 %v6164_v55, %v1531_v44  ;;  %v4960_v35 = vadd.f32 %v6164_v55, %v1532_v24  ;;  %v4963_v52 = vadd.f32 %v6164_v55, %v1533_v4 }
  0xfc   : > { %6167 = vst [vmem:[#allocation103_spill] sm:$0xff] %v4945_v19  ;;  %6168 = vst [vmem:[#allocation104_spill] sm:$0xff] %v4948_v34  ;;  %v4966_v39 = vadd.f32 %v6164_v55, %v1534_v0  ;;  %v4969_v29 = vadd.f32 %v6164_v55, %v1535_v50  ;;  %v4972_v43 = vadd.f32 %v6164_v55, %v1536_v51 }
  0xfd   : > { %6169 = vst [vmem:[#allocation105_spill] sm:$0xff] %v4951_v59  ;;  %6170 = vst [vmem:[#allocation106_spill] sm:$0xff] %v4954_v56  ;;  %v4975_v8 = vadd.f32 %v6164_v55, %v1537_v61  ;;  %v4978_v30 = vadd.f32 %v6164_v55, %v1538_v1  ;;  %v1661_v46 = vmul.f32 %v6179_v48, %v4521_v62 }
  0xfe   : > { %6171 = vst [vmem:[#allocation107_spill] sm:$0xff] %v4957_v17  ;;  %6172 = vst [vmem:[#allocation108_spill] sm:$0xff] %v4960_v35  ;;  %v1662_v63 = vmul.f32 %v6179_v48, %v4524_v9  ;;  %v1663_v6 = vmul.f32 %v6179_v48, %v4527_v16  ;;  %v1664_v36 = vmul.f32 %v6179_v48, %v4930_v27 }
  0xff   : > { %6173 = vst [vmem:[#allocation109_spill] sm:$0xff] %v4963_v52  ;;  %6174 = vst [vmem:[#allocation110_spill] sm:$0xff] %v4966_v39  ;;  %v1665_v12 = vmul.f32 %v6179_v48, %v4933_v13  ;;  %v1666_v49 = vmul.f32 %v6179_v48, %v4936_v45  ;;  %v1667_v33 = vmul.f32 %v6179_v48, %v4939_v42 }
 0x100   : > { %6175 = vst [vmem:[#allocation111_spill] sm:$0xff] %v4969_v29  ;;  %6176 = vst [vmem:[#allocation112_spill] sm:$0xff] %v4972_v43  ;;  %v1668_v62 = vmul.f32 %v6179_v48, %v4942_v11  ;;  %v1669_v9 = vmul.f32 %v6179_v48, %v4945_v19  ;;  %v1670_v58 = vmul.f32 %v6179_v48, %v4948_v34 }
 0x101   : > { %6177 = vst [vmem:[#allocation113_spill] sm:$0xff] %v4975_v8  ;;  %6178 = vst [vmem:[#allocation114_spill] sm:$0xff] %v4978_v30  ;;  %v1671_v22 = vmul.f32 %v6179_v48, %v4951_v59  ;;  %v1672_v26 = vmul.f32 %v6179_v48, %v4954_v56  ;;  %v1673_v18 = vmul.f32 %v6179_v48, %v4957_v17 }
 0x102   : > { %v1674_v2 = vmul.f32 %v6179_v48, %v4960_v35  ;;  %v1675_v53 = vmul.f32 %v6179_v48, %v4963_v52  ;;  %v1676_v32 = vmul.f32 %v6179_v48, %v4966_v39  ;;  %v1677_v37 = vmul.f32 %v6179_v48, %v4969_v29 }
 0x103   : > { %v1678_v60 = vmul.f32 %v6179_v48, %v4972_v43  ;;  %v1679_v31 = vmul.f32 %v6179_v48, %v4975_v8  ;;  %v1680_v47 = vmul.f32 %v6179_v48, %v4978_v30  ;;  %v1732_v38 = vmul.f32 %v6180_v57, %v4527_v16 }
 0x104   : > { %v1733_v44 = vmul.f32 %v6180_v57, %v4930_v27  ;;  %v1734_v24 = vmul.f32 %v6180_v57, %v4933_v13  ;;  %v1735_v4 = vmul.f32 %v6180_v57, %v4936_v45  ;;  %v1736_v0 = vmul.f32 %v6180_v57, %v4939_v42 }
 0x105   : > { %v1737_v50 = vmul.f32 %v6180_v57, %v4942_v11  ;;  %v1738_v51 = vmul.f32 %v6180_v57, %v4945_v19  ;;  %v1739_v16 = vmul.f32 %v6180_v57, %v4948_v34  ;;  %v1740_v61 = vmul.f32 %v6180_v57, %v4951_v59 }
 0x106   : > { %v1741_v1 = vmul.f32 %v6180_v57, %v4954_v56  ;;  %v1742_v55 = vmul.f32 %v6180_v57, %v4957_v17  ;;  %v1743_v48 = vmul.f32 %v6180_v57, %v4960_v35  ;;  %v1744_v20 = vmul.f32 %v6180_v57, %v4963_v52 }
 0x107   : > { %v1745_v54 = vmul.f32 %v6180_v57, %v4966_v39  ;;  %v1746_v5 = vmul.f32 %v6180_v57, %v4969_v29  ;;  %v1747_v23 = vmul.f32 %v6180_v57, %v4972_v43  ;;  %v1748_v10 = vmul.f32 %v6180_v57, %v4975_v8 }
 0x108   : > { %v1749_v40 = vmul.f32 %v6180_v57, %v4978_v30  ;;  %v1750_v14 = vmul.f32 %v6180_v57, %v6181_v28  ;;  %v1764_v7 = vadd.f32 %v1732_v38, %v1661_v46  ;;  %v1765_v41 = vadd.f32 %v1733_v44, %v1662_v63  ;;  %v6182_v57 = vld [vmem:[#allocation68_spill] sm:$0xff]  ;;  %v6196_v38 = vld [vmem:[#allocation114_spill] sm:$0xff] }
 0x109   : > { %v1766_v25 = vadd.f32 %v1734_v24, %v1663_v6  ;;  %v1767_v3 = vadd.f32 %v1735_v4, %v1664_v36  ;;  %v1768_v15 = vadd.f32 %v1736_v0, %v1665_v12  ;;  %v1769_v39 = vadd.f32 %v1737_v50, %v1666_v49  ;;  %v6183_v12 = vld [vmem:[#allocation49_spill] sm:$0xff]  ;;  %v6197_v4 = vld [vmem:[#allocation66_spill] sm:$0xff] }
 0x10a   : > { %v1770_v52 = vadd.f32 %v1738_v51, %v1667_v33  ;;  %v1771_v29 = vadd.f32 %v1739_v16, %v1668_v62  ;;  %v1772_v35 = vadd.f32 %v1740_v61, %v1669_v9  ;;  %v1773_v17 = vadd.f32 %v1741_v1, %v1670_v58  ;;  %v6187_v49 = vld [vmem:[#allocation105_spill] sm:$0xff]  ;;  %v6188_v33 = vld [vmem:[#allocation106_spill] sm:$0xff]  ;;  %v6189_v62 = vld [vmem:[#allocation107_spill] sm:$0xff] }
 0x10b   : > { %v1774_v43 = vadd.f32 %v1742_v55, %v1671_v22  ;;  %v1775_v56 = vadd.f32 %v1743_v48, %v1672_v26  ;;  %v1776_v59 = vadd.f32 %v1744_v20, %v1673_v18  ;;  %v1777_v8 = vadd.f32 %v1745_v54, %v1674_v2  ;;  %v6184_v54 = vld [vmem:[#allocation63_spill] sm:$0xff]  ;;  %v6190_v9 = vld [vmem:[#allocation108_spill] sm:$0xff]  ;;  %v6191_v22 = vld [vmem:[#allocation109_spill] sm:$0xff] }
 0x10c   : > { %v1778_v34 = vadd.f32 %v1746_v5, %v1675_v53  ;;  %v1779_v19 = vadd.f32 %v1747_v23, %v1676_v32  ;;  %v1780_v30 = vadd.f32 %v1748_v10, %v1677_v37  ;;  %v1781_v11 = vadd.f32 %v1749_v40, %v1678_v60  ;;  %v6185_v23 = vld [vmem:[#allocation103_spill] sm:$0xff]  ;;  %v6192_v18 = vld [vmem:[#allocation110_spill] sm:$0xff]  ;;  %v6194_v37 = vld [vmem:[#allocation112_spill] sm:$0xff] }
 0x10d   : > { %v1782_v42 = vadd.f32 %v1750_v14, %v1679_v31  ;;  %v1783_v46 = vadd.f32 %v6182_v57, %v1680_v47  ;;  %v1802_v63 = vmul.f32 %v4577_v21, %v4930_v27  ;;  %v1803_v6 = vmul.f32 %v4577_v21, %v4933_v13  ;;  %v6186_v14 = vld [vmem:[#allocation104_spill] sm:$0xff]  ;;  %v6193_v53 = vld [vmem:[#allocation111_spill] sm:$0xff]  ;;  %v6195_v31 = vld [vmem:[#allocation113_spill] sm:$0xff] }
 0x10e   : > { %v1804_v36 = vmul.f32 %v4577_v21, %v4936_v45  ;;  %v1805_v20 = vmul.f32 %v4577_v21, %v6183_v12  ;;  %v1806_v5 = vmul.f32 %v4577_v21, %v6184_v54  ;;  %v1807_v40 = vmul.f32 %v4577_v21, %v6185_v23  ;;  %v6198_v50 = vld [vmem:[#allocation69_spill] sm:$0xff] }
 0x10f   : > { %v1808_v10 = vmul.f32 %v4577_v21, %v6186_v14  ;;  %v1809_v27 = vmul.f32 %v4577_v21, %v6187_v49  ;;  %v1810_v13 = vmul.f32 %v4577_v21, %v6188_v33  ;;  %v1811_v45 = vmul.f32 %v4577_v21, %v6189_v62 }
 0x110   : > { %v1812_v58 = vmul.f32 %v4577_v21, %v6190_v9  ;;  %v1813_v26 = vmul.f32 %v4577_v21, %v6191_v22  ;;  %v1814_v2 = vmul.f32 %v4577_v21, %v6192_v18  ;;  %v1815_v32 = vmul.f32 %v4577_v21, %v6193_v53  ;;  %v6199_v53 = vld [vmem:[#allocation70_spill] sm:$0xff] }
 0x111   : > { %v1816_v60 = vmul.f32 %v4577_v21, %v6194_v37  ;;  %v1817_v47 = vmul.f32 %v4577_v21, %v6195_v31  ;;  %v1818_v44 = vmul.f32 %v4577_v21, %v6196_v38  ;;  %v1819_v24 = vmul.f32 %v4577_v21, %v6181_v28  ;;  %v6208_v37 = vld [vmem:[#allocation73_spill] sm:$0xff] }
 0x112   : > { %v1820_v0 = vmul.f32 %v4577_v21, %v6197_v4  ;;  %v1834_v51 = vadd.f32 %v1802_v63, %v6198_v50  ;;  %v1835_v16 = vadd.f32 %v1803_v6, %v1764_v7  ;;  %v1836_v61 = vadd.f32 %v1804_v36, %v1765_v41  ;;  %v6200_v7 = vld [vmem:[#allocation71_spill] sm:$0xff]  ;;  %v6211_v50 = vld [vmem:[#allocation81_spill] sm:$0xff] }
 0x113   : > { %v1837_v1 = vadd.f32 %v1805_v20, %v1766_v25  ;;  %v1838_v55 = vadd.f32 %v1806_v5, %v1767_v3  ;;  %v1839_v48 = vadd.f32 %v1807_v40, %v1768_v15  ;;  %v1840_v57 = vadd.f32 %v1808_v10, %v1769_v39  ;;  %v6201_v25 = vld [vmem:[#allocation72_spill] sm:$0xff]  ;;  %v6202_v40 = vld [vmem:[#allocation78_spill] sm:$0xff] }
 0x114   : > { %v1841_v12 = vadd.f32 %v1809_v27, %v1770_v52  ;;  %v1842_v54 = vadd.f32 %v1810_v13, %v1771_v29  ;;  %v1843_v23 = vadd.f32 %v1811_v45, %v1772_v35  ;;  %v1844_v14 = vadd.f32 %v1812_v58, %v1773_v17  ;;  %v6204_v13 = vld [vmem:[#allocation83_spill] sm:$0xff] }
 0x115   : > { %v1845_v49 = vadd.f32 %v1813_v26, %v1774_v43  ;;  %v1846_v33 = vadd.f32 %v1814_v2, %v1775_v56  ;;  %v1847_v62 = vadd.f32 %v1815_v32, %v1776_v59  ;;  %v1848_v9 = vadd.f32 %v1816_v60, %v1777_v8  ;;  %v6206_v26 = vld [vmem:[#allocation87_spill] sm:$0xff] }
 0x116   : > { %v1849_v28 = vadd.f32 %v1817_v47, %v1778_v34  ;;  %v1850_v22 = vadd.f32 %v1818_v44, %v1779_v19  ;;  %v1851_v18 = vadd.f32 %v1819_v24, %v1780_v30  ;;  %v1852_v21 = vadd.f32 %v1820_v0, %v1781_v11  ;;  %v6209_v44 = vld [vmem:[#allocation77_spill] sm:$0xff]  ;;  %v2195_v0 = vld [vmem:[#allocation2 + $0x48] sm:$0xff] }
 0x117   : > { %v1853_v63 = vadd.f32 %v6199_v53, %v1782_v42  ;;  %v1854_v41 = vadd.f32 %v6200_v7, %v1783_v46  ;;  %v5101_v3 = vadd.f32 %v6201_v25, %v1834_v51  ;;  %v5104_v15 = vadd.f32 %v6201_v25, %v1835_v16 }
 0x118   : > { %v5107_v17 = vadd.f32 %v6201_v25, %v1836_v61  ;;  %v5110_v59 = vadd.f32 %v6201_v25, %v1837_v1  ;;  %v1877_v19 = vadd.f32 %v6201_v25, %v1838_v55  ;;  %v5114_v11 = vadd.f32 %v6201_v25, %v1839_v48  ;;  %v6213_v61 = vld [vmem:[#allocation86_spill] sm:$0xff]  ;;  %v6215_v48 = vld [vmem:[#allocation19_spill] sm:$0xff] }
 0x119   : > { %v5117_v42 = vadd.f32 %v6201_v25, %v1840_v57  ;;  %v5120_v34 = vadd.f32 %v6201_v25, %v1841_v12  ;;  %v1881_v56 = vadd.f32 %v6201_v25, %v1842_v54  ;;  %1905 = vst [vmem:[#allocation2 + $0x60] sm:$0xff] %v5101_v3  ;;  %v5125_v35 = vadd.f32 %v6201_v25, %v1843_v23  ;;  %v6217_v54 = vld [vmem:[#allocation21_spill] sm:$0xff] }
 0x11a   : > { %v5128_v52 = vadd.f32 %v6201_v25, %v1844_v14  ;;  %v1884_v39 = vadd.f32 %v6201_v25, %v1845_v49  ;;  %v1885_v29 = vadd.f32 %v6201_v25, %v1846_v33  ;;  %1908 = vst [vmem:[#allocation2 + $0x78] sm:$0xff] %v5110_v59  ;;  %1909 = vst [vmem:[#allocation2 + $0x80] sm:$0xff] %v1877_v19  ;;  %v6203_v10 = vand.u32 15, %v6202_v40 }
 0x11b   : > { %1906 = vst [vmem:[#allocation2 + $0x68] sm:$0xff] %v5104_v15  ;;  %1907 = vst [vmem:[#allocation2 + $0x70] sm:$0xff] %v5107_v17  ;;  %v5136_v43 = vadd.f32 %v6201_v25, %v1847_v62  ;;  %v5139_v8 = vadd.f32 %v6201_v25, %v1848_v9  ;;  %v5142_v30 = vadd.f32 %v6201_v25, %v1849_v28  ;;  %v6205_v45 = vand.u32 15, %v6204_v13  ;;  %v6219_v9 = vld [vmem:[#allocation20_spill] sm:$0xff] }
 0x11c   : > { %v5145_v46 = vadd.f32 %v6201_v25, %v1850_v22  ;;  %1910 = vst [vmem:[#allocation2 + $0x88] sm:$0xff] %v5114_v11  ;;  %1912 = vst [vmem:[#allocation2 + $0x98] sm:$0xff] %v5120_v34  ;;  %v5151_v6 = vadd.f32 %v6201_v25, %v1851_v18  ;;  %v5154_v36 = vadd.f32 %v6201_v25, %v1852_v21  ;;  %v1973_v27 = vadd.s32 4294967294, %v6203_v10  ;;  %v5195_v18 = vld [vmem:[#allocation2] sm:$0xff] }
 0x11d   : > { %1913 = vst [vmem:[#allocation2 + $0xa0] sm:$0xff] %v1881_v56  ;;  %1911 = vst [vmem:[#allocation2 + $0x90] sm:$0xff] %v5117_v42  ;;  %v5157_v20 = vadd.f32 %v6201_v25, %v1853_v63  ;;  %v5160_v5 = vadd.f32 %v6201_v25, %v1854_v41  ;;  %v1977_v58 = vadd.s32 4294967294, %v6205_v45  ;;  %v6207_v2 = vand.u32 15, %v6206_v26  ;;  %v6222_v21 = vld [vmem:[#allocation74_spill] sm:$0xff]  ;;  %v6225_v26 = vld [vmem:[#allocation75_spill] sm:$0xff] }
 0x11e   : > { %1914 = vst [vmem:[#allocation2 + $0xa8] sm:$0xff] %v5125_v35  ;;  %1915 = vst [vmem:[#allocation2 + $0xb0] sm:$0xff] %v5128_v52  ;;  %v2239_v60 = vmul.f32 %v6208_v37, %v1877_v19  ;;  %v2243_v31 = vmul.f32 %v6208_v37, %v1881_v56  ;;  %v2246_v47 = vmul.f32 %v6208_v37, %v1884_v39  ;;  %v6210_v24 = vand.u32 15, %v6209_v44  ;;  %v6223_v56 = vld [vmem:[#allocation98_spill] sm:$0xff] }
 0x11f   : > { %1916 = vst [vmem:[#allocation2 + $0xb8] sm:$0xff] %v1884_v39  ;;  %1917 = vst [vmem:[#allocation2 + $0xc0] sm:$0xff] %v1885_v29  ;;  %v1981_v32 = vadd.s32 4294967294, %v6207_v2  ;;  %v2247_v38 = vmul.f32 %v6208_v37, %v1885_v29  ;;  %vm2005_vm4 = vcmp.ge.s32.totalorder %v1973_v27, 0  ;;  %vm2009_vm5 = vcmp.ge.s32.totalorder %v1977_v58, 0  ;;  %v6224_v39 = vld [vmem:[#allocation96_spill] sm:$0xff] }
 0x120   : > { %1918 = vst [vmem:[#allocation2 + $0xc8] sm:$0xff] %v5136_v43  ;;  %1919 = vst [vmem:[#allocation2 + $0xd0] sm:$0xff] %v5139_v8  ;;  %v2334_v4 = vadd.s32 2, %v6210_v24  ;;  %v6212_v51 = vand.u32 15, %v6211_v50  ;;  %v6214_v1 = vand.u32 15, %v6213_v61  ;;  %v6216_v57 = vand.u32 15, %v6215_v48 }
 0x121   : > { %1920 = vst [vmem:[#allocation2 + $0xd8] sm:$0xff] %v5142_v30  ;;  %1921 = vst [vmem:[#allocation2 + $0xe0] sm:$0xff] %v5145_v46  ;;  %vm2013_vm6 = vcmp.ge.s32.totalorder %v1981_v32, 0  ;;  %v6218_v23 = vand.u32 15, %v6217_v54  ;;  %v1941_v49 = vld [vmem:[#allocation2 + $0x7e] sm:$0xff]  ;;  %v2232_v62 = vmul.f32 %v6208_v37, %v2195_v0  ;;  %v6220_v28 = vand.u32 15, %v6219_v9 }
 0x122   : > { %1922 = vst [vmem:[#allocation2 + $0xe8] sm:$0xff] %v5151_v6  ;;  %1923 = vst [vmem:[#allocation2 + $0xf0] sm:$0xff] %v5154_v36  ;;  %v2338_v16 = vadd.s32 2, %v6212_v51  ;;  %v2342_v55 = vadd.s32 2, %v6214_v1  ;;  %vm2398_vm7 = vcmp.lt.s32.totalorder %v2334_v4, 16  ;;  %v1963_v12 = vadd.s32 4294967294, %v6216_v57 }
 0x123   : > { %1924 = vst [vmem:[#allocation2 + $0xf8] sm:$0xff] %v5157_v20  ;;  %1925 = vst [vmem:[#allocation2 + $0x100] sm:$0xff] %v5160_v5  ;;  %v1967_v14 = vadd.s32 4294967294, %v6218_v23  ;;  %v2302_v33 = vld [vmem:[#allocation2 + $0x7a] sm:$0xff]  ;;  %v2328_v22 = vadd.s32 2, %v6220_v28  ;;  %v5199_v53 = vmul.f32 %v5195_v18, %v6222_v21  ;;  %v1942_v63 = vld [vmem:[#allocation2 + $0x86] sm:$0xff]  ;;  %v2734_v29 = vmul.f32 %v6224_v39, %v6223_v56 }
 0x124   : > { %vm2402_vm8 = vcmp.lt.s32.totalorder %v2338_v16, 16  ;;  %6221 = vst [vmem:[#allocation64_spill] sm:$0xff] %v5195_v18  ;;  %v1945_v7 = vld [vmem:[#allocation2 + $0x9e] sm:$0xff]  ;;  %v2101_v41 = vsel %vm2005_vm4, %v1941_v49, 0.0  ;;  %vm2406_vm9 = vcmp.lt.s32.totalorder %v2342_v55, 16  ;;  %v2462_v19 = vsel %vm2398_vm7, %v2302_v33, 0.0 }
 0x125   : > { %v2303_v25 = vld [vmem:[#allocation2 + $0x82] sm:$0xff]  ;;  %v2105_v45 = vsel %vm2009_vm5, %v1945_v7, 0.0  ;;  %v2138_v2 = vmul.f32 %v6225_v26, %v2101_v41  ;;  %v5207_v37 = vmul.f32 %v6225_v26, %v1942_v63  ;;  %v2306_v58 = vld [vmem:[#allocation2 + $0x9a] sm:$0xff]  ;;  %v1935_v21 = vld [vmem:[#allocation2 + $0x4e] sm:$0xff]  ;;  %vm1995_vm10 = vcmp.ge.s32.totalorder %v1963_v12, 0 }
 0x126   : > { %v1946_v40 = vld [vmem:[#allocation2 + $0xa6] sm:$0xff]  ;;  %v1948_v10 = vld [vmem:[#allocation2 + $0xb6] sm:$0xff]  ;;  %v1949_v13 = vld [vmem:[#allocation2 + $0xbe] sm:$0xff]  ;;  %v2142_v0 = vmul.f32 %v6225_v26, %v2105_v45  ;;  %v2466_v32 = vsel %vm2402_vm8, %v2306_v58, 0.0  ;;  %vm1999_vm11 = vcmp.ge.s32.totalorder %v1967_v14, 0  ;;  %vm2392_vm12 = vcmp.lt.s32.totalorder %v2328_v22, 16 }
 0x127   : > { %v6226_v44 = vld [vmem:[#allocation82_spill] sm:$0xff]  ;;  %v1950_v27 = vld [vmem:[#allocation2 + $0xc6] sm:$0xff]  ;;  %v2109_v4 = vsel %vm2013_vm6, %v1949_v13, 0.0  ;;  %v5215_v50 = vmul.f32 %v6225_v26, %v1946_v40  ;;  %v2145_v51 = vmul.f32 %v6225_v26, %v1948_v10  ;;  %v2271_v57 = vadd.f32 %v2239_v60, %v2138_v2  ;;  %v6229_v14 = vld [vmem:[#allocation93_spill] sm:$0xff] }
 0x128   : > { %v5210_v24 = vmul.f32 %v6226_v44, %v2462_v19  ;;  %v2307_v61 = vld [vmem:[#allocation2 + $0xa2] sm:$0xff]  ;;  %v2146_v1 = vmul.f32 %v6225_v26, %v2109_v4  ;;  %v5220_v48 = vmul.f32 %v6225_v26, %v1950_v27  ;;  %v2310_v54 = vld [vmem:[#allocation2 + $0xba] sm:$0xff]  ;;  %v2275_v49 = vadd.f32 %v2243_v31, %v2142_v0  ;;  %v6227_v16 = vld [vmem:[#allocation100_spill] sm:$0xff] }
 0x129   : > { %v2311_v23 = vld [vmem:[#allocation2 + $0xc2] sm:$0xff]  ;;  %v2278_v33 = vadd.f32 %v2246_v47, %v2145_v51  ;;  %v2470_v9 = vsel %vm2406_vm9, %v2310_v54, 0.0  ;;  %v2500_v28 = vmul.f32 %v6226_v44, %v2303_v25  ;;  %v5226_v7 = vmul.f32 %v6226_v44, %v2466_v32  ;;  %v2296_v25 = vld [vmem:[#allocation2 + $0x4a] sm:$0xff]  ;;  %v5253_v51 = vld [vmem:[%s5885_s7] ss:$0 sm:$0xff] }
 0x12a   : > { %v2279_v63 = vadd.f32 %v2247_v38, %v2146_v1  ;;  %v2504_v41 = vmul.f32 %v6226_v44, %v2307_v61  ;;  %v2507_v19 = vmul.f32 %v6226_v44, %v2470_v9  ;;  %v2508_v60 = vmul.f32 %v6226_v44, %v2311_v23  ;;  %v6228_v38 = vld [vmem:[#allocation94_spill] sm:$0xff]  ;;  %v6230_v23 = vld [vmem:[#allocation97_spill] sm:$0xff]  ;;  %v6231_v9 = vld [vmem:[#allocation80_spill] sm:$0xff] }
 0x12b   : > { %v2532_v56 = vadd.f32 %v2500_v28, %v2271_v57  ;;  %v2091_v55 = vsel %vm1995_vm10, %v6227_v16, 0.0  ;;  %v2095_v40 = vsel %vm1999_vm11, %v1935_v21, 0.0  ;;  %v2264_v4 = vadd.f32 %v2232_v62, %v6229_v14  ;;  %v5261_v62 = vld [vmem:[#allocation2 + $0xb2] sm:$0xff] }
 0x12c   : > { %v2536_v31 = vadd.f32 %v2504_v41, %v2275_v49  ;;  %v2539_v47 = vadd.f32 %v2507_v19, %v2278_v33  ;;  %v2540_v10 = vadd.f32 %v2508_v60, %v2279_v63  ;;  %v5236_v45 = vmul.f32 %v6225_v26, %v2091_v55  ;;  %v1943_v49 = vld [vmem:[#allocation2 + $0x8e] sm:$0xff] }
 0x12d   : > { %v5233_v13 = vadd.f32 %v6228_v38, %v2532_v56  ;;  %v5239_v2 = vmul.f32 %v6225_v26, %v2095_v40  ;;  %v2456_v61 = vsel %vm2392_vm12, %v2296_v25, 0.0  ;;  %v2766_v54 = vadd.f32 %v2734_v29, %v5199_v53  ;;  %v1947_v33 = vld [vmem:[#allocation2 + $0xae] sm:$0xff] }
 0x12e   : > { %v2575_v27 = vadd.f32 %v6228_v38, %v2536_v31  ;;  %v5243_v12 = vadd.f32 %v6228_v38, %v2539_v47  ;;  %v5247_v0 = vadd.f32 %v6228_v38, %v2540_v10  ;;  %v2493_v57 = vmul.f32 %v6226_v44, %v2456_v61  ;;  %v6233_v63 = vld [vmem:[#allocation85_spill] sm:$0xff]  ;;  %v5282_v47 = vld [vmem:[%s5883_s5 + $0x1] ss:$0 sm:$0xff] }
 0x12f   : > { %2603 = vst [vmem:[#allocation2 + $0x80] sm:$0xff] %v5233_v13  ;;  %v2676_v26 = vmul.f32 %v5253_v51, %v5233_v13  ;;  %v5259_v58 = vmul.f32 %v6224_v39, %v5233_v13  ;;  %v6232_v28 = vand.u32 15, %v6231_v9  ;;  %v6234_v41 = vand.u32 15, %v6233_v63  ;;  %v1951_v31 = vld [vmem:[#allocation2 + $0xce] sm:$0xff] }
 0x130   : > { %2607 = vst [vmem:[#allocation2 + $0xa0] sm:$0xff] %v2575_v27  ;;  %v5264_v22 = vmul.f32 %v5253_v51, %v2575_v27  ;;  %v2749_v1 = vmul.f32 %v6224_v39, %v2575_v27  ;;  %2610 = vst [vmem:[#allocation2 + $0xb8] sm:$0xff] %v5243_v12  ;;  %v2850_v32 = vmul.f32 %v6230_v23, %v5247_v0  ;;  %v6235_v39 = vld [vmem:[#allocation89_spill] sm:$0xff]  ;;  %v2308_v63 = vld [vmem:[#allocation2 + $0xaa] sm:$0xff] }
 0x131   : > { %2611 = vst [vmem:[#allocation2 + $0xc0] sm:$0xff] %v5247_v0  ;;  %v1975_v21 = vadd.s32 4294967294, %v6232_v28  ;;  %v1979_v19 = vadd.s32 4294967294, %v6234_v41  ;;  %v6236_v60 = vand.u32 15, %v6235_v39  ;;  %v2525_v29 = vadd.f32 %v2493_v57, %v2264_v4  ;;  %v2196_v57 = vld [vmem:[#allocation2 + $0x50] sm:$0xff] }
 0x132   : > { %v2781_v56 = vadd.f32 %v2749_v1, %v2676_v26  ;;  %v2240_v16 = vmul.f32 %v5282_v47, %v5114_v11  ;;  %v2244_v55 = vmul.f32 %v5282_v47, %v5125_v35  ;;  %v2248_v40 = vmul.f32 %v5282_v47, %v5136_v43  ;;  %v5296_v11 = vld [vmem:[%s5883_s5] ss:$0 sm:$0xff]  ;;  %v1936_v1 = vld [vmem:[#allocation2 + $0x56] sm:$0xff]  ;;  %v2312_v41 = vld [vmem:[#allocation2 + $0xca] sm:$0xff] }
 0x133   : > { %v1983_v44 = vadd.s32 4294967294, %v6236_v60  ;;  %vm2007_vm13 = vcmp.ge.s32.totalorder %v1975_v21, 0  ;;  %vm2011_vm14 = vcmp.ge.s32.totalorder %v1979_v19, 0  ;;  %v5291_v10 = vadd.f32 %v6228_v38, %v2525_v29  ;;  %v2192_v43 = vld [vmem:[#allocation2 + $0x30] sm:$0xff] }
 0x134   : > { %v2882_v25 = vadd.f32 %v2850_v32, %v2781_v56  ;;  %v2103_v27 = vsel %vm2007_vm13, %v1943_v49, 0.0  ;;  %v2107_v14 = vsel %vm2011_vm14, %v1947_v33, 0.0  ;;  %v2272_v61 = vadd.f32 %v2240_v16, %v5207_v37  ;;  %v6237_v32 = vld [vmem:[#allocation102_spill] sm:$0xff]  ;;  %v2304_v21 = vld [vmem:[#allocation2 + $0x8a] sm:$0xff] }
 0x135   : > { %vm2015_vm15 = vcmp.ge.s32.totalorder %v1983_v44, 0  ;;  %v2140_v35 = vmul.f32 %v5296_v11, %v2103_v27  ;;  %v2144_v26 = vmul.f32 %v5296_v11, %v2107_v14  ;;  %2596 = vst [vmem:[#allocation2 + $0x48] sm:$0xff] %v5291_v10  ;;  %v2835_v49 = vmul.f32 %v6230_v23, %v5291_v10  ;;  %v6238_v37 = vld [vmem:[#allocation79_spill] sm:$0xff]  ;;  %v6240_v60 = vld [vmem:[#allocation84_spill] sm:$0xff]  ;;  %v6244_v27 = vld [vmem:[#allocation101_spill] sm:$0xff] }
 0x136   : > { %v2111_v4 = vsel %vm2015_vm15, %v1951_v31, 0.0  ;;  %v2921_v38 = vadd.f32 %v6237_v32, %v2882_v25  ;;  %v2276_v9 = vadd.f32 %v2244_v55, %v5215_v50  ;;  %v2280_v28 = vadd.f32 %v2248_v40, %v5220_v48  ;;  %v6242_v29 = vld [vmem:[#allocation88_spill] sm:$0xff]  ;;  %v5322_v40 = vld [vmem:[%s5883_s5 + $0x2] ss:$0 sm:$0xff] }
 0x137   : > { %v2148_v33 = vmul.f32 %v5296_v11, %v2111_v4  ;;  %v6239_v19 = vand.u32 15, %v6238_v37  ;;  %v6241_v44 = vand.u32 15, %v6240_v60  ;;  %v6243_v31 = vand.u32 15, %v6242_v29  ;;  %v2297_v55 = vld [vmem:[#allocation2 + $0x52] sm:$0xff] }
 0x138   : > { %3496 = vmatprep.mubr.f32.mxu1 %v2921_v38  ;;  %v2867_v23 = vadd.f32 %v2835_v49, %v2766_v54  ;;  %v5315_v25 = vmul.f32 %v5296_v11, %v1936_v1  ;;  %v2229_v50 = vmul.f32 %v5282_v47, %v2192_v43  ;;  %v2233_v48 = vmul.f32 %v5282_v47, %v2196_v57  ;;  %v1944_v54 = vld [vmem:[#allocation2 + $0x96] sm:$0xff] }
 0x139   : > { %v2336_v39 = vadd.s32 2, %v6239_v19  ;;  %v2340_v56 = vadd.s32 2, %v6241_v44  ;;  %v2344_v16 = vadd.s32 2, %v6243_v31  ;;  %v2490_v14 = vmul.f32 %v5322_v40, %v6244_v27  ;;  %v1952_v4 = vld [vmem:[#allocation2 + $0xd6] sm:$0xff] }
 0x13a   : > { %v2906_v1 = vadd.f32 %v6237_v32, %v2867_v23  ;;  %v2265_v60 = vadd.f32 %v2233_v48, %v5239_v2  ;;  %v2494_v44 = vmul.f32 %v5322_v40, %v2297_v55  ;;  %v5337_v32 = vmul.f32 %v5296_v11, %v1952_v4  ;;  %v5348_v23 = vld [vmem:[%s5884_s6] ss:$0 sm:$0xff]  ;;  %v5373_v4 = vld [vmem:[%s5885_s7 + $0x1] ss:$0 sm:$0xff] }
 0x13b   : > { %vm2400_vm0 = vcmp.lt.s32.totalorder %v2336_v39, 16  ;;  %vm2404_vm1 = vcmp.lt.s32.totalorder %v2340_v56, 16  ;;  %vm2408_vm2 = vcmp.lt.s32.totalorder %v2344_v16, 16  ;;  %v2261_v39 = vadd.f32 %v2229_v50, %v5236_v45  ;;  %v2313_v50 = vld [vmem:[#allocation2 + $0xd2] sm:$0xff] }
 0x13c   : > { %v2464_v38 = vsel %vm2400_vm0, %v2304_v21, 0.0  ;;  %v2468_v43 = vsel %vm2404_vm1, %v2308_v63, 0.0  ;;  %v2472_v49 = vsel %vm2408_vm2, %v2312_v41, 0.0  ;;  %3473 = vmatmul.mubr.f32.vlgmr.msra.gmra.mrb[0].mxu0 %v2906_v1  ;;  %v5334_v56 = vmul.f32 %v5296_v11, %v1944_v54 }
 0x13d   : > { %v2501_v57 = vmul.f32 %v5322_v40, %v2464_v38  ;;  %v2505_v37 = vmul.f32 %v5322_v40, %v2468_v43  ;;  %v2509_v19 = vmul.f32 %v5322_v40, %v2472_v49  ;;  %v2522_v29 = vadd.f32 %v2490_v14, %v2261_v39  ;;  %v2197_v14 = vld [vmem:[#allocation2 + $0x58] sm:$0xff] }
 0x13e   : > { %v2526_v31 = vadd.f32 %v2494_v44, %v2265_v60  ;;  %v2241_v16 = vmul.f32 %v5282_v47, %v5117_v42  ;;  %v2245_v45 = vmul.f32 %v5282_v47, %v5128_v52  ;;  %v2249_v2 = vmul.f32 %v5282_v47, %v5139_v8  ;;  %v2305_v52 = vld [vmem:[#allocation2 + $0x92] sm:$0xff]  ;;  %v1937_v39 = vld [vmem:[#allocation2 + $0x5e] sm:$0xff] }
 0x13f   : > { %v2533_v21 = vadd.f32 %v2501_v57, %v2272_v61  ;;  %v2537_v63 = vadd.f32 %v2505_v37, %v2276_v9  ;;  %v2541_v41 = vadd.f32 %v2509_v19, %v2280_v28  ;;  %v5360_v42 = vadd.f32 %v5348_v23, %v2522_v29  ;;  %v6245_v60 = vld [vmem:[#allocation23_spill] sm:$0xff] }
 0x140   : > { %v5363_v8 = vadd.f32 %v5348_v23, %v2526_v31  ;;  %v2273_v48 = vadd.f32 %v2241_v16, %v2140_v35  ;;  %v2277_v55 = vadd.f32 %v2245_v45, %v2144_v26  ;;  %v2281_v27 = vadd.f32 %v2249_v2, %v2148_v33  ;;  %v5380_v26 = vld [vmem:[%s5885_s7 + $0x2] ss:$0 sm:$0xff] }
 0x141   : > { %v5351_v61 = vadd.f32 %v5348_v23, %v2533_v21  ;;  %v5354_v9 = vadd.f32 %v5348_v23, %v2537_v63  ;;  %v5357_v28 = vadd.f32 %v5348_v23, %v2541_v41  ;;  %2593 = vst [vmem:[#allocation2 + $0x30] sm:$0xff] %v5360_v42  ;;  %v2735_v1 = vmul.f32 %v5373_v4, %v5360_v42  ;;  %v6247_v16 = vld [vmem:[#allocation22_spill] sm:$0xff] }
 0x142   : > { %2597 = vst [vmem:[#allocation2 + $0x50] sm:$0xff] %v5363_v8  ;;  %v2836_v38 = vmul.f32 %v5380_v26, %v5363_v8  ;;  %v2502_v43 = vmul.f32 %v5322_v40, %v2305_v52  ;;  %v2506_v49 = vmul.f32 %v5322_v40, %v5261_v62  ;;  %v2510_v57 = vmul.f32 %v5322_v40, %v2313_v50  ;;  %v2298_v50 = vld [vmem:[#allocation2 + $0x5a] sm:$0xff] }
 0x143   : > { %2604 = vst [vmem:[#allocation2 + $0x88] sm:$0xff] %v5351_v61  ;;  %2608 = vst [vmem:[#allocation2 + $0xa8] sm:$0xff] %v5354_v9  ;;  %v2677_v54 = vmul.f32 %v5253_v51, %v5351_v61  ;;  %v2750_v35 = vmul.f32 %v5373_v4, %v5354_v9  ;;  %v2851_v33 = vmul.f32 %v5380_v26, %v5357_v28  ;;  %v6246_v44 = vand.u32 15, %v6245_v60 }
 0x144   : > { %2612 = vst [vmem:[#allocation2 + $0xc8] sm:$0xff] %v5357_v28  ;;  %v2767_v19 = vadd.f32 %v2735_v1, %v5199_v53  ;;  %v2234_v63 = vmul.f32 %v5282_v47, %v2197_v14  ;;  %v2534_v41 = vadd.f32 %v2502_v43, %v2273_v48  ;;  %v2538_v29 = vadd.f32 %v2506_v49, %v2277_v55  ;;  %v5413_v55 = vld [vmem:[%s5886_s8] ss:$0 sm:$0xff] }
 0x145   : > { %v2782_v37 = vadd.f32 %v2750_v35, %v2677_v54  ;;  %v1969_v21 = vadd.s32 4294967294, %v6246_v44  ;;  %v2542_v31 = vadd.f32 %v2510_v57, %v2281_v27  ;;  %v6248_v45 = vand.u32 15, %v6247_v16  ;;  %v5428_v57 = vld [vmem:[#allocation2 + $0x38] sm:$0xff] }
 0x146   : > { %v2868_v18 = vadd.f32 %v2836_v38, %v2767_v19  ;;  %v2266_v62 = vadd.f32 %v2234_v63, %v5315_v25  ;;  %v5402_v54 = vadd.f32 %v5348_v23, %v2534_v41  ;;  %v5405_v35 = vadd.f32 %v5348_v23, %v2538_v29  ;;  %v1953_v19 = vld [vmem:[#allocation2 + $0xde] sm:$0xff] }
 0x147   : > { %v2330_v2 = vadd.s32 2, %v6248_v45  ;;  %v2883_v52 = vadd.f32 %v2851_v33, %v2782_v37  ;;  %vm2001_vm3 = vcmp.ge.s32.totalorder %v1969_v21, 0  ;;  %v5408_v14 = vadd.f32 %v5348_v23, %v2542_v31  ;;  %v2314_v29 = vld [vmem:[#allocation2 + $0xda] sm:$0xff] }
 0x148   : > { %v2097_v48 = vsel %vm2001_vm3, %v1937_v39, 0.0  ;;  %v2907_v25 = vadd.f32 %v5413_v55, %v2868_v18  ;;  %2605 = vst [vmem:[#allocation2 + $0x90] sm:$0xff] %v5402_v54  ;;  %2609 = vst [vmem:[#allocation2 + $0xb0] sm:$0xff] %v5405_v35  ;;  %v2678_v1 = vmul.f32 %v5253_v51, %v5402_v54  ;;  %v2751_v38 = vmul.f32 %v5373_v4, %v5405_v35  ;;  %v6249_v39 = vld [vmem:[#allocation91_spill] sm:$0xff]  ;;  %v6251_v31 = vld [vmem:[#allocation90_spill] sm:$0xff] }
 0x149   : > { %v2922_v27 = vadd.f32 %v5413_v55, %v2883_v52  ;;  %v2134_v33 = vmul.f32 %v5296_v11, %v2097_v48  ;;  %vm2394_vm4 = vcmp.lt.s32.totalorder %v2330_v2, 16  ;;  %2613 = vst [vmem:[#allocation2 + $0xd0] sm:$0xff] %v5408_v14  ;;  %v2852_v43 = vmul.f32 %v5380_v26, %v5408_v14 }
 0x14a   : > { %v2458_v49 = vsel %vm2394_vm4, %v2298_v50, 0.0  ;;  %3475 = vmatprep.mubr.f32.mxu0 %v2907_v25  ;;  %v2736_v37 = vmul.f32 %v5428_v57, %v5373_v4  ;;  %v6250_v60 = vand.u32 15, %v6249_v39  ;;  %v2242_v21 = vmul.f32 %v5282_v47, %v5120_v34 }
 0x14b   : > { %3497 = vmatmul.mubr.f32.vlgmr.msra.gmra.mrb[0].mxu1 %v2922_v27  ;;  %v2495_v18 = vmul.f32 %v5322_v40, %v2458_v49  ;;  %v2783_v63 = vadd.f32 %v2751_v38, %v2678_v1  ;;  %v2250_v41 = vmul.f32 %v5282_v47, %v5142_v30  ;;  %v6252_v16 = vand.u32 15, %v6251_v31  ;;  %v1938_v27 = vld [vmem:[#allocation2 + $0x66] sm:$0xff] }
 0x14c   : > { %v1985_v44 = vadd.s32 4294967294, %v6250_v60  ;;  %v2752_v2 = vmul.f32 %v5373_v4, %v5243_v12  ;;  %v2768_v50 = vadd.f32 %v2736_v37, %v5199_v53  ;;  %v2274_v48 = vadd.f32 %v2242_v21, %v5334_v56  ;;  %v2299_v30 = vld [vmem:[#allocation2 + $0x62] sm:$0xff] }
 0x14d   : > { %v2346_v45 = vadd.s32 2, %v6252_v16  ;;  %v2527_v52 = vadd.f32 %v2495_v18, %v2266_v62  ;;  %v2884_v25 = vadd.f32 %v2852_v43, %v2783_v63  ;;  %v2282_v1 = vadd.f32 %v2250_v41, %v5337_v32  ;;  %v5445_v38 = vld [vmem:[#allocation2 + $0x40] sm:$0xff] }
 0x14e   : > { %vm2017_vm5 = vcmp.ge.s32.totalorder %v1985_v44, 0  ;;  %v2535_v53 = vadd.f32 %v5226_v7, %v2274_v48  ;;  %v1954_v18 = vld [vmem:[#allocation2 + $0xe6] sm:$0xff]  ;;  %v2135_v37 = vmul.f32 %v5296_v11, %v1938_v27  ;;  %v2235_v32 = vmul.f32 %v5282_v47, %v5101_v3 }
 0x14f   : > { %v2113_v34 = vsel %vm2017_vm5, %v1953_v19, 0.0  ;;  %vm2410_vm6 = vcmp.lt.s32.totalorder %v2346_v45, 16  ;;  %v5448_v49 = vadd.f32 %v5348_v23, %v2527_v52  ;;  %v2923_v56 = vadd.f32 %v5413_v55, %v2884_v25  ;;  %v2315_v19 = vld [vmem:[#allocation2 + $0xe2] sm:$0xff] }
 0x150   : > { %v2150_v39 = vmul.f32 %v5296_v11, %v2113_v34  ;;  %v2474_v62 = vsel %vm2410_vm6, %v2314_v29, 0.0  ;;  %v5461_v44 = vadd.f32 %v5348_v23, %v2535_v53  ;;  %v2496_v7 = vmul.f32 %v5322_v40, %v2299_v30  ;;  %v6253_v45 = vld [vmem:[#allocation99_spill] sm:$0xff]  ;;  %v6254_v30 = vld [vmem:[#allocation76_spill] sm:$0xff] }
 0x151   : > { %v2511_v43 = vmul.f32 %v5322_v40, %v2474_v62  ;;  %2598 = vst [vmem:[#allocation2 + $0x58] sm:$0xff] %v5448_v49  ;;  %v2837_v60 = vmul.f32 %v5380_v26, %v5448_v49  ;;  %v2737_v21 = vmul.f32 %v5373_v4, %v5445_v38  ;;  %3499 = vmatprep.mubr.f32.mxu1 %v2923_v56  ;;  %v6255_v62 = vand.u32 15, %v6254_v30 }
 0x152   : > { %v2267_v41 = vadd.f32 %v2235_v32, %v2134_v33  ;;  %v2151_v29 = vmul.f32 %v5296_v11, %v1954_v18  ;;  %v2251_v3 = vmul.f32 %v5282_v47, %v5145_v46  ;;  %2606 = vst [vmem:[#allocation2 + $0x98] sm:$0xff] %v5461_v44  ;;  %v2679_v16 = vmul.f32 %v5253_v51, %v5461_v44 }
 0x153   : > { %v2543_v63 = vadd.f32 %v2511_v43, %v2282_v1  ;;  %v2869_v31 = vadd.f32 %v2837_v60, %v2768_v50  ;;  %v2769_v52 = vadd.f32 %v2737_v21, %v6253_v45  ;;  %v2512_v48 = vmul.f32 %v5322_v40, %v2315_v19  ;;  %v1939_v1 = vld [vmem:[#allocation2 + $0x6e] sm:$0xff] }
 0x154   : > { %v2528_v25 = vadd.f32 %v2496_v7, %v2267_v41  ;;  %v2283_v33 = vadd.f32 %v2251_v3, %v2150_v39  ;;  %v2753_v34 = vmul.f32 %v5373_v4, %v5247_v0  ;;  %v2784_v50 = vadd.f32 %v2752_v2, %v2679_v16  ;;  %v2300_v19 = vld [vmem:[#allocation2 + $0x6a] sm:$0xff] }
 0x155   : > { %v5475_v27 = vadd.f32 %v5348_v23, %v2543_v63  ;;  %v2908_v46 = vadd.f32 %v5413_v55, %v2869_v31  ;;  %v1971_v53 = vadd.s32 4294967294, %v6255_v62  ;;  %v2236_v18 = vmul.f32 %v5282_v47, %v5104_v15  ;;  %v6256_v60 = vld [vmem:[#allocation24_spill] sm:$0xff] }
 0x156   : > { %v5488_v39 = vadd.f32 %v5348_v23, %v2528_v25  ;;  %v2544_v43 = vadd.f32 %v2512_v48, %v2283_v33  ;;  %v2785_v32 = vadd.f32 %v2753_v34, %v5264_v22  ;;  %v6257_v7 = vand.u32 15, %v6256_v60  ;;  %v3650_v63 = vld [vmem:[#allocation2 + $0x28] sm:$0xff] }
 0x157   : > { %2614 = vst [vmem:[#allocation2 + $0xd8] sm:$0xff] %v5475_v27  ;;  %v2853_v56 = vmul.f32 %v5380_v26, %v5475_v27  ;;  %3476 = vmatmul.mubr.f32.gmra.mrb[2].mxu0 %v2908_v46  ;;  %vm2003_vm7 = vcmp.ge.s32.totalorder %v1971_v53, 0  ;;  %v2268_v2 = vadd.f32 %v2236_v18, %v2135_v37  ;;  %v2665_v15 = vmul.f32 %v3650_v63, %v5253_v51  ;;  %v1955_v45 = vld [vmem:[#allocation2 + $0xee] sm:$0xff]  ;;  %v6258_v48 = vld [vmem:[#allocation95_spill] sm:$0xff]  ;;  %v1940_v18 = vld [vmem:[#allocation2 + $0x76] sm:$0xff] }
 0x158   : > { %v2332_v21 = vadd.s32 2, %v6257_v7  ;;  %2599 = vst [vmem:[#allocation2 + $0x60] sm:$0xff] %v5488_v39  ;;  %v2838_v3 = vmul.f32 %v5380_v26, %v5488_v39  ;;  %v5498_v31 = vadd.f32 %v5348_v23, %v2544_v43  ;;  %v2099_v22 = vsel %vm2003_vm7, %v1939_v1, 0.0  ;;  %v6260_v7 = vld [vmem:[#allocation92_spill] sm:$0xff] }
 0x159   : > { %v2885_v41 = vadd.f32 %v2853_v56, %v2784_v50  ;;  %v2136_v16 = vmul.f32 %v5296_v11, %v2099_v22  ;;  %v2738_v37 = vmul.f32 %v5373_v4, %v5291_v10  ;;  %v6259_v25 = vand.u32 15, %v6258_v48 }
 0x15a   : > { %vm2396_vm8 = vcmp.lt.s32.totalorder %v2332_v21, 16  ;;  %v2870_v46 = vadd.f32 %v2838_v3, %v2769_v52  ;;  %2615 = vst [vmem:[#allocation2 + $0xe0] sm:$0xff] %v5498_v31  ;;  %v2854_v50 = vmul.f32 %v5380_v26, %v5498_v31  ;;  %v2252_v53 = vmul.f32 %v5282_v47, %v5151_v6  ;;  %v2316_v52 = vld [vmem:[#allocation2 + $0xea] sm:$0xff] }
 0x15b   : > { %v1987_v33 = vadd.s32 4294967294, %v6259_v25  ;;  %v2924_v34 = vadd.f32 %v5413_v55, %v2885_v41  ;;  %v2460_v30 = vsel %vm2396_vm8, %v2300_v19, 0.0  ;;  %v2770_v62 = vadd.f32 %v2738_v37, %v2665_v15  ;;  %v2301_v41 = vld [vmem:[#allocation2 + $0x72] sm:$0xff] }
 0x15c   : > { %v2497_v1 = vmul.f32 %v5322_v40, %v2460_v30  ;;  %v2909_v56 = vadd.f32 %v5413_v55, %v2870_v46  ;;  %v2886_v43 = vadd.f32 %v2854_v50, %v2785_v32  ;;  %v6261_v21 = vand.u32 15, %v6260_v7 }
 0x15d   : > { %vm2019_vm9 = vcmp.ge.s32.totalorder %v1987_v33, 0  ;;  %3500 = vmatmul.mubr.f32.gmra.mrb[2].mxu1 %v2924_v34  ;;  %v2284_v22 = vadd.f32 %v2252_v53, %v2151_v29  ;;  %v2681_v15 = vmul.f32 %v5253_v51, %v5354_v9  ;;  %v2754_v32 = vmul.f32 %v5373_v4, %v5357_v28  ;;  %v2317_v33 = vld [vmem:[#allocation2 + $0xf2] sm:$0xff] }
 0x15e   : > { %v2115_v60 = vsel %vm2019_vm9, %v1955_v45, 0.0  ;;  %v2348_v63 = vadd.s32 2, %v6261_v21  ;;  %v2529_v3 = vadd.f32 %v2497_v1, %v2268_v2  ;;  %3478 = vmatprep.mubr.f32.mxu0 %v2909_v56  ;;  %v2925_v6 = vadd.f32 %v5413_v55, %v2886_v43  ;;  %v1956_v45 = vld [vmem:[#allocation2 + $0xf6] sm:$0xff] }
 0x15f   : > { %v2152_v19 = vmul.f32 %v5296_v11, %v2115_v60  ;;  %v2137_v37 = vmul.f32 %v5296_v11, %v1940_v18  ;;  %v2237_v29 = vmul.f32 %v5282_v47, %v5107_v17  ;;  %v2498_v25 = vmul.f32 %v5322_v40, %v2301_v41 }
 0x160   : > { %vm2412_vm10 = vcmp.lt.s32.totalorder %v2348_v63, 16  ;;  %v5523_v48 = vadd.f32 %v5348_v23, %v2529_v3  ;;  %3502 = vmatprep.mubr.f32.mxu1 %v2925_v6  ;;  %v2786_v46 = vadd.f32 %v2754_v32, %v2681_v15  ;;  %v2666_v50 = vmul.f32 %v5253_v51, %v5360_v42 }
 0x161   : > { %v2476_v2 = vsel %vm2412_vm10, %v2316_v52, 0.0  ;;  %v2739_v30 = vmul.f32 %v5373_v4, %v5363_v8  ;;  %v2269_v53 = vadd.f32 %v2237_v29, %v2136_v16  ;;  %v2153_v17 = vmul.f32 %v5296_v11, %v1956_v45  ;;  %v1957_v45 = vld [vmem:[#allocation2 + $0xfe] sm:$0xff] }
 0x162   : > { %v2513_v34 = vmul.f32 %v5322_v40, %v2476_v2  ;;  %2600 = vst [vmem:[#allocation2 + $0x68] sm:$0xff] %v5523_v48  ;;  %v2839_v1 = vmul.f32 %v5380_v26, %v5523_v48  ;;  %v2253_v18 = vmul.f32 %v5282_v47, %v5154_v36  ;;  %v2514_v60 = vmul.f32 %v5322_v40, %v2317_v33  ;;  %v6262_v2 = vld [vmem:[#allocation26_spill] sm:$0xff] }
 0x163   : > { %v2771_v43 = vadd.f32 %v2739_v30, %v2666_v50  ;;  %v2682_v42 = vmul.f32 %v5253_v51, %v5405_v35  ;;  %v2530_v7 = vadd.f32 %v2498_v25, %v2269_v53  ;;  %v2755_v63 = vmul.f32 %v5373_v4, %v5408_v14  ;;  %v6264_v50 = vld [vmem:[#allocation25_spill] sm:$0xff] }
 0x164   : > { %v2545_v56 = vadd.f32 %v2513_v34, %v2284_v22  ;;  %v2871_v52 = vadd.f32 %v2839_v1, %v2770_v62  ;;  %v2285_v21 = vadd.f32 %v2253_v18, %v2152_v19  ;;  %v2238_v41 = vmul.f32 %v5282_v47, %v5110_v59  ;;  %v2318_v18 = vld [vmem:[#allocation2 + $0xfa] sm:$0xff] }
 0x165   : > { %v2667_v36 = vmul.f32 %v5428_v57, %v5253_v51  ;;  %v2740_v3 = vmul.f32 %v5373_v4, %v5448_v49  ;;  %v5555_v62 = vadd.f32 %v5348_v23, %v2530_v7  ;;  %v2787_v15 = vadd.f32 %v2755_v63, %v2682_v42 }
 0x166   : > { %v5545_v16 = vadd.f32 %v5348_v23, %v2545_v56  ;;  %v2910_v22 = vadd.f32 %v5413_v55, %v2871_v52  ;;  %v2546_v19 = vadd.f32 %v2514_v60, %v2285_v21  ;;  %v2270_v32 = vadd.f32 %v2238_v41, %v2137_v37 }
 0x167   : > { %v2772_v59 = vadd.f32 %v2740_v3, %v2667_v36  ;;  %v6263_v57 = vand.u32 15, %v6262_v2  ;;  %2601 = vst [vmem:[#allocation2 + $0x70] sm:$0xff] %v5555_v62  ;;  %v2840_v25 = vmul.f32 %v5380_v26, %v5555_v62  ;;  %v2254_v34 = vmul.f32 %v5282_v47, %v5157_v20 }
 0x168   : > { %2616 = vst [vmem:[#allocation2 + $0xe8] sm:$0xff] %v5545_v16  ;;  %v2855_v6 = vmul.f32 %v5380_v26, %v5545_v16  ;;  %3479 = vmatmul.mubr.f32.gmra.mrb[4].mxu0 %v2910_v22  ;;  %v5566_v33 = vadd.f32 %v5348_v23, %v2546_v19  ;;  %v6265_v30 = vand.u32 15, %v6264_v50  ;;  %v2531_v53 = vadd.f32 %v5210_v24, %v2270_v32 }
 0x169   : > { %v1989_v29 = vadd.s32 4294967294, %v6263_v57  ;;  %v2683_v56 = vmul.f32 %v5253_v51, %v5243_v12  ;;  %v2872_v60 = vadd.f32 %v2840_v25, %v2771_v43  ;;  %v2286_v7 = vadd.f32 %v2254_v34, %v2153_v17 }
 0x16a   : > { %v2350_v37 = vadd.s32 2, %v6265_v30  ;;  %v2887_v1 = vadd.f32 %v2855_v6, %v2786_v46  ;;  %2617 = vst [vmem:[#allocation2 + $0xf0] sm:$0xff] %v5566_v33  ;;  %v2856_v42 = vmul.f32 %v5380_v26, %v5566_v33  ;;  %v5580_v21 = vadd.f32 %v5348_v23, %v2531_v53  ;;  %v1958_v46 = vld [vmem:[#allocation2 + $0x106] sm:$0xff] }
 0x16b   : > { %vm2021_vm11 = vcmp.ge.s32.totalorder %v1989_v29, 0  ;;  %v2911_v63 = vadd.f32 %v5413_v55, %v2872_v60  ;;  %v2756_v36 = vmul.f32 %v5373_v4, %v5475_v27  ;;  %v2668_v22 = vmul.f32 %v5253_v51, %v5445_v38  ;;  %v2319_v6 = vld [vmem:[#allocation2 + $0x102] sm:$0xff]  ;;  %v1959_v60 = vld [vmem:[#allocation2 + $0x10e] sm:$0xff] }
 0x16c   : > { %v2117_v52 = vsel %vm2021_vm11, %v1957_v45, 0.0  ;;  %v2926_v20 = vadd.f32 %v5413_v55, %v2887_v1  ;;  %vm2414_vm12 = vcmp.lt.s32.totalorder %v2350_v37, 16  ;;  %v2888_v41 = vadd.f32 %v2856_v42, %v2787_v15  ;;  %2602 = vst [vmem:[#allocation2 + $0x78] sm:$0xff] %v5580_v21  ;;  %v2219_v37 = vld [vmem:[#allocation2 + $0x108] sm:$0xff] }
 0x16d   : > { %v2154_v24 = vmul.f32 %v5296_v11, %v2117_v52  ;;  %v2478_v43 = vsel %vm2414_vm12, %v2318_v18, 0.0  ;;  %v2841_v17 = vmul.f32 %v5380_v26, %v5580_v21  ;;  %v2741_v19 = vmul.f32 %v5373_v4, %v5488_v39  ;;  %3481 = vmatprep.mubr.f32.mxu0 %v2911_v63  ;;  %v6266_v42 = vld [vmem:[#allocation28_spill] sm:$0xff] }
 0x16e   : > { %3503 = vmatmul.mubr.f32.gmra.mrb[4].mxu1 %v2926_v20  ;;  %v2515_v3 = vmul.f32 %v5322_v40, %v2478_v43  ;;  %v2927_v15 = vadd.f32 %v5413_v55, %v2888_v41  ;;  %v2788_v32 = vadd.f32 %v2756_v36, %v2683_v56  ;;  %v2842_v45 = vmul.f32 %v5380_v26, %v5233_v13  ;;  %v2320_v41 = vld [vmem:[#allocation2 + $0x10a] sm:$0xff] }
 0x16f   : > { %v2155_v2 = vmul.f32 %v5296_v11, %v1958_v46  ;;  %v2873_v57 = vadd.f32 %v2841_v17, %v2772_v59  ;;  %v2773_v25 = vadd.f32 %v2741_v19, %v2668_v22  ;;  %v2255_v34 = vmul.f32 %v5282_v47, %v5160_v5  ;;  %v6268_v43 = vld [vmem:[#allocation27_spill] sm:$0xff] }
 0x170   : > { %v2547_v29 = vadd.f32 %v2515_v3, %v2286_v7  ;;  %3505 = vmatprep.mubr.f32.mxu1 %v2927_v15  ;;  %v2516_v38 = vmul.f32 %v5322_v40, %v2319_v6  ;;  %v2684_v50 = vmul.f32 %v5253_v51, %v5247_v0  ;;  %v2757_v30 = vmul.f32 %v5373_v4, %v5498_v31 }
 0x171   : > { %v2669_v13 = vmul.f32 %v5253_v51, %v5291_v10  ;;  %v2912_v59 = vadd.f32 %v5413_v55, %v2873_v57  ;;  %v2874_v53 = vadd.f32 %v2842_v45, %v2773_v25  ;;  %v2287_v5 = vadd.f32 %v2255_v34, %v2154_v24  ;;  %v2220_v25 = vld [vmem:[#allocation2 + $0x110] sm:$0xff] }
 0x172   : > { %v5609_v1 = vadd.f32 %v5348_v23, %v2547_v29  ;;  %v2789_v18 = vadd.f32 %v2757_v30, %v2684_v50  ;;  %v2742_v56 = vmul.f32 %v5373_v4, %v5523_v48  ;;  %v2843_v0 = vmul.f32 %v5380_v26, %v5351_v61  ;;  %v2321_v34 = vld [vmem:[#allocation2 + $0x112] sm:$0xff] }
 0x173   : > { %v6267_v52 = vand.u32 15, %v6266_v42  ;;  %3482 = vmatmul.mubr.f32.gmra.mrb[6].mxu0 %v2912_v59  ;;  %v2913_v20 = vadd.f32 %v5413_v55, %v2874_v53  ;;  %v2548_v24 = vadd.f32 %v2516_v38, %v2287_v5  ;;  %v2256_v46 = vmul.f32 %v5282_v47, %v2219_v37 }
 0x174   : > { %2618 = vst [vmem:[#allocation2 + $0xf8] sm:$0xff] %v5609_v1  ;;  %v2857_v10 = vmul.f32 %v5380_v26, %v5609_v1  ;;  %v2774_v63 = vadd.f32 %v2742_v56, %v2669_v13  ;;  %v6269_v36 = vand.u32 15, %v6268_v43  ;;  %v2685_v3 = vmul.f32 %v5253_v51, %v5357_v28 }
 0x175   : > { %v1991_v7 = vadd.s32 4294967294, %v6267_v52  ;;  %3484 = vmatprep.mubr.f32.mxu0 %v2913_v20  ;;  %v5627_v19 = vadd.f32 %v5348_v23, %v2548_v24  ;;  %v2288_v15 = vadd.f32 %v2256_v46, %v2155_v2  ;;  %v2758_v29 = vmul.f32 %v5373_v4, %v5545_v16 }
 0x176   : > { %v2352_v17 = vadd.s32 2, %v6269_v36  ;;  %v2889_v22 = vadd.f32 %v2857_v10, %v2788_v32  ;;  %v2875_v45 = vadd.f32 %v2843_v0, %v2774_v63  ;;  %v2670_v2 = vmul.f32 %v5253_v51, %v5363_v8 }
 0x177   : > { %vm2023_vm13 = vcmp.ge.s32.totalorder %v1991_v7, 0  ;;  %2619 = vst [vmem:[#allocation2 + $0x100] sm:$0xff] %v5627_v19  ;;  %v2858_v28 = vmul.f32 %v5380_v26, %v5627_v19  ;;  %v2790_v13 = vadd.f32 %v2758_v29, %v2685_v3  ;;  %v2743_v37 = vmul.f32 %v5373_v4, %v5555_v62  ;;  %v2221_v7 = vld [vmem:[#allocation2 + $0x118] sm:$0xff] }
 0x178   : > { %v2119_v6 = vsel %vm2023_vm13, %v1959_v60, 0.0  ;;  %vm2416_vm14 = vcmp.lt.s32.totalorder %v2352_v17, 16  ;;  %v2928_v38 = vadd.f32 %v5413_v55, %v2889_v22  ;;  %v2914_v50 = vadd.f32 %v5413_v55, %v2875_v45  ;;  %v1960_v60 = vld [vmem:[#allocation2 + $0x116] sm:$0xff]  ;;  %v2809_v22 = vld [vmem:[#allocation2 + $0xa0] sm:$0xff] }
 0x179   : > { %v2156_v57 = vmul.f32 %v5296_v11, %v2119_v6  ;;  %v2480_v32 = vsel %vm2416_vm14, %v2320_v41, 0.0  ;;  %v2890_v59 = vadd.f32 %v2858_v28, %v2789_v18  ;;  %v2844_v53 = vmul.f32 %v5380_v26, %v5402_v54  ;;  %v6270_v45 = vld [vmem:[#allocation29_spill] sm:$0xff] }
 0x17a   : > { %v2517_v30 = vmul.f32 %v5322_v40, %v2480_v32  ;;  %3506 = vmatmul.mubr.f32.gmra.mrb[6].mxu1 %v2928_v38  ;;  %v2257_v5 = vmul.f32 %v5282_v47, %v2220_v25  ;;  %v2518_v56 = vmul.f32 %v5322_v40, %v2321_v34  ;;  %3485 = vmatmul.mubr.f32.gmra.mrb[8].mxu0 %v2914_v50 }
 0x17b   : > { %v2775_v8 = vadd.f32 %v2743_v37, %v2670_v2  ;;  %v2686_v42 = vmul.f32 %v5253_v51, %v5408_v14  ;;  %v2759_v52 = vmul.f32 %v5373_v4, %v5566_v33  ;;  %v2929_v18 = vadd.f32 %v5413_v55, %v2890_v59 }
 0x17c   : > { %v2549_v0 = vadd.f32 %v2517_v30, %v2288_v15  ;;  %v2289_v10 = vadd.f32 %v2257_v5, %v2156_v57  ;;  %v2671_v20 = vmul.f32 %v5253_v51, %v5448_v49  ;;  %v2744_v24 = vmul.f32 %v5373_v4, %v5580_v21  ;;  %v2322_v15 = vld [vmem:[#allocation2 + $0x11a] sm:$0xff] }
 0x17d   : > { %v2876_v63 = vadd.f32 %v2844_v53, %v2775_v8  ;;  %v2791_v41 = vadd.f32 %v2759_v52, %v2686_v42  ;;  %v2845_v14 = vmul.f32 %v5380_v26, %v5461_v44  ;;  %3508 = vmatprep.mubr.f32.mxu1 %v2929_v18  ;;  %v2157_v17 = vmul.f32 %v5296_v11, %v1960_v60 }
 0x17e   : > { %v2588_v46 = vadd.f32 %v5348_v23, %v2549_v0  ;;  %v2550_v43 = vadd.f32 %v2518_v56, %v2289_v10  ;;  %v2776_v36 = vadd.f32 %v2744_v24, %v2671_v20  ;;  %v2258_v3 = vmul.f32 %v5282_v47, %v2221_v7  ;;  %v6272_v0 = vld [vmem:[#allocation64_spill] sm:$0xff] }
 0x17f   : > { %v2915_v6 = vadd.f32 %v5413_v55, %v2876_v63  ;;  %v6271_v57 = vand.u32 15, %v6270_v45  ;;  %v2687_v25 = vmul.f32 %v5253_v51, %v5475_v27  ;;  %v2760_v47 = vmul.f32 %v5373_v4, %v5609_v1 }
 0x180   : > { %2620 = vst [vmem:[#allocation2 + $0x108] sm:$0xff] %v2588_v46  ;;  %v2859_v49 = vmul.f32 %v5380_v26, %v2588_v46  ;;  %v2589_v34 = vadd.f32 %v5348_v23, %v2550_v43  ;;  %v2877_v38 = vadd.f32 %v2845_v14, %v2776_v36  ;;  %v2290_v28 = vadd.f32 %v2258_v3, %v2157_v17 }
 0x181   : > { %v2354_v29 = vadd.s32 2, %v6271_v57  ;;  %3487 = vmatprep.mubr.f32.mxu0 %v2915_v6  ;;  %v2672_v32 = vmul.f32 %v5253_v51, %v5488_v39  ;;  %v2846_v2 = vmul.f32 %v5380_v26, %v2809_v22  ;;  %v2792_v37 = vadd.f32 %v2760_v47, %v2687_v25 }
 0x182   : > { %v2891_v11 = vadd.f32 %v2859_v49, %v2790_v13  ;;  %2621 = vst [vmem:[#allocation2 + $0x110] sm:$0xff] %v2589_v34  ;;  %v2860_v50 = vmul.f32 %v5380_v26, %v2589_v34  ;;  %v2916_v27 = vadd.f32 %v5413_v55, %v2877_v38  ;;  %v2688_v5 = vmul.f32 %v5253_v51, %v5498_v31 }
 0x183   : > { %vm2418_vm15 = vcmp.lt.s32.totalorder %v2354_v29, 16  ;;  %v2777_v13 = vadd.f32 %v5259_v58, %v2672_v32  ;;  %v2761_v39 = vmul.f32 %v5373_v4, %v5627_v19  ;;  %v2862_v8 = vmul.f32 %v5380_v26, %v6272_v0  ;;  %v6273_v32 = vld [vmem:[#allocation31_spill] sm:$0xff] }
 0x184   : > { %v2482_v30 = vsel %vm2418_vm15, %v2322_v15, 0.0  ;;  %v2930_v59 = vadd.f32 %v5413_v55, %v2891_v11  ;;  %v2892_v56 = vadd.f32 %v2860_v50, %v2791_v41  ;;  %3488 = vmatmul.mubr.f32.gmra.mrb[10].mxu0 %v2916_v27  ;;  %v2673_v60 = vmul.f32 %v5253_v51, %v5523_v48  ;;  %v6274_v50 = vld [vmem:[#allocation30_spill] sm:$0xff] }
 0x185   : > { %v2519_v53 = vmul.f32 %v5322_v40, %v2482_v30  ;;  %v2878_v52 = vadd.f32 %v2846_v2, %v2777_v13  ;;  %v2746_v58 = vmul.f32 %v5373_v4, %v5351_v61  ;;  %v2847_v40 = vmul.f32 %v5380_v26, %v5354_v9 }
 0x186   : > { %3509 = vmatmul.mubr.f32.gmra.mrb[8].mxu1 %v2930_v59  ;;  %v2931_v31 = vadd.f32 %v5413_v55, %v2892_v56  ;;  %v2793_v7 = vadd.f32 %v2761_v39, %v2688_v5  ;;  %v2689_v19 = vmul.f32 %v5253_v51, %v5545_v16  ;;  %v2762_v18 = vmul.f32 %v5373_v4, %v2588_v46  ;;  %v6276_v5 = vld [vmem:[#allocation53_spill] sm:$0xff] }
 0x187   : > { %v2551_v42 = vadd.f32 %v2519_v53, %v2290_v28  ;;  %v2917_v48 = vadd.f32 %v5413_v55, %v2878_v52  ;;  %v2778_v20 = vadd.f32 %v2746_v58, %v2673_v60  ;;  %v2674_v24 = vmul.f32 %v5253_v51, %v5555_v62  ;;  %v6275_v53 = vld [vmem:[#allocation54_spill] sm:$0xff]  ;;  %v6278_v58 = vld [vmem:[#allocation32_spill] sm:$0xff] }
 0x188   : > { %3511 = vmatprep.mubr.f32.mxu1 %v2931_v31  ;;  %v2894_v61 = vadd.f32 %v2862_v8, %v2793_v7  ;;  %v2794_v63 = vadd.f32 %v2762_v18, %v2689_v19  ;;  %v2747_v9 = vmul.f32 %v5373_v4, %v5402_v54  ;;  %v2848_v41 = vmul.f32 %v5380_v26, %v5405_v35 }
 0x189   : > { %v2590_v10 = vadd.f32 %v5348_v23, %v2551_v42  ;;  %3490 = vmatprep.mubr.f32.mxu0 %v2917_v48  ;;  %v2879_v23 = vadd.f32 %v2847_v40, %v2778_v20  ;;  %v2690_v46 = vmul.f32 %v5253_v51, %v5566_v33  ;;  %v2763_v14 = vmul.f32 %v5373_v4, %v2589_v34  ;;  %v6277_v42 = vld [vmem:[#allocation33_spill] sm:$0xff]  ;;  %v6280_v20 = vld [vmem:[#allocation55_spill] sm:$0xff] }
 0x18a   : > { %v2895_v62 = vadd.f32 %v2862_v8, %v2794_v63  ;;  %v2779_v43 = vadd.f32 %v2747_v9, %v2674_v24  ;;  %v2675_v36 = vmul.f32 %v5253_v51, %v5580_v21  ;;  %v2748_v35 = vmul.f32 %v5373_v4, %v5461_v44 }
 0x18b   : > { %2622 = vst [vmem:[#allocation2 + $0x118] sm:$0xff] %v2590_v10  ;;  %v2861_v16 = vmul.f32 %v5380_v26, %v2590_v10  ;;  %v2918_v54 = vadd.f32 %v5413_v55, %v2879_v23  ;;  %v2795_v3 = vadd.f32 %v2763_v14, %v2690_v46  ;;  %v2933_v22 = vadd.f32 %v5413_v55, %v2894_v61  ;;  %v6282_v46 = vld [vmem:[#allocation34_spill] sm:$0xff] }
 0x18c   : > { %v2880_v49 = vadd.f32 %v2848_v41, %v2779_v43  ;;  %v2849_v33 = vmul.f32 %v5380_v26, %v5243_v12  ;;  %v2691_v6 = vmul.f32 %v5253_v51, %v5609_v1  ;;  %v2780_v45 = vadd.f32 %v2748_v35, %v2675_v36  ;;  %v6284_v35 = vld [vmem:[#allocation57_spill] sm:$0xff] }
 0x18d   : > { %v2893_v17 = vadd.f32 %v2861_v16, %v2792_v37  ;;  %3491 = vmatmul.mubr.f32.gmra.mrb[12].mxu0 %v2918_v54  ;;  %v2896_v21 = vadd.f32 %v2862_v8, %v2795_v3  ;;  %v2764_v57 = vmul.f32 %v5373_v4, %v2590_v10  ;;  %v2934_v44 = vadd.f32 %v5413_v55, %v2895_v62  ;;  %v5725_v4 = vld [vmem:[%s5888_s10] ss:$0 sm:$0xff]  ;;  %v6279_v10 = vld [vmem:[#allocation56_spill] sm:$0xff]  ;;  %v6281_v16 = vld [vmem:[#allocation35_spill] sm:$0xff] }
 0x18e   : > { %v2919_v29 = vadd.f32 %v5413_v55, %v2880_v49  ;;  %v2881_v25 = vadd.f32 %v2849_v33, %v2780_v45  ;;  %v6283_v54 = vld [vmem:[#allocation58_spill] sm:$0xff] }
 0x18f   : > { %v2932_v15 = vadd.f32 %v5413_v55, %v2893_v17  ;;  %v2796_v34 = vadd.f32 %v2764_v57, %v2691_v6  ;;  %v2935_v12 = vadd.f32 %v5413_v55, %v2896_v21  ;;  %v6285_v21 = vld [vmem:[#allocation37_spill] sm:$0xff]  ;;  %v6286_v57 = vld [vmem:[#allocation36_spill] sm:$0xff] }
 0x190   : > { %3493 = vmatprep.mubr.f32.mxu0 %v2919_v29  ;;  %v2920_v51 = vadd.f32 %v5413_v55, %v2881_v25 }
 0x191   : > { %3512 = vmatmul.mubr.f32.gmra.mrb[10].mxu1 %v2932_v15  ;;  %v2897_v26 = vadd.f32 %v2862_v8, %v2796_v34 }
 0x192   : > { %3514 = vmatprep.mubr.f32.mxu1 %v2933_v22  ;;  %3494 = vmatmul.mubr.f32.gmra.mrb[14].mxu0 %v2920_v51 }
 0x193   : > { %v2936_v1 = vadd.f32 %v5413_v55, %v2897_v26 }
 0x195   : > { %3515 = vmatmul.mubr.f32.gmra.mrb[12].mxu1 %v2934_v44 }
 0x196   : > { %3517 = vmatprep.mubr.f32.mxu1 %v2935_v12 }
 0x199   : > { %3518 = vmatmul.mubr.f32.gmra.mrb[14].mxu1 %v2936_v1 }
 0x20f   : > { %v3474_v38 = vpop.f32.mrb[0].mxu0 }
 0x210   : > { %v3032_v28 = vadd.f32 %v3474_v38, %v5725_v4  ;;  %v3026_v47 = vpop.f32.mrb[1].mxu0  ;;  %v6287_v38 = vld [vmem:[#allocation60_spill] sm:$0xff] }
 0x211   : > { %v3027_v11 = vadd.f32 %v5725_v4, %v3026_v47 }
 0x212   : > { %v3186_v2 = vmul.f32 %v3032_v28, %v6273_v32 }
 0x213   : > { %v3185_v27 = vmul.f32 %v3027_v11, %v6274_v50  ;;  %v6288_v11 = vld [vmem:[#allocation59_spill] sm:$0xff] }
 0x214   : > { %3218 = vst [vmem:[%s5733_s27 + $0x8] sm:$0xff] %v3186_v2  ;;  %v6289_v2 = vld [vmem:[#allocation39_spill] sm:$0xff] }
 0x215   : > { %3217 = vst [vmem:[%s5733_s27] sm:$0xff] %v3185_v27  ;;  %v6290_v27 = vld [vmem:[#allocation38_spill] sm:$0xff] }
 0x21e   : > { %v3498_v55 = vpop.f32.mrb[0].mxu1 }
 0x21f   : > { %v3112_v30 = vadd.f32 %v3498_v55, %v5725_v4  ;;  %v3106_v37 = vpop.f32.mrb[1].mxu1 }
 0x220   : > { %v3107_v59 = vadd.f32 %v5725_v4, %v3106_v37 }
 0x221   : > { %v3202_v13 = vmul.f32 %v3112_v30, %v6275_v53 }
 0x222   : > { %v3201_v56 = vmul.f32 %v3107_v59, %v6276_v5 }
 0x223   : > { %3234 = vst [vmem:[%s5733_s27 + $0x88] sm:$0xff] %v3202_v13 }
 0x224   : > { %3233 = vst [vmem:[%s5733_s27 + $0x80] sm:$0xff] %v3201_v56 }
 0x22a   : > { %v3477_v39 = vpop.f32.mrb[2].mxu0 }
 0x22b   : > { %v3042_v0 = vadd.f32 %v3477_v39, %v5725_v4  ;;  %v3036_v8 = vpop.f32.mrb[3].mxu0 }
 0x22c   : > { %v3037_v60 = vadd.f32 %v5725_v4, %v3036_v8 }
 0x22d   : > { %v3188_v52 = vmul.f32 %v3042_v0, %v6277_v42  ;;  %v6291_v0 = vld [vmem:[#allocation47_spill] sm:$0xff] }
 0x22e   : > { %v3187_v40 = vmul.f32 %v3037_v60, %v6278_v58  ;;  %v6292_v60 = vld [vmem:[#allocation62_spill] sm:$0xff] }
 0x22f   : > { %3220 = vst [vmem:[%s5733_s27 + $0x18] sm:$0xff] %v3188_v52  ;;  %v6293_v52 = vld [vmem:[#allocation40_spill] sm:$0xff] }
 0x230   : > { %v3501_v31 = vpop.f32.mrb[2].mxu1  ;;  %3219 = vst [vmem:[%s5733_s27 + $0x10] sm:$0xff] %v3187_v40  ;;  %v6294_v40 = vld [vmem:[#allocation61_spill] sm:$0xff] }
 0x231   : > { %v3122_v7 = vadd.f32 %v3501_v31, %v5725_v4  ;;  %v3116_v19 = vpop.f32.mrb[3].mxu1 }
 0x232   : > { %v3117_v18 = vadd.f32 %v5725_v4, %v3116_v19 }
 0x233   : > { %v3204_v48 = vmul.f32 %v3122_v7, %v6279_v10 }
 0x234   : > { %v3203_v24 = vmul.f32 %v3117_v18, %v6280_v20 }
 0x235   : > { %3236 = vst [vmem:[%s5733_s27 + $0x98] sm:$0xff] %v3204_v48 }
 0x236   : > { %3235 = vst [vmem:[%s5733_s27 + $0x90] sm:$0xff] %v3203_v24 }
 0x23b   : > { %v3480_v61 = vpop.f32.mrb[4].mxu0 }
 0x23c   : > { %v3052_v63 = vadd.f32 %v3480_v61, %v5725_v4  ;;  %v3046_v9 = vpop.f32.mrb[5].mxu0  ;;  %v6295_v61 = vld [vmem:[#allocation50_spill] sm:$0xff] }
 0x23d   : > { %v3047_v41 = vadd.f32 %v5725_v4, %v3046_v9 }
 0x23e   : > { %v3190_v23 = vmul.f32 %v3052_v63, %v6281_v16 }
 0x23f   : > { %v3189_v14 = vmul.f32 %v3047_v41, %v6282_v46  ;;  %v6296_v41 = vld [vmem:[#allocation48_spill] sm:$0xff] }
 0x240   : > { %3222 = vst [vmem:[%s5733_s27 + $0x28] sm:$0xff] %v3190_v23  ;;  %v6297_v23 = vld [vmem:[#allocation42_spill] sm:$0xff] }
 0x241   : > { %v3504_v62 = vpop.f32.mrb[4].mxu1  ;;  %3221 = vst [vmem:[%s5733_s27 + $0x20] sm:$0xff] %v3189_v14  ;;  %v6298_v14 = vld [vmem:[#allocation41_spill] sm:$0xff] }
 0x242   : > { %v3132_v43 = vadd.f32 %v3504_v62, %v5725_v4  ;;  %v3126_v36 = vpop.f32.mrb[5].mxu1 }
 0x243   : > { %v3127_v17 = vadd.f32 %v5725_v4, %v3126_v36 }
 0x244   : > { %v3206_v3 = vmul.f32 %v3132_v43, %v6283_v54 }
 0x245   : > { %v3205_v22 = vmul.f32 %v3127_v17, %v6284_v35 }
 0x246   : > { %3238 = vst [vmem:[%s5733_s27 + $0xa8] sm:$0xff] %v3206_v3  ;;  %v3483_v49 = vpop.f32.mrb[6].mxu0 }
 0x247   : > { %3237 = vst [vmem:[%s5733_s27 + $0xa0] sm:$0xff] %v3205_v22  ;;  %v3062_v33 = vadd.f32 %v3483_v49, %v5725_v4  ;;  %v3056_v6 = vpop.f32.mrb[7].mxu0 }
 0x248   : > { %v3057_v15 = vadd.f32 %v5725_v4, %v3056_v6 }
 0x249   : > { %v3192_v45 = vmul.f32 %v3062_v33, %v6285_v21  ;;  %v6299_v33 = vld [vmem:[#allocation44_spill] sm:$0xff] }
 0x24a   : > { %v3191_v29 = vmul.f32 %v3057_v15, %v6286_v57  ;;  %v6300_v15 = vld [vmem:[#allocation52_spill] sm:$0xff] }
 0x24b   : > { %3224 = vst [vmem:[%s5733_s27 + $0x38] sm:$0xff] %v3192_v45  ;;  %v6301_v45 = vld [vmem:[#allocation43_spill] sm:$0xff] }
 0x24c   : > { %3223 = vst [vmem:[%s5733_s27 + $0x30] sm:$0xff] %v3191_v29 }
 0x24d   : > { %v3507_v44 = vpop.f32.mrb[6].mxu1  ;;  %v3486_v12 = vpop.f32.mrb[8].mxu0 }
 0x24e   : > { %v3142_v25 = vadd.f32 %v3507_v44, %v5725_v4  ;;  %v3136_v34 = vpop.f32.mrb[7].mxu1  ;;  %v3072_v26 = vadd.f32 %v3486_v12, %v5725_v4  ;;  %v3066_v1 = vpop.f32.mrb[9].mxu0  ;;  %v6302_v44 = vld [vmem:[#allocation51_spill] sm:$0xff] }
 0x24f   : > { %v3137_v51 = vadd.f32 %v5725_v4, %v3136_v34  ;;  %v3067_v47 = vadd.f32 %v5725_v4, %v3066_v1 }
 0x250   : > { %v3208_v28 = vmul.f32 %v3142_v25, %v6287_v38  ;;  %v3194_v50 = vmul.f32 %v3072_v26, %v6289_v2  ;;  %v6304_v26 = vld [vmem:[#allocation46_spill] sm:$0xff]  ;;  %v6306_v38 = vld [vmem:[#allocation45_spill] sm:$0xff] }
 0x251   : > { %v3207_v32 = vmul.f32 %v3137_v51, %v6288_v11  ;;  %v3193_v55 = vmul.f32 %v3067_v47, %v6290_v27 }
 0x252   : > { %3240 = vst [vmem:[%s5733_s27 + $0xb8] sm:$0xff] %v3208_v28  ;;  %3226 = vst [vmem:[%s5733_s27 + $0x48] sm:$0xff] %v3194_v50 }
 0x253   : > { %3239 = vst [vmem:[%s5733_s27 + $0xb0] sm:$0xff] %v3207_v32  ;;  %3225 = vst [vmem:[%s5733_s27 + $0x40] sm:$0xff] %v3193_v55 }
 0x257   : > { %v3489_v30 = vpop.f32.mrb[10].mxu0 }
 0x258   : > { %v3082_v59 = vadd.f32 %v3489_v30, %v5725_v4  ;;  %v3076_v53 = vpop.f32.mrb[11].mxu0 }
 0x259   : > { %v3510_v37 = vpop.f32.mrb[8].mxu1  ;;  %v3077_v56 = vadd.f32 %v5725_v4, %v3076_v53 }
 0x25a   : > { %v3152_v13 = vadd.f32 %v3510_v37, %v5725_v4  ;;  %v3146_v5 = vpop.f32.mrb[9].mxu1  ;;  %v3196_v8 = vmul.f32 %v3082_v59, %v6291_v0 }
 0x25b   : > { %v3147_v39 = vadd.f32 %v5725_v4, %v3146_v5  ;;  %v3195_v58 = vmul.f32 %v3077_v56, %v6293_v52 }
 0x25c   : > { %v3210_v42 = vmul.f32 %v3152_v13, %v6292_v60  ;;  %3228 = vst [vmem:[%s5733_s27 + $0x58] sm:$0xff] %v3196_v8 }
 0x25d   : > { %v3209_v31 = vmul.f32 %v3147_v39, %v6294_v40  ;;  %3227 = vst [vmem:[%s5733_s27 + $0x50] sm:$0xff] %v3195_v58 }
 0x25e   : > { %3242 = vst [vmem:[%s5733_s27 + $0xc8] sm:$0xff] %v3210_v42 }
 0x25f   : > { %3241 = vst [vmem:[%s5733_s27 + $0xc0] sm:$0xff] %v3209_v31 }
 0x260   : > { %v3492_v7 = vpop.f32.mrb[12].mxu0 }
 0x261   : > { %v3092_v19 = vadd.f32 %v3492_v7, %v5725_v4  ;;  %v3086_v18 = vpop.f32.mrb[13].mxu0 }
 0x262   : > { %v3087_v48 = vadd.f32 %v5725_v4, %v3086_v18 }
 0x263   : > { %v3198_v63 = vmul.f32 %v3092_v19, %v6295_v61 }
 0x264   : > { %v3513_v10 = vpop.f32.mrb[10].mxu1  ;;  %v3197_v16 = vmul.f32 %v3087_v48, %v6296_v41 }
 0x265   : > { %v3162_v20 = vadd.f32 %v3513_v10, %v5725_v4  ;;  %v3156_v24 = vpop.f32.mrb[11].mxu1  ;;  %3230 = vst [vmem:[%s5733_s27 + $0x68] sm:$0xff] %v3198_v63  ;;  %v3495_v36 = vpop.f32.mrb[14].mxu0 }
 0x266   : > { %v3157_v9 = vadd.f32 %v5725_v4, %v3156_v24  ;;  %3229 = vst [vmem:[%s5733_s27 + $0x60] sm:$0xff] %v3197_v16  ;;  %v3102_v3 = vadd.f32 %v3495_v36, %v5725_v4  ;;  %v3096_v35 = vpop.f32.mrb[15].mxu0 }
 0x267   : > { %v3212_v46 = vmul.f32 %v3162_v20, %v6297_v23  ;;  %v3097_v49 = vadd.f32 %v5725_v4, %v3096_v35 }
 0x268   : > { %v3211_v62 = vmul.f32 %v3157_v9, %v6298_v14  ;;  %v3516_v43 = vpop.f32.mrb[12].mxu1  ;;  %v3200_v21 = vmul.f32 %v3102_v3, %v6300_v15 }
 0x269   : > { %3244 = vst [vmem:[%s5733_s27 + $0xd8] sm:$0xff] %v3212_v46  ;;  %v3172_v17 = vadd.f32 %v3516_v43, %v5725_v4  ;;  %v3166_v54 = vpop.f32.mrb[13].mxu1  ;;  %v3199_v25 = vmul.f32 %v3097_v49, %v6302_v44 }
 0x26a   : > { %3243 = vst [vmem:[%s5733_s27 + $0xd0] sm:$0xff] %v3211_v62  ;;  %v3167_v22 = vadd.f32 %v5725_v4, %v3166_v54  ;;  %3232 = vst [vmem:[%s5733_s27 + $0x78] sm:$0xff] %v3200_v21 }
 0x26b   : > { %v3214_v6 = vmul.f32 %v3172_v17, %v6299_v33  ;;  %3231 = vst [vmem:[%s5733_s27 + $0x70] sm:$0xff] %v3199_v25 }
 0x26c   : > { %v3213_v57 = vmul.f32 %v3167_v22, %v6301_v45  ;;  %v3519_v29 = vpop.f32.mrb[14].mxu1 }
 0x26d   : > { %3246 = vst [vmem:[%s5733_s27 + $0xe8] sm:$0xff] %v3214_v6  ;;  %v3182_v34 = vadd.f32 %v3519_v29, %v5725_v4  ;;  %v3176_v12 = vpop.f32.mrb[15].mxu1 }
 0x26e   : > { %3245 = vst [vmem:[%s5733_s27 + $0xe0] sm:$0xff] %v3213_v57  ;;  %v3177_v51 = vadd.f32 %v5725_v4, %v3176_v12 }
 0x26f   : > { %v3216_v1 = vmul.f32 %v3182_v34, %v6304_v26 }
 0x270   : > { %v3215_v28 = vmul.f32 %v3177_v51, %v6306_v38 }
 0x271   : > { %3248 = vst [vmem:[%s5733_s27 + $0xf8] sm:$0xff] %v3216_v1 }
 0x272   : > { %3247 = vst [vmem:[%s5733_s27 + $0xf0] sm:$0xff] %v3215_v28 }
 0x273   : > { %3750 = shalt.err (!%p3747_p6)
}
 0x274   : > { %s3751_s30 = scalar_lea.hbm %s5829_s12, 4096  ;;  %s3755_s17 = scalar_lea.hbm %s6305_s28, 8192 }
 0x275   : > { %p3752_p12 = scmp.ne.s32.totalorder %s5829_s12, %s3751_s30  ;;  %p3756_p11 = scmp.lt.u32.totalorder %s5829_s12, %s6305_s28 }
 0x276   : > { %p3757_p7 = scmp.lt.u32.totalorder %s3755_s17, %s3751_s30  ;;  %p3759_p8 = scmp.lt.u32.totalorder %s3751_s30, %s5829_s12 }
 0x277   : > { %p3753_p13 = pnand %p3752_p12, %p6307_p4 }
 0x278   : > { %p3758_p3 = por %p3757_p7, %p3756_p11 }
 0x279   : > { %p3754_p1 = pneg %p3753_p13 }
 0x27a   : > { %p3760_p5 = por %p3759_p8, %p3758_p3 }
 0x27c   : > { %p3761_p10 = pnand %p3760_p5, %p3754_p1 }
 0x27e   : > { %3764 = shalt.err (!%p3761_p10)
}
 0x27f   : > { %s3816_s24 = smov 128   ;;  %s3817_s16 = smov 8  }
 0x280   : > { %3578 = dma.vmem_to_hbm [thread:$0]  (%p6307_p4), %s5831_s14, 4096, %s5829_s12, %s3250_s21, %s3816_s24, %s3816_s24, %s3817_s16  }
 0x281 PF: > { %s6308_s1 = sld [smem:[#allocation13_spill]]  ;;  %s6309_s11 = sld [smem:[#allocation18_spill]] }
 0x282   : > { %p6311_p0 = scmp.ge.s32.totalorder %s3807_s20, 2 }
 0x287   : > { %s3278_s29 = sand.u32 1, %s6308_s1   ;;  %p6310_p2 = scmp.ne.s32.totalorder %s6309_s11, 0 }
 0x288   : > { %s3279_s22 = scalar_lea.sflag [#allocation5], %s3278_s29 }
 0x289   : > { %p3592_p9 = pnand %p6311_p0, %p6310_p2 }
 0x28b   : > { %3790 = dma.done.wait (!%p3592_p9), %s3279_s22, 4096  }
 0x28c   : > { %3792 = vsyncadd (!%p3592_p9), %s3279_s22, 4294963200  ;;  %s6312_s20 = sld [smem:[#allocation15_spill]]  ;;  %s6313_s15 = sld [smem:[#allocation14_spill]] }
 0x28d   : > { %s6314_s19 = sld [smem:[#allocation16_spill]]  ;;  %s6315_s17 = smov %s3799_s18 }
 0x292   : > { %p25_p6 = scmp.ge.s32.totalorder %s6312_s20, 4   ;;  %s6316_s18 = smov %s6313_s15 }
 0x294   :  { %27 = sbr.rel (!%p25_p6) target bundleno = 9 (0x9), region = 117 }
 0x29b   :  { %3284 = vsyncpa [#allocation4], 1 }
 0x29c   :  { %3286 = vsyncpa [#allocation4 + $0x1], 1 }
 0x29d   :  { %3287 = vsyncpa [#allocation7], 1 }
 0x29e   :  { %3288 = vsyncpa [#allocation5], 1 }
 0x29f   :  { %3290 = vsyncpa [#allocation5 + $0x1], 1 }

</bundles_post_ra>
